<compile_context>
chip_gen: v7x
topology: tpu7x:2x2x1
jax: 0.10.0
libtpu: 0.0.40
codegen_flags: <defaults>
</compile_context>

<pallas_src>
import functools

import numpy as np

import jax
import jax.numpy as jnp
from jax.experimental import pallas as pl
from jax.experimental.pallas import tpu as pltpu


# ----------------------------------------------------------------------------
# Fused Pallas kernel: conv1 -> conv2 -> fc1 -> (mu | logvar)
# Only 2-D dots (MXU, bf16 in / f32 acc), static aligned-ish slices and
# elementwise epilogues.  No gather matmuls, no reshapes across the lane dim.
# ----------------------------------------------------------------------------
def _vae_encoder_kernel(cols1_ref, mask1_ref, w1_ref, b1_ref, w2_ref, b2_ref,
                        wfc1_ref, bfc1_ref, whead_ref, bhead_ref, out_ref):
    f32, bf16 = jnp.float32, jnp.bfloat16
    B = out_ref.shape[0]
    G = B * 64                      # rows per parity grid: (b, r, c), r,c in 0..7
    HID = wfc1_ref.shape[2]         # 256

    # --- conv1 -----------------------------------------------------------------
    # cols1 rows are ordered (parity p, b, r, c); mask1 zeroes the rows that
    # correspond to conv2's zero padding (relu(bias) there must become 0).
    h1 = jnp.dot(cols1_ref[...], w1_ref[...], preferred_element_type=f32)
    h1 = jnp.maximum(h1 + b1_ref[...], 0.0) * mask1_ref[...]
    h1 = h1.astype(bf16)                                            # [4*G, 32]

    # --- conv2: 16 taps -> 4 shifted accumulators (i//2, j//2) ------------------
    accs = [jnp.zeros((G, 64), f32) for _ in range(4)]
    for i in range(4):
        for j in range(4):
            p = (i % 2) * 2 + (j % 2)                 # which parity grid of h1
            grid_p = h1[p * G:(p + 1) * G, :]         # [G, 32], aligned slice
            k = (i // 2) * 2 + (j // 2)
            accs[k] = accs[k] + jnp.dot(grid_p, w2_ref[i * 4 + j],
                                        preferred_element_type=f32)

    # combine: h2[b, oh, ow] = sum_{r0,c0} A[r0,c0][b, oh+r0, ow+c0]
    parts = []
    for r0 in range(2):
        for c0 in range(2):
            a = accs[r0 * 2 + c0].reshape(B, 8, 8, 64)   # free reshape (8-aligned)
            parts.append(a[:, r0:r0 + 7, c0:c0 + 7, :])  # static slices
    h2 = (parts[0] + parts[1]) + (parts[2] + parts[3])
    h2 = jnp.maximum(h2 + b2_ref[...], 0.0).astype(bf16)            # [B, 7, 7, 64]

    # --- flatten + fc1 ----------------------------------------------------------
    # The PyTorch NCHW flatten is folded into wfc1's prep-time layout
    # (wfc1[s, c, n] = fc1_w[c*49 + s, n]), so fc1 is just 49 per-position dots
    # accumulated in f32 (4 accumulators to break the serial add chain).
    f_acc = [jnp.zeros((B, HID), f32) for _ in range(4)]
    for s in range(49):
        oh, ow = s // 7, s % 7
        xs = h2[:, oh, ow, :]                                        # [B, 64]
        f_acc[s % 4] = f_acc[s % 4] + jnp.dot(xs, wfc1_ref[s],
                                              preferred_element_type=f32)
    hfc = (f_acc[0] + f_acc[1]) + (f_acc[2] + f_acc[3])
    hfc = jnp.maximum(hfc + bfc1_ref[...], 0.0).astype(bf16)        # [B, 256]

    # --- fused (mu | logvar) heads, lane-padded to 128 --------------------------
    out = jnp.dot(hfc, whead_ref[...], preferred_element_type=f32)
    out_ref[...] = (out + bhead_ref[...]).astype(out_ref.dtype)     # [B, 128]


# ----------------------------------------------------------------------------
# Parameter init (deterministic, synthetic — PyTorch-style layouts)
# ----------------------------------------------------------------------------
def init_params(key, latent_dim):
    ks = jax.random.split(key, 10)

    def u(k, shape, fan_in):
        bound = 1.0 / jnp.sqrt(fan_in)
        return jax.random.uniform(k, shape, jnp.float32, -bound, bound)

    p = {}
    p["conv1_w"] = u(ks[0], (32, 1, 4, 4), 1 * 4 * 4)
    p["conv1_b"] = u(ks[1], (32,), 1 * 4 * 4)
    p["conv2_w"] = u(ks[2], (64, 32, 4, 4), 32 * 4 * 4)
    p["conv2_b"] = u(ks[3], (64,), 32 * 4 * 4)
    p["fc1_w"] = u(ks[4], (64 * 7 * 7, 256), 64 * 7 * 7)   # [in, out], NCHW order
    p["fc1_b"] = u(ks[5], (256,), 64 * 7 * 7)
    p["fc_mu_w"] = u(ks[6], (256, latent_dim), 256)
    p["fc_mu_b"] = u(ks[7], (latent_dim,), 256)
    p["fc_logvar_w"] = u(ks[8], (256, latent_dim), 256)
    p["fc_logvar_b"] = u(ks[9], (latent_dim,), 256)
    return p


# ----------------------------------------------------------------------------
# One-time host-side preparation of kernel operands (runs ONCE, outside jit):
#   * conv weights in (kh, kw, cin)-major matmul layout, bf16
#   * conv1 im2col gather indices in "parity grid" row order + validity mask
#   * fc1 weight regrouped per spatial position ([49, 64, 256]) so the NCHW
#     flatten order costs nothing in-kernel
#   * mu/logvar heads fused and lane-padded to 128
# ----------------------------------------------------------------------------
def prepare_params(params, B, latent_dim):
    f32, bf16 = jnp.float32, jnp.bfloat16
    K = 4
    C1, C2 = 32, 64
    H1 = W1 = 14                  # conv1 output spatial
    H2 = W2 = 7                   # conv2 output spatial
    S2 = H2 * W2                  # 49
    HID = params["fc1_b"].shape[0]
    R = 8                         # parity-grid extent (padded 16x16 conv1 out / 2)

    # conv weights -> matmul form
    w1 = jnp.transpose(params["conv1_w"], (2, 3, 1, 0)).reshape(K * K, C1)
    w2 = jnp.transpose(params["conv2_w"], (2, 3, 1, 0)).reshape(K * K, C1, C2)

    # conv1 im2col gather indices.  Row order: ((p*B + b)*8 + r)*8 + c, where the
    # parity grid p=(pr,pc) cell (r, c) holds the zero-padded conv1 output at
    # padded position (2r+pr, 2c+pc), i.e. conv1 output (2r+pr-1, 2c+pc-1).
    n_rows = 4 * B * R * R
    rowB = np.zeros((n_rows, 1), np.int32)
    rowY = np.zeros((n_rows, K * K), np.int32)
    rowX = np.zeros((n_rows, K * K), np.int32)
    mask1 = np.zeros((n_rows, 1), np.float32)
    for pr in range(2):
        for pc in range(2):
            p = pr * 2 + pc
            for b in range(B):
                for r in range(R):
                    for c in range(R):
                        row = ((p * B + b) * R + r) * R + c
                        rowB[row, 0] = b
                        h1i = 2 * r + pr - 1
                        w1i = 2 * c + pc - 1
                        if 0 <= h1i < H1 and 0 <= w1i < W1:
                            mask1[row, 0] = 1.0
                            for di in range(K):
                                for dj in range(K):
                                    rowY[row, di * K + dj] = 2 * h1i + di
                                    rowX[row, di * K + dj] = 2 * w1i + dj
                        # invalid rows keep index 0 and are zeroed by mask1

    # fc1 weight regrouped per spatial position: wfc1[s, c, n] = fc1_w[c*49+s, n]
    wfc1 = jnp.transpose(params["fc1_w"].reshape(C2, S2, HID), (1, 0, 2))

    # fused + lane-padded heads
    n_head = 2 * latent_dim
    N_pad = ((n_head + 127) // 128) * 128
    whead = (jnp.zeros((HID, N_pad), f32)
             .at[:, :latent_dim].set(params["fc_mu_w"])
             .at[:, latent_dim:n_head].set(params["fc_logvar_w"]))
    bhead = (jnp.zeros((N_pad,), f32)
             .at[:latent_dim].set(params["fc_mu_b"])
             .at[latent_dim:n_head].set(params["fc_logvar_b"]))

    prep = dict(
        rowB=jnp.asarray(rowB), rowY=jnp.asarray(rowY), rowX=jnp.asarray(rowX),
        mask1=jnp.asarray(mask1),
        w1=w1.astype(bf16),
        b1=params["conv1_b"].reshape(1, C1).astype(f32),
        w2=w2.astype(bf16),
        b2=params["conv2_b"].reshape(1, C2).astype(f32),
        wfc1=wfc1.astype(bf16),
        bfc1=params["fc1_b"].reshape(1, HID).astype(f32),
        whead=whead.astype(bf16),
        bhead=bhead.reshape(1, N_pad).astype(f32),
    )
    meta = dict(B=B, latent_dim=latent_dim)
    return prep, meta


# ----------------------------------------------------------------------------
# Forward pass: one fused pallas_call.  The only XLA-side work is a tiny
# (8K-element) gather that builds conv1's im2col patches in parity-grid order.
# ----------------------------------------------------------------------------
def vae_encoder_forward(prep, x_nchw, *, B, latent_dim):
    assert x_nchw.shape == (B, 1, 28, 28)

    xp = jnp.pad(x_nchw[:, 0], ((0, 0), (1, 1), (1, 1)))            # [B, 30, 30]
    cols1 = xp[prep["rowB"], prep["rowY"], prep["rowX"]]             # [4*B*64, 16]
    cols1 = cols1.astype(jnp.bfloat16)

    n_pad = prep["whead"].shape[1]
    vmem = pl.BlockSpec(memory_space=pltpu.MemorySpace.VMEM)
    out = pl.pallas_call(
        _vae_encoder_kernel,
        out_shape=jax.ShapeDtypeStruct((B, n_pad), jnp.float32),
        in_specs=[vmem] * 10,
        out_specs=vmem,
    )(cols1, prep["mask1"], prep["w1"], prep["b1"], prep["w2"], prep["b2"],
      prep["wfc1"], prep["bfc1"], prep["whead"], prep["bhead"])

    mu = out[:, :latent_dim]
    logvar = out[:, latent_dim:2 * latent_dim]
    return mu, logvar


# ----------------------------------------------------------------------------
# Plain-XLA f32 reference (mirrors the PyTorch module) for a sanity check.
# ----------------------------------------------------------------------------
def reference_forward(params, x, latent_dim):
    y = jax.lax.conv_general_dilated(
        x, params["conv1_w"], (2, 2), [(1, 1), (1, 1)],
        dimension_numbers=("NCHW", "OIHW", "NCHW"))
    y = jax.nn.relu(y + params["conv1_b"][None, :, None, None])
    y = jax.lax.conv_general_dilated(
        y, params["conv2_w"], (2, 2), [(1, 1), (1, 1)],
        dimension_numbers=("NCHW", "OIHW", "NCHW"))
    y = jax.nn.relu(y + params["conv2_b"][None, :, None, None])
    y = y.reshape(y.shape[0], -1)                                    # NCHW flatten
    h = jax.nn.relu(y @ params["fc1_w"] + params["fc1_b"])
    mu = h @ params["fc_mu_w"] + params["fc_mu_b"]
    logvar = h @ params["fc_logvar_w"] + params["fc_logvar_b"]
    return mu, logvar


if __name__ == "__main__":
    latent_dim = 16
    B = 2

    key = jax.random.PRNGKey(0)
    k_x, k_p = jax.random.split(key)
    # fc1 expects 64*7*7 features -> input must be [B, 1, 28, 28] (MNIST-like)
    x = jax.random.normal(k_x, (B, 1, 28, 28), dtype=jnp.float32)
    params = init_params(k_p, latent_dim)

    prep, meta = prepare_params(params, B, latent_dim)
    fwd = jax.jit(functools.partial(vae_encoder_forward, **meta))

    mu, logvar = fwd(prep, x)
    jax.block_until_ready((mu, logvar))

    assert mu.shape == (B, latent_dim) and logvar.shape == (B, latent_dim)
    assert mu.dtype == jnp.float32 and logvar.dtype == jnp.float32

    # Loose numerical check vs the f32 XLA reference (kernel feeds bf16 to the MXU).
    mu_ref, logvar_ref = reference_forward(params, x, latent_dim)
    err = max(float(jnp.max(jnp.abs(mu - mu_ref))),
              float(jnp.max(jnp.abs(logvar - logvar_ref))))
    assert err < 5e-2, f"max abs err vs reference: {err}"

    print("KERNEL_OK")
</pallas_src>

<mosaic_0001>
module attributes {stable_mosaic.version = 11 : i64} {
  func.func @_vae_encoder_kernel(%arg0: memref<512x16xbf16, #tpu.memory_space<vmem>>, %arg1: memref<512x1xf32, #tpu.memory_space<vmem>>, %arg2: memref<16x32xbf16, #tpu.memory_space<vmem>>, %arg3: memref<1x32xf32, #tpu.memory_space<vmem>>, %arg4: memref<16x32x64xbf16, #tpu.memory_space<vmem>>, %arg5: memref<1x64xf32, #tpu.memory_space<vmem>>, %arg6: memref<49x64x256xbf16, #tpu.memory_space<vmem>>, %arg7: memref<1x256xf32, #tpu.memory_space<vmem>>, %arg8: memref<256x128xbf16, #tpu.memory_space<vmem>>, %arg9: memref<1x128xf32, #tpu.memory_space<vmem>>, %arg10: memref<2x128xf32, #tpu.memory_space<vmem>>) attributes {dimension_semantics = [], scalar_prefetch = 0 : i64, scratch_operands = 0 : i64, tpu.core_type = #tpu.core_type<tc>} {
    %c0 = arith.constant 0 : index
    %c0_0 = arith.constant 0 : index
    %0 = vector.load %arg0[%c0, %c0_0] : memref<512x16xbf16, #tpu.memory_space<vmem>>, vector<512x16xbf16>
    %c0_1 = arith.constant 0 : index
    %c0_2 = arith.constant 0 : index
    %1 = vector.load %arg2[%c0_1, %c0_2] : memref<16x32xbf16, #tpu.memory_space<vmem>>, vector<16x32xbf16>
    %cst = arith.constant dense<0.000000e+00> : vector<512x32xf32>
    %2 = tpu.matmul %0, %1, %cst {dimension_numbers = #tpu.dot_dimension_numbers<[1], [0], [0], [1], [0, 0, 1, 1], [], []>} : vector<512x16xbf16>, vector<16x32xbf16>, vector<512x32xf32> -> vector<512x32xf32>
    %c0_3 = arith.constant 0 : index
    %c0_4 = arith.constant 0 : index
    %3 = vector.load %arg3[%c0_3, %c0_4] : memref<1x32xf32, #tpu.memory_space<vmem>>, vector<1x32xf32>
    %4 = vector.broadcast %3 : vector<1x32xf32> to vector<512x32xf32>
    %5 = arith.addf %2, %4 : vector<512x32xf32>
    %cst_5 = arith.constant 0.000000e+00 : f32
    %6 = vector.broadcast %cst_5 : f32 to vector<512x32xf32>
    %7 = arith.maximumf %5, %6 : vector<512x32xf32>
    %c0_6 = arith.constant 0 : index
    %c0_7 = arith.constant 0 : index
    %8 = vector.load %arg1[%c0_6, %c0_7] : memref<512x1xf32, #tpu.memory_space<vmem>>, vector<512x1xf32>
    %9 = vector.broadcast %8 : vector<512x1xf32> to vector<512x32xf32>
    %10 = arith.mulf %7, %9 : vector<512x32xf32>
    %11 = arith.truncf %10 : vector<512x32xf32> to vector<512x32xbf16>
    %cst_8 = arith.constant 0.000000e+00 : f32
    %12 = vector.broadcast %cst_8 : f32 to vector<128x64xf32>
    %cst_9 = arith.constant 0.000000e+00 : f32
    %13 = vector.broadcast %cst_9 : f32 to vector<128x64xf32>
    %cst_10 = arith.constant 0.000000e+00 : f32
    %14 = vector.broadcast %cst_10 : f32 to vector<128x64xf32>
    %cst_11 = arith.constant 0.000000e+00 : f32
    %15 = vector.broadcast %cst_11 : f32 to vector<128x64xf32>
    %16 = vector.extract_strided_slice %11 {offsets = [0, 0], sizes = [128, 32], strides = [1, 1]} : vector<512x32xbf16> to vector<128x32xbf16>
    %c0_12 = arith.constant 0 : index
    %c0_13 = arith.constant 0 : index
    %c0_14 = arith.constant 0 : index
    %17 = vector.load %arg4[%c0_12, %c0_13, %c0_14] : memref<16x32x64xbf16, #tpu.memory_space<vmem>>, vector<1x32x64xbf16>
    %18 = vector.shape_cast %17 : vector<1x32x64xbf16> to vector<32x64xbf16>
    %cst_15 = arith.constant dense<0.000000e+00> : vector<128x64xf32>
    %19 = tpu.matmul %16, %18, %cst_15 {dimension_numbers = #tpu.dot_dimension_numbers<[1], [0], [0], [1], [0, 0, 1, 1], [], []>} : vector<128x32xbf16>, vector<32x64xbf16>, vector<128x64xf32> -> vector<128x64xf32>
    %20 = arith.addf %12, %19 : vector<128x64xf32>
    %21 = vector.extract_strided_slice %11 {offsets = [128, 0], sizes = [128, 32], strides = [1, 1]} : vector<512x32xbf16> to vector<128x32xbf16>
    %c1 = arith.constant 1 : index
    %c0_16 = arith.constant 0 : index
    %c0_17 = arith.constant 0 : index
    %22 = vector.load %arg4[%c1, %c0_16, %c0_17] : memref<16x32x64xbf16, #tpu.memory_space<vmem>>, vector<1x32x64xbf16>
    %23 = vector.shape_cast %22 : vector<1x32x64xbf16> to vector<32x64xbf16>
    %cst_18 = arith.constant dense<0.000000e+00> : vector<128x64xf32>
    %24 = tpu.matmul %21, %23, %cst_18 {dimension_numbers = #tpu.dot_dimension_numbers<[1], [0], [0], [1], [0, 0, 1, 1], [], []>} : vector<128x32xbf16>, vector<32x64xbf16>, vector<128x64xf32> -> vector<128x64xf32>
    %25 = arith.addf %20, %24 : vector<128x64xf32>
    %26 = vector.extract_strided_slice %11 {offsets = [0, 0], sizes = [128, 32], strides = [1, 1]} : vector<512x32xbf16> to vector<128x32xbf16>
    %c2 = arith.constant 2 : index
    %c0_19 = arith.constant 0 : index
    %c0_20 = arith.constant 0 : index
    %27 = vector.load %arg4[%c2, %c0_19, %c0_20] : memref<16x32x64xbf16, #tpu.memory_space<vmem>>, vector<1x32x64xbf16>
    %28 = vector.shape_cast %27 : vector<1x32x64xbf16> to vector<32x64xbf16>
    %cst_21 = arith.constant dense<0.000000e+00> : vector<128x64xf32>
    %29 = tpu.matmul %26, %28, %cst_21 {dimension_numbers = #tpu.dot_dimension_numbers<[1], [0], [0], [1], [0, 0, 1, 1], [], []>} : vector<128x32xbf16>, vector<32x64xbf16>, vector<128x64xf32> -> vector<128x64xf32>
    %30 = arith.addf %13, %29 : vector<128x64xf32>
    %31 = vector.extract_strided_slice %11 {offsets = [128, 0], sizes = [128, 32], strides = [1, 1]} : vector<512x32xbf16> to vector<128x32xbf16>
    %c3 = arith.constant 3 : index
    %c0_22 = arith.constant 0 : index
    %c0_23 = arith.constant 0 : index
    %32 = vector.load %arg4[%c3, %c0_22, %c0_23] : memref<16x32x64xbf16, #tpu.memory_space<vmem>>, vector<1x32x64xbf16>
    %33 = vector.shape_cast %32 : vector<1x32x64xbf16> to vector<32x64xbf16>
    %cst_24 = arith.constant dense<0.000000e+00> : vector<128x64xf32>
    %34 = tpu.matmul %31, %33, %cst_24 {dimension_numbers = #tpu.dot_dimension_numbers<[1], [0], [0], [1], [0, 0, 1, 1], [], []>} : vector<128x32xbf16>, vector<32x64xbf16>, vector<128x64xf32> -> vector<128x64xf32>
    %35 = arith.addf %30, %34 : vector<128x64xf32>
    %36 = vector.extract_strided_slice %11 {offsets = [256, 0], sizes = [128, 32], strides = [1, 1]} : vector<512x32xbf16> to vector<128x32xbf16>
    %c4 = arith.constant 4 : index
    %c0_25 = arith.constant 0 : index
    %c0_26 = arith.constant 0 : index
    %37 = vector.load %arg4[%c4, %c0_25, %c0_26] : memref<16x32x64xbf16, #tpu.memory_space<vmem>>, vector<1x32x64xbf16>
    %38 = vector.shape_cast %37 : vector<1x32x64xbf16> to vector<32x64xbf16>
    %cst_27 = arith.constant dense<0.000000e+00> : vector<128x64xf32>
    %39 = tpu.matmul %36, %38, %cst_27 {dimension_numbers = #tpu.dot_dimension_numbers<[1], [0], [0], [1], [0, 0, 1, 1], [], []>} : vector<128x32xbf16>, vector<32x64xbf16>, vector<128x64xf32> -> vector<128x64xf32>
    %40 = arith.addf %25, %39 : vector<128x64xf32>
    %41 = vector.extract_strided_slice %11 {offsets = [384, 0], sizes = [128, 32], strides = [1, 1]} : vector<512x32xbf16> to vector<128x32xbf16>
    %c5 = arith.constant 5 : index
    %c0_28 = arith.constant 0 : index
    %c0_29 = arith.constant 0 : index
    %42 = vector.load %arg4[%c5, %c0_28, %c0_29] : memref<16x32x64xbf16, #tpu.memory_space<vmem>>, vector<1x32x64xbf16>
    %43 = vector.shape_cast %42 : vector<1x32x64xbf16> to vector<32x64xbf16>
    %cst_30 = arith.constant dense<0.000000e+00> : vector<128x64xf32>
    %44 = tpu.matmul %41, %43, %cst_30 {dimension_numbers = #tpu.dot_dimension_numbers<[1], [0], [0], [1], [0, 0, 1, 1], [], []>} : vector<128x32xbf16>, vector<32x64xbf16>, vector<128x64xf32> -> vector<128x64xf32>
    %45 = arith.addf %40, %44 : vector<128x64xf32>
    %46 = vector.extract_strided_slice %11 {offsets = [256, 0], sizes = [128, 32], strides = [1, 1]} : vector<512x32xbf16> to vector<128x32xbf16>
    %c6 = arith.constant 6 : index
    %c0_31 = arith.constant 0 : index
    %c0_32 = arith.constant 0 : index
    %47 = vector.load %arg4[%c6, %c0_31, %c0_32] : memref<16x32x64xbf16, #tpu.memory_space<vmem>>, vector<1x32x64xbf16>
    %48 = vector.shape_cast %47 : vector<1x32x64xbf16> to vector<32x64xbf16>
    %cst_33 = arith.constant dense<0.000000e+00> : vector<128x64xf32>
    %49 = tpu.matmul %46, %48, %cst_33 {dimension_numbers = #tpu.dot_dimension_numbers<[1], [0], [0], [1], [0, 0, 1, 1], [], []>} : vector<128x32xbf16>, vector<32x64xbf16>, vector<128x64xf32> -> vector<128x64xf32>
    %50 = arith.addf %35, %49 : vector<128x64xf32>
    %51 = vector.extract_strided_slice %11 {offsets = [384, 0], sizes = [128, 32], strides = [1, 1]} : vector<512x32xbf16> to vector<128x32xbf16>
    %c7 = arith.constant 7 : index
    %c0_34 = arith.constant 0 : index
    %c0_35 = arith.constant 0 : index
    %52 = vector.load %arg4[%c7, %c0_34, %c0_35] : memref<16x32x64xbf16, #tpu.memory_space<vmem>>, vector<1x32x64xbf16>
    %53 = vector.shape_cast %52 : vector<1x32x64xbf16> to vector<32x64xbf16>
    %cst_36 = arith.constant dense<0.000000e+00> : vector<128x64xf32>
    %54 = tpu.matmul %51, %53, %cst_36 {dimension_numbers = #tpu.dot_dimension_numbers<[1], [0], [0], [1], [0, 0, 1, 1], [], []>} : vector<128x32xbf16>, vector<32x64xbf16>, vector<128x64xf32> -> vector<128x64xf32>
    %55 = arith.addf %50, %54 : vector<128x64xf32>
    %56 = vector.extract_strided_slice %11 {offsets = [0, 0], sizes = [128, 32], strides = [1, 1]} : vector<512x32xbf16> to vector<128x32xbf16>
    %c8 = arith.constant 8 : index
    %c0_37 = arith.constant 0 : index
    %c0_38 = arith.constant 0 : index
    %57 = vector.load %arg4[%c8, %c0_37, %c0_38] : memref<16x32x64xbf16, #tpu.memory_space<vmem>>, vector<1x32x64xbf16>
    %58 = vector.shape_cast %57 : vector<1x32x64xbf16> to vector<32x64xbf16>
    %cst_39 = arith.constant dense<0.000000e+00> : vector<128x64xf32>
    %59 = tpu.matmul %56, %58, %cst_39 {dimension_numbers = #tpu.dot_dimension_numbers<[1], [0], [0], [1], [0, 0, 1, 1], [], []>} : vector<128x32xbf16>, vector<32x64xbf16>, vector<128x64xf32> -> vector<128x64xf32>
    %60 = arith.addf %14, %59 : vector<128x64xf32>
    %61 = vector.extract_strided_slice %11 {offsets = [128, 0], sizes = [128, 32], strides = [1, 1]} : vector<512x32xbf16> to vector<128x32xbf16>
    %c9 = arith.constant 9 : index
    %c0_40 = arith.constant 0 : index
    %c0_41 = arith.constant 0 : index
    %62 = vector.load %arg4[%c9, %c0_40, %c0_41] : memref<16x32x64xbf16, #tpu.memory_space<vmem>>, vector<1x32x64xbf16>
    %63 = vector.shape_cast %62 : vector<1x32x64xbf16> to vector<32x64xbf16>
    %cst_42 = arith.constant dense<0.000000e+00> : vector<128x64xf32>
    %64 = tpu.matmul %61, %63, %cst_42 {dimension_numbers = #tpu.dot_dimension_numbers<[1], [0], [0], [1], [0, 0, 1, 1], [], []>} : vector<128x32xbf16>, vector<32x64xbf16>, vector<128x64xf32> -> vector<128x64xf32>
    %65 = arith.addf %60, %64 : vector<128x64xf32>
    %66 = vector.extract_strided_slice %11 {offsets = [0, 0], sizes = [128, 32], strides = [1, 1]} : vector<512x32xbf16> to vector<128x32xbf16>
    %c10 = arith.constant 10 : index
    %c0_43 = arith.constant 0 : index
    %c0_44 = arith.constant 0 : index
    %67 = vector.load %arg4[%c10, %c0_43, %c0_44] : memref<16x32x64xbf16, #tpu.memory_space<vmem>>, vector<1x32x64xbf16>
    %68 = vector.shape_cast %67 : vector<1x32x64xbf16> to vector<32x64xbf16>
    %cst_45 = arith.constant dense<0.000000e+00> : vector<128x64xf32>
    %69 = tpu.matmul %66, %68, %cst_45 {dimension_numbers = #tpu.dot_dimension_numbers<[1], [0], [0], [1], [0, 0, 1, 1], [], []>} : vector<128x32xbf16>, vector<32x64xbf16>, vector<128x64xf32> -> vector<128x64xf32>
    %70 = arith.addf %15, %69 : vector<128x64xf32>
    %71 = vector.extract_strided_slice %11 {offsets = [128, 0], sizes = [128, 32], strides = [1, 1]} : vector<512x32xbf16> to vector<128x32xbf16>
    %c11 = arith.constant 11 : index
    %c0_46 = arith.constant 0 : index
    %c0_47 = arith.constant 0 : index
    %72 = vector.load %arg4[%c11, %c0_46, %c0_47] : memref<16x32x64xbf16, #tpu.memory_space<vmem>>, vector<1x32x64xbf16>
    %73 = vector.shape_cast %72 : vector<1x32x64xbf16> to vector<32x64xbf16>
    %cst_48 = arith.constant dense<0.000000e+00> : vector<128x64xf32>
    %74 = tpu.matmul %71, %73, %cst_48 {dimension_numbers = #tpu.dot_dimension_numbers<[1], [0], [0], [1], [0, 0, 1, 1], [], []>} : vector<128x32xbf16>, vector<32x64xbf16>, vector<128x64xf32> -> vector<128x64xf32>
    %75 = arith.addf %70, %74 : vector<128x64xf32>
    %76 = vector.extract_strided_slice %11 {offsets = [256, 0], sizes = [128, 32], strides = [1, 1]} : vector<512x32xbf16> to vector<128x32xbf16>
    %c12 = arith.constant 12 : index
    %c0_49 = arith.constant 0 : index
    %c0_50 = arith.constant 0 : index
    %77 = vector.load %arg4[%c12, %c0_49, %c0_50] : memref<16x32x64xbf16, #tpu.memory_space<vmem>>, vector<1x32x64xbf16>
    %78 = vector.shape_cast %77 : vector<1x32x64xbf16> to vector<32x64xbf16>
    %cst_51 = arith.constant dense<0.000000e+00> : vector<128x64xf32>
    %79 = tpu.matmul %76, %78, %cst_51 {dimension_numbers = #tpu.dot_dimension_numbers<[1], [0], [0], [1], [0, 0, 1, 1], [], []>} : vector<128x32xbf16>, vector<32x64xbf16>, vector<128x64xf32> -> vector<128x64xf32>
    %80 = arith.addf %65, %79 : vector<128x64xf32>
    %81 = vector.extract_strided_slice %11 {offsets = [384, 0], sizes = [128, 32], strides = [1, 1]} : vector<512x32xbf16> to vector<128x32xbf16>
    %c13 = arith.constant 13 : index
    %c0_52 = arith.constant 0 : index
    %c0_53 = arith.constant 0 : index
    %82 = vector.load %arg4[%c13, %c0_52, %c0_53] : memref<16x32x64xbf16, #tpu.memory_space<vmem>>, vector<1x32x64xbf16>
    %83 = vector.shape_cast %82 : vector<1x32x64xbf16> to vector<32x64xbf16>
    %cst_54 = arith.constant dense<0.000000e+00> : vector<128x64xf32>
    %84 = tpu.matmul %81, %83, %cst_54 {dimension_numbers = #tpu.dot_dimension_numbers<[1], [0], [0], [1], [0, 0, 1, 1], [], []>} : vector<128x32xbf16>, vector<32x64xbf16>, vector<128x64xf32> -> vector<128x64xf32>
    %85 = arith.addf %80, %84 : vector<128x64xf32>
    %86 = vector.extract_strided_slice %11 {offsets = [256, 0], sizes = [128, 32], strides = [1, 1]} : vector<512x32xbf16> to vector<128x32xbf16>
    %c14 = arith.constant 14 : index
    %c0_55 = arith.constant 0 : index
    %c0_56 = arith.constant 0 : index
    %87 = vector.load %arg4[%c14, %c0_55, %c0_56] : memref<16x32x64xbf16, #tpu.memory_space<vmem>>, vector<1x32x64xbf16>
    %88 = vector.shape_cast %87 : vector<1x32x64xbf16> to vector<32x64xbf16>
    %cst_57 = arith.constant dense<0.000000e+00> : vector<128x64xf32>
    %89 = tpu.matmul %86, %88, %cst_57 {dimension_numbers = #tpu.dot_dimension_numbers<[1], [0], [0], [1], [0, 0, 1, 1], [], []>} : vector<128x32xbf16>, vector<32x64xbf16>, vector<128x64xf32> -> vector<128x64xf32>
    %90 = arith.addf %75, %89 : vector<128x64xf32>
    %91 = vector.extract_strided_slice %11 {offsets = [384, 0], sizes = [128, 32], strides = [1, 1]} : vector<512x32xbf16> to vector<128x32xbf16>
    %c15 = arith.constant 15 : index
    %c0_58 = arith.constant 0 : index
    %c0_59 = arith.constant 0 : index
    %92 = vector.load %arg4[%c15, %c0_58, %c0_59] : memref<16x32x64xbf16, #tpu.memory_space<vmem>>, vector<1x32x64xbf16>
    %93 = vector.shape_cast %92 : vector<1x32x64xbf16> to vector<32x64xbf16>
    %cst_60 = arith.constant dense<0.000000e+00> : vector<128x64xf32>
    %94 = tpu.matmul %91, %93, %cst_60 {dimension_numbers = #tpu.dot_dimension_numbers<[1], [0], [0], [1], [0, 0, 1, 1], [], []>} : vector<128x32xbf16>, vector<32x64xbf16>, vector<128x64xf32> -> vector<128x64xf32>
    %95 = arith.addf %90, %94 : vector<128x64xf32>
    %96 = vector.shape_cast %45 : vector<128x64xf32> to vector<2x8x8x64xf32>
    %97 = vector.extract_strided_slice %96 {offsets = [0, 0, 0, 0], sizes = [2, 7, 7, 64], strides = [1, 1, 1, 1]} : vector<2x8x8x64xf32> to vector<2x7x7x64xf32>
    %98 = vector.shape_cast %55 : vector<128x64xf32> to vector<2x8x8x64xf32>
    %99 = vector.extract_strided_slice %98 {offsets = [0, 0, 1, 0], sizes = [2, 7, 7, 64], strides = [1, 1, 1, 1]} : vector<2x8x8x64xf32> to vector<2x7x7x64xf32>
    %100 = vector.shape_cast %85 : vector<128x64xf32> to vector<2x8x8x64xf32>
    %101 = vector.extract_strided_slice %100 {offsets = [0, 1, 0, 0], sizes = [2, 7, 7, 64], strides = [1, 1, 1, 1]} : vector<2x8x8x64xf32> to vector<2x7x7x64xf32>
    %102 = vector.shape_cast %95 : vector<128x64xf32> to vector<2x8x8x64xf32>
    %103 = vector.extract_strided_slice %102 {offsets = [0, 1, 1, 0], sizes = [2, 7, 7, 64], strides = [1, 1, 1, 1]} : vector<2x8x8x64xf32> to vector<2x7x7x64xf32>
    %104 = arith.addf %97, %99 : vector<2x7x7x64xf32>
    %105 = arith.addf %101, %103 : vector<2x7x7x64xf32>
    %106 = arith.addf %104, %105 : vector<2x7x7x64xf32>
    %c0_61 = arith.constant 0 : index
    %c0_62 = arith.constant 0 : index
    %107 = vector.load %arg5[%c0_61, %c0_62] : memref<1x64xf32, #tpu.memory_space<vmem>>, vector<1x64xf32>
    %108 = vector.shape_cast %107 : vector<1x64xf32> to vector<1x1x1x64xf32>
    %109 = vector.broadcast %108 : vector<1x1x1x64xf32> to vector<2x7x7x64xf32>
    %110 = arith.addf %106, %109 : vector<2x7x7x64xf32>
    %cst_63 = arith.constant 0.000000e+00 : f32
    %111 = vector.broadcast %cst_63 : f32 to vector<2x7x7x64xf32>
    %112 = arith.maximumf %110, %111 : vector<2x7x7x64xf32>
    %113 = arith.truncf %112 : vector<2x7x7x64xf32> to vector<2x7x7x64xbf16>
    %cst_64 = arith.constant 0.000000e+00 : f32
    %114 = vector.broadcast %cst_64 : f32 to vector<2x256xf32>
    %cst_65 = arith.constant 0.000000e+00 : f32
    %115 = vector.broadcast %cst_65 : f32 to vector<2x256xf32>
    %cst_66 = arith.constant 0.000000e+00 : f32
    %116 = vector.broadcast %cst_66 : f32 to vector<2x256xf32>
    %cst_67 = arith.constant 0.000000e+00 : f32
    %117 = vector.broadcast %cst_67 : f32 to vector<2x256xf32>
    %118 = vector.extract_strided_slice %113 {offsets = [0, 0, 0, 0], sizes = [2, 1, 1, 64], strides = [1, 1, 1, 1]} : vector<2x7x7x64xbf16> to vector<2x1x1x64xbf16>
    %119 = vector.shape_cast %118 : vector<2x1x1x64xbf16> to vector<2x64xbf16>
    %c0_68 = arith.constant 0 : index
    %c0_69 = arith.constant 0 : index
    %c0_70 = arith.constant 0 : index
    %120 = vector.load %arg6[%c0_68, %c0_69, %c0_70] : memref<49x64x256xbf16, #tpu.memory_space<vmem>>, vector<1x64x256xbf16>
    %121 = vector.shape_cast %120 : vector<1x64x256xbf16> to vector<64x256xbf16>
    %cst_71 = arith.constant dense<0.000000e+00> : vector<2x256xf32>
    %122 = tpu.matmul %119, %121, %cst_71 {dimension_numbers = #tpu.dot_dimension_numbers<[1], [0], [0], [1], [0, 0, 1, 1], [], []>} : vector<2x64xbf16>, vector<64x256xbf16>, vector<2x256xf32> -> vector<2x256xf32>
    %123 = arith.addf %114, %122 : vector<2x256xf32>
    %124 = vector.extract_strided_slice %113 {offsets = [0, 0, 1, 0], sizes = [2, 1, 1, 64], strides = [1, 1, 1, 1]} : vector<2x7x7x64xbf16> to vector<2x1x1x64xbf16>
    %125 = vector.shape_cast %124 : vector<2x1x1x64xbf16> to vector<2x64xbf16>
    %c1_72 = arith.constant 1 : index
    %c0_73 = arith.constant 0 : index
    %c0_74 = arith.constant 0 : index
    %126 = vector.load %arg6[%c1_72, %c0_73, %c0_74] : memref<49x64x256xbf16, #tpu.memory_space<vmem>>, vector<1x64x256xbf16>
    %127 = vector.shape_cast %126 : vector<1x64x256xbf16> to vector<64x256xbf16>
    %cst_75 = arith.constant dense<0.000000e+00> : vector<2x256xf32>
    %128 = tpu.matmul %125, %127, %cst_75 {dimension_numbers = #tpu.dot_dimension_numbers<[1], [0], [0], [1], [0, 0, 1, 1], [], []>} : vector<2x64xbf16>, vector<64x256xbf16>, vector<2x256xf32> -> vector<2x256xf32>
    %129 = arith.addf %115, %128 : vector<2x256xf32>
    %130 = vector.extract_strided_slice %113 {offsets = [0, 0, 2, 0], sizes = [2, 1, 1, 64], strides = [1, 1, 1, 1]} : vector<2x7x7x64xbf16> to vector<2x1x1x64xbf16>
    %131 = vector.shape_cast %130 : vector<2x1x1x64xbf16> to vector<2x64xbf16>
    %c2_76 = arith.constant 2 : index
    %c0_77 = arith.constant 0 : index
    %c0_78 = arith.constant 0 : index
    %132 = vector.load %arg6[%c2_76, %c0_77, %c0_78] : memref<49x64x256xbf16, #tpu.memory_space<vmem>>, vector<1x64x256xbf16>
    %133 = vector.shape_cast %132 : vector<1x64x256xbf16> to vector<64x256xbf16>
    %cst_79 = arith.constant dense<0.000000e+00> : vector<2x256xf32>
    %134 = tpu.matmul %131, %133, %cst_79 {dimension_numbers = #tpu.dot_dimension_numbers<[1], [0], [0], [1], [0, 0, 1, 1], [], []>} : vector<2x64xbf16>, vector<64x256xbf16>, vector<2x256xf32> -> vector<2x256xf32>
    %135 = arith.addf %116, %134 : vector<2x256xf32>
    %136 = vector.extract_strided_slice %113 {offsets = [0, 0, 3, 0], sizes = [2, 1, 1, 64], strides = [1, 1, 1, 1]} : vector<2x7x7x64xbf16> to vector<2x1x1x64xbf16>
    %137 = vector.shape_cast %136 : vector<2x1x1x64xbf16> to vector<2x64xbf16>
    %c3_80 = arith.constant 3 : index
    %c0_81 = arith.constant 0 : index
    %c0_82 = arith.constant 0 : index
    %138 = vector.load %arg6[%c3_80, %c0_81, %c0_82] : memref<49x64x256xbf16, #tpu.memory_space<vmem>>, vector<1x64x256xbf16>
    %139 = vector.shape_cast %138 : vector<1x64x256xbf16> to vector<64x256xbf16>
    %cst_83 = arith.constant dense<0.000000e+00> : vector<2x256xf32>
    %140 = tpu.matmul %137, %139, %cst_83 {dimension_numbers = #tpu.dot_dimension_numbers<[1], [0], [0], [1], [0, 0, 1, 1], [], []>} : vector<2x64xbf16>, vector<64x256xbf16>, vector<2x256xf32> -> vector<2x256xf32>
    %141 = arith.addf %117, %140 : vector<2x256xf32>
    %142 = vector.extract_strided_slice %113 {offsets = [0, 0, 4, 0], sizes = [2, 1, 1, 64], strides = [1, 1, 1, 1]} : vector<2x7x7x64xbf16> to vector<2x1x1x64xbf16>
    %143 = vector.shape_cast %142 : vector<2x1x1x64xbf16> to vector<2x64xbf16>
    %c4_84 = arith.constant 4 : index
    %c0_85 = arith.constant 0 : index
    %c0_86 = arith.constant 0 : index
    %144 = vector.load %arg6[%c4_84, %c0_85, %c0_86] : memref<49x64x256xbf16, #tpu.memory_space<vmem>>, vector<1x64x256xbf16>
    %145 = vector.shape_cast %144 : vector<1x64x256xbf16> to vector<64x256xbf16>
    %cst_87 = arith.constant dense<0.000000e+00> : vector<2x256xf32>
    %146 = tpu.matmul %143, %145, %cst_87 {dimension_numbers = #tpu.dot_dimension_numbers<[1], [0], [0], [1], [0, 0, 1, 1], [], []>} : vector<2x64xbf16>, vector<64x256xbf16>, vector<2x256xf32> -> vector<2x256xf32>
    %147 = arith.addf %123, %146 : vector<2x256xf32>
    %148 = vector.extract_strided_slice %113 {offsets = [0, 0, 5, 0], sizes = [2, 1, 1, 64], strides = [1, 1, 1, 1]} : vector<2x7x7x64xbf16> to vector<2x1x1x64xbf16>
    %149 = vector.shape_cast %148 : vector<2x1x1x64xbf16> to vector<2x64xbf16>
    %c5_88 = arith.constant 5 : index
    %c0_89 = arith.constant 0 : index
    %c0_90 = arith.constant 0 : index
    %150 = vector.load %arg6[%c5_88, %c0_89, %c0_90] : memref<49x64x256xbf16, #tpu.memory_space<vmem>>, vector<1x64x256xbf16>
    %151 = vector.shape_cast %150 : vector<1x64x256xbf16> to vector<64x256xbf16>
    %cst_91 = arith.constant dense<0.000000e+00> : vector<2x256xf32>
    %152 = tpu.matmul %149, %151, %cst_91 {dimension_numbers = #tpu.dot_dimension_numbers<[1], [0], [0], [1], [0, 0, 1, 1], [], []>} : vector<2x64xbf16>, vector<64x256xbf16>, vector<2x256xf32> -> vector<2x256xf32>
    %153 = arith.addf %129, %152 : vector<2x256xf32>
    %154 = vector.extract_strided_slice %113 {offsets = [0, 0, 6, 0], sizes = [2, 1, 1, 64], strides = [1, 1, 1, 1]} : vector<2x7x7x64xbf16> to vector<2x1x1x64xbf16>
    %155 = vector.shape_cast %154 : vector<2x1x1x64xbf16> to vector<2x64xbf16>
    %c6_92 = arith.constant 6 : index
    %c0_93 = arith.constant 0 : index
    %c0_94 = arith.constant 0 : index
    %156 = vector.load %arg6[%c6_92, %c0_93, %c0_94] : memref<49x64x256xbf16, #tpu.memory_space<vmem>>, vector<1x64x256xbf16>
    %157 = vector.shape_cast %156 : vector<1x64x256xbf16> to vector<64x256xbf16>
    %cst_95 = arith.constant dense<0.000000e+00> : vector<2x256xf32>
    %158 = tpu.matmul %155, %157, %cst_95 {dimension_numbers = #tpu.dot_dimension_numbers<[1], [0], [0], [1], [0, 0, 1, 1], [], []>} : vector<2x64xbf16>, vector<64x256xbf16>, vector<2x256xf32> -> vector<2x256xf32>
    %159 = arith.addf %135, %158 : vector<2x256xf32>
    %160 = vector.extract_strided_slice %113 {offsets = [0, 1, 0, 0], sizes = [2, 1, 1, 64], strides = [1, 1, 1, 1]} : vector<2x7x7x64xbf16> to vector<2x1x1x64xbf16>
    %161 = vector.shape_cast %160 : vector<2x1x1x64xbf16> to vector<2x64xbf16>
    %c7_96 = arith.constant 7 : index
    %c0_97 = arith.constant 0 : index
    %c0_98 = arith.constant 0 : index
    %162 = vector.load %arg6[%c7_96, %c0_97, %c0_98] : memref<49x64x256xbf16, #tpu.memory_space<vmem>>, vector<1x64x256xbf16>
    %163 = vector.shape_cast %162 : vector<1x64x256xbf16> to vector<64x256xbf16>
    %cst_99 = arith.constant dense<0.000000e+00> : vector<2x256xf32>
    %164 = tpu.matmul %161, %163, %cst_99 {dimension_numbers = #tpu.dot_dimension_numbers<[1], [0], [0], [1], [0, 0, 1, 1], [], []>} : vector<2x64xbf16>, vector<64x256xbf16>, vector<2x256xf32> -> vector<2x256xf32>
    %165 = arith.addf %141, %164 : vector<2x256xf32>
    %166 = vector.extract_strided_slice %113 {offsets = [0, 1, 1, 0], sizes = [2, 1, 1, 64], strides = [1, 1, 1, 1]} : vector<2x7x7x64xbf16> to vector<2x1x1x64xbf16>
    %167 = vector.shape_cast %166 : vector<2x1x1x64xbf16> to vector<2x64xbf16>
    %c8_100 = arith.constant 8 : index
    %c0_101 = arith.constant 0 : index
    %c0_102 = arith.constant 0 : index
    %168 = vector.load %arg6[%c8_100, %c0_101, %c0_102] : memref<49x64x256xbf16, #tpu.memory_space<vmem>>, vector<1x64x256xbf16>
    %169 = vector.shape_cast %168 : vector<1x64x256xbf16> to vector<64x256xbf16>
    %cst_103 = arith.constant dense<0.000000e+00> : vector<2x256xf32>
    %170 = tpu.matmul %167, %169, %cst_103 {dimension_numbers = #tpu.dot_dimension_numbers<[1], [0], [0], [1], [0, 0, 1, 1], [], []>} : vector<2x64xbf16>, vector<64x256xbf16>, vector<2x256xf32> -> vector<2x256xf32>
    %171 = arith.addf %147, %170 : vector<2x256xf32>
    %172 = vector.extract_strided_slice %113 {offsets = [0, 1, 2, 0], sizes = [2, 1, 1, 64], strides = [1, 1, 1, 1]} : vector<2x7x7x64xbf16> to vector<2x1x1x64xbf16>
    %173 = vector.shape_cast %172 : vector<2x1x1x64xbf16> to vector<2x64xbf16>
    %c9_104 = arith.constant 9 : index
    %c0_105 = arith.constant 0 : index
    %c0_106 = arith.constant 0 : index
    %174 = vector.load %arg6[%c9_104, %c0_105, %c0_106] : memref<49x64x256xbf16, #tpu.memory_space<vmem>>, vector<1x64x256xbf16>
    %175 = vector.shape_cast %174 : vector<1x64x256xbf16> to vector<64x256xbf16>
    %cst_107 = arith.constant dense<0.000000e+00> : vector<2x256xf32>
    %176 = tpu.matmul %173, %175, %cst_107 {dimension_numbers = #tpu.dot_dimension_numbers<[1], [0], [0], [1], [0, 0, 1, 1], [], []>} : vector<2x64xbf16>, vector<64x256xbf16>, vector<2x256xf32> -> vector<2x256xf32>
    %177 = arith.addf %153, %176 : vector<2x256xf32>
    %178 = vector.extract_strided_slice %113 {offsets = [0, 1, 3, 0], sizes = [2, 1, 1, 64], strides = [1, 1, 1, 1]} : vector<2x7x7x64xbf16> to vector<2x1x1x64xbf16>
    %179 = vector.shape_cast %178 : vector<2x1x1x64xbf16> to vector<2x64xbf16>
    %c10_108 = arith.constant 10 : index
    %c0_109 = arith.constant 0 : index
    %c0_110 = arith.constant 0 : index
    %180 = vector.load %arg6[%c10_108, %c0_109, %c0_110] : memref<49x64x256xbf16, #tpu.memory_space<vmem>>, vector<1x64x256xbf16>
    %181 = vector.shape_cast %180 : vector<1x64x256xbf16> to vector<64x256xbf16>
    %cst_111 = arith.constant dense<0.000000e+00> : vector<2x256xf32>
    %182 = tpu.matmul %179, %181, %cst_111 {dimension_numbers = #tpu.dot_dimension_numbers<[1], [0], [0], [1], [0, 0, 1, 1], [], []>} : vector<2x64xbf16>, vector<64x256xbf16>, vector<2x256xf32> -> vector<2x256xf32>
    %183 = arith.addf %159, %182 : vector<2x256xf32>
    %184 = vector.extract_strided_slice %113 {offsets = [0, 1, 4, 0], sizes = [2, 1, 1, 64], strides = [1, 1, 1, 1]} : vector<2x7x7x64xbf16> to vector<2x1x1x64xbf16>
    %185 = vector.shape_cast %184 : vector<2x1x1x64xbf16> to vector<2x64xbf16>
    %c11_112 = arith.constant 11 : index
    %c0_113 = arith.constant 0 : index
    %c0_114 = arith.constant 0 : index
    %186 = vector.load %arg6[%c11_112, %c0_113, %c0_114] : memref<49x64x256xbf16, #tpu.memory_space<vmem>>, vector<1x64x256xbf16>
    %187 = vector.shape_cast %186 : vector<1x64x256xbf16> to vector<64x256xbf16>
    %cst_115 = arith.constant dense<0.000000e+00> : vector<2x256xf32>
    %188 = tpu.matmul %185, %187, %cst_115 {dimension_numbers = #tpu.dot_dimension_numbers<[1], [0], [0], [1], [0, 0, 1, 1], [], []>} : vector<2x64xbf16>, vector<64x256xbf16>, vector<2x256xf32> -> vector<2x256xf32>
    %189 = arith.addf %165, %188 : vector<2x256xf32>
    %190 = vector.extract_strided_slice %113 {offsets = [0, 1, 5, 0], sizes = [2, 1, 1, 64], strides = [1, 1, 1, 1]} : vector<2x7x7x64xbf16> to vector<2x1x1x64xbf16>
    %191 = vector.shape_cast %190 : vector<2x1x1x64xbf16> to vector<2x64xbf16>
    %c12_116 = arith.constant 12 : index
    %c0_117 = arith.constant 0 : index
    %c0_118 = arith.constant 0 : index
    %192 = vector.load %arg6[%c12_116, %c0_117, %c0_118] : memref<49x64x256xbf16, #tpu.memory_space<vmem>>, vector<1x64x256xbf16>
    %193 = vector.shape_cast %192 : vector<1x64x256xbf16> to vector<64x256xbf16>
    %cst_119 = arith.constant dense<0.000000e+00> : vector<2x256xf32>
    %194 = tpu.matmul %191, %193, %cst_119 {dimension_numbers = #tpu.dot_dimension_numbers<[1], [0], [0], [1], [0, 0, 1, 1], [], []>} : vector<2x64xbf16>, vector<64x256xbf16>, vector<2x256xf32> -> vector<2x256xf32>
    %195 = arith.addf %171, %194 : vector<2x256xf32>
    %196 = vector.extract_strided_slice %113 {offsets = [0, 1, 6, 0], sizes = [2, 1, 1, 64], strides = [1, 1, 1, 1]} : vector<2x7x7x64xbf16> to vector<2x1x1x64xbf16>
    %197 = vector.shape_cast %196 : vector<2x1x1x64xbf16> to vector<2x64xbf16>
    %c13_120 = arith.constant 13 : index
    %c0_121 = arith.constant 0 : index
    %c0_122 = arith.constant 0 : index
    %198 = vector.load %arg6[%c13_120, %c0_121, %c0_122] : memref<49x64x256xbf16, #tpu.memory_space<vmem>>, vector<1x64x256xbf16>
    %199 = vector.shape_cast %198 : vector<1x64x256xbf16> to vector<64x256xbf16>
    %cst_123 = arith.constant dense<0.000000e+00> : vector<2x256xf32>
    %200 = tpu.matmul %197, %199, %cst_123 {dimension_numbers = #tpu.dot_dimension_numbers<[1], [0], [0], [1], [0, 0, 1, 1], [], []>} : vector<2x64xbf16>, vector<64x256xbf16>, vector<2x256xf32> -> vector<2x256xf32>
    %201 = arith.addf %177, %200 : vector<2x256xf32>
    %202 = vector.extract_strided_slice %113 {offsets = [0, 2, 0, 0], sizes = [2, 1, 1, 64], strides = [1, 1, 1, 1]} : vector<2x7x7x64xbf16> to vector<2x1x1x64xbf16>
    %203 = vector.shape_cast %202 : vector<2x1x1x64xbf16> to vector<2x64xbf16>
    %c14_124 = arith.constant 14 : index
    %c0_125 = arith.constant 0 : index
    %c0_126 = arith.constant 0 : index
    %204 = vector.load %arg6[%c14_124, %c0_125, %c0_126] : memref<49x64x256xbf16, #tpu.memory_space<vmem>>, vector<1x64x256xbf16>
    %205 = vector.shape_cast %204 : vector<1x64x256xbf16> to vector<64x256xbf16>
    %cst_127 = arith.constant dense<0.000000e+00> : vector<2x256xf32>
    %206 = tpu.matmul %203, %205, %cst_127 {dimension_numbers = #tpu.dot_dimension_numbers<[1], [0], [0], [1], [0, 0, 1, 1], [], []>} : vector<2x64xbf16>, vector<64x256xbf16>, vector<2x256xf32> -> vector<2x256xf32>
    %207 = arith.addf %183, %206 : vector<2x256xf32>
    %208 = vector.extract_strided_slice %113 {offsets = [0, 2, 1, 0], sizes = [2, 1, 1, 64], strides = [1, 1, 1, 1]} : vector<2x7x7x64xbf16> to vector<2x1x1x64xbf16>
    %209 = vector.shape_cast %208 : vector<2x1x1x64xbf16> to vector<2x64xbf16>
    %c15_128 = arith.constant 15 : index
    %c0_129 = arith.constant 0 : index
    %c0_130 = arith.constant 0 : index
    %210 = vector.load %arg6[%c15_128, %c0_129, %c0_130] : memref<49x64x256xbf16, #tpu.memory_space<vmem>>, vector<1x64x256xbf16>
    %211 = vector.shape_cast %210 : vector<1x64x256xbf16> to vector<64x256xbf16>
    %cst_131 = arith.constant dense<0.000000e+00> : vector<2x256xf32>
    %212 = tpu.matmul %209, %211, %cst_131 {dimension_numbers = #tpu.dot_dimension_numbers<[1], [0], [0], [1], [0, 0, 1, 1], [], []>} : vector<2x64xbf16>, vector<64x256xbf16>, vector<2x256xf32> -> vector<2x256xf32>
    %213 = arith.addf %189, %212 : vector<2x256xf32>
    %214 = vector.extract_strided_slice %113 {offsets = [0, 2, 2, 0], sizes = [2, 1, 1, 64], strides = [1, 1, 1, 1]} : vector<2x7x7x64xbf16> to vector<2x1x1x64xbf16>
    %215 = vector.shape_cast %214 : vector<2x1x1x64xbf16> to vector<2x64xbf16>
    %c16 = arith.constant 16 : index
    %c0_132 = arith.constant 0 : index
    %c0_133 = arith.constant 0 : index
    %216 = vector.load %arg6[%c16, %c0_132, %c0_133] : memref<49x64x256xbf16, #tpu.memory_space<vmem>>, vector<1x64x256xbf16>
    %217 = vector.shape_cast %216 : vector<1x64x256xbf16> to vector<64x256xbf16>
    %cst_134 = arith.constant dense<0.000000e+00> : vector<2x256xf32>
    %218 = tpu.matmul %215, %217, %cst_134 {dimension_numbers = #tpu.dot_dimension_numbers<[1], [0], [0], [1], [0, 0, 1, 1], [], []>} : vector<2x64xbf16>, vector<64x256xbf16>, vector<2x256xf32> -> vector<2x256xf32>
    %219 = arith.addf %195, %218 : vector<2x256xf32>
    %220 = vector.extract_strided_slice %113 {offsets = [0, 2, 3, 0], sizes = [2, 1, 1, 64], strides = [1, 1, 1, 1]} : vector<2x7x7x64xbf16> to vector<2x1x1x64xbf16>
    %221 = vector.shape_cast %220 : vector<2x1x1x64xbf16> to vector<2x64xbf16>
    %c17 = arith.constant 17 : index
    %c0_135 = arith.constant 0 : index
    %c0_136 = arith.constant 0 : index
    %222 = vector.load %arg6[%c17, %c0_135, %c0_136] : memref<49x64x256xbf16, #tpu.memory_space<vmem>>, vector<1x64x256xbf16>
    %223 = vector.shape_cast %222 : vector<1x64x256xbf16> to vector<64x256xbf16>
    %cst_137 = arith.constant dense<0.000000e+00> : vector<2x256xf32>
    %224 = tpu.matmul %221, %223, %cst_137 {dimension_numbers = #tpu.dot_dimension_numbers<[1], [0], [0], [1], [0, 0, 1, 1], [], []>} : vector<2x64xbf16>, vector<64x256xbf16>, vector<2x256xf32> -> vector<2x256xf32>
    %225 = arith.addf %201, %224 : vector<2x256xf32>
    %226 = vector.extract_strided_slice %113 {offsets = [0, 2, 4, 0], sizes = [2, 1, 1, 64], strides = [1, 1, 1, 1]} : vector<2x7x7x64xbf16> to vector<2x1x1x64xbf16>
    %227 = vector.shape_cast %226 : vector<2x1x1x64xbf16> to vector<2x64xbf16>
    %c18 = arith.constant 18 : index
    %c0_138 = arith.constant 0 : index
    %c0_139 = arith.constant 0 : index
    %228 = vector.load %arg6[%c18, %c0_138, %c0_139] : memref<49x64x256xbf16, #tpu.memory_space<vmem>>, vector<1x64x256xbf16>
    %229 = vector.shape_cast %228 : vector<1x64x256xbf16> to vector<64x256xbf16>
    %cst_140 = arith.constant dense<0.000000e+00> : vector<2x256xf32>
    %230 = tpu.matmul %227, %229, %cst_140 {dimension_numbers = #tpu.dot_dimension_numbers<[1], [0], [0], [1], [0, 0, 1, 1], [], []>} : vector<2x64xbf16>, vector<64x256xbf16>, vector<2x256xf32> -> vector<2x256xf32>
    %231 = arith.addf %207, %230 : vector<2x256xf32>
    %232 = vector.extract_strided_slice %113 {offsets = [0, 2, 5, 0], sizes = [2, 1, 1, 64], strides = [1, 1, 1, 1]} : vector<2x7x7x64xbf16> to vector<2x1x1x64xbf16>
    %233 = vector.shape_cast %232 : vector<2x1x1x64xbf16> to vector<2x64xbf16>
    %c19 = arith.constant 19 : index
    %c0_141 = arith.constant 0 : index
    %c0_142 = arith.constant 0 : index
    %234 = vector.load %arg6[%c19, %c0_141, %c0_142] : memref<49x64x256xbf16, #tpu.memory_space<vmem>>, vector<1x64x256xbf16>
    %235 = vector.shape_cast %234 : vector<1x64x256xbf16> to vector<64x256xbf16>
    %cst_143 = arith.constant dense<0.000000e+00> : vector<2x256xf32>
    %236 = tpu.matmul %233, %235, %cst_143 {dimension_numbers = #tpu.dot_dimension_numbers<[1], [0], [0], [1], [0, 0, 1, 1], [], []>} : vector<2x64xbf16>, vector<64x256xbf16>, vector<2x256xf32> -> vector<2x256xf32>
    %237 = arith.addf %213, %236 : vector<2x256xf32>
    %238 = vector.extract_strided_slice %113 {offsets = [0, 2, 6, 0], sizes = [2, 1, 1, 64], strides = [1, 1, 1, 1]} : vector<2x7x7x64xbf16> to vector<2x1x1x64xbf16>
    %239 = vector.shape_cast %238 : vector<2x1x1x64xbf16> to vector<2x64xbf16>
    %c20 = arith.constant 20 : index
    %c0_144 = arith.constant 0 : index
    %c0_145 = arith.constant 0 : index
    %240 = vector.load %arg6[%c20, %c0_144, %c0_145] : memref<49x64x256xbf16, #tpu.memory_space<vmem>>, vector<1x64x256xbf16>
    %241 = vector.shape_cast %240 : vector<1x64x256xbf16> to vector<64x256xbf16>
    %cst_146 = arith.constant dense<0.000000e+00> : vector<2x256xf32>
    %242 = tpu.matmul %239, %241, %cst_146 {dimension_numbers = #tpu.dot_dimension_numbers<[1], [0], [0], [1], [0, 0, 1, 1], [], []>} : vector<2x64xbf16>, vector<64x256xbf16>, vector<2x256xf32> -> vector<2x256xf32>
    %243 = arith.addf %219, %242 : vector<2x256xf32>
    %244 = vector.extract_strided_slice %113 {offsets = [0, 3, 0, 0], sizes = [2, 1, 1, 64], strides = [1, 1, 1, 1]} : vector<2x7x7x64xbf16> to vector<2x1x1x64xbf16>
    %245 = vector.shape_cast %244 : vector<2x1x1x64xbf16> to vector<2x64xbf16>
    %c21 = arith.constant 21 : index
    %c0_147 = arith.constant 0 : index
    %c0_148 = arith.constant 0 : index
    %246 = vector.load %arg6[%c21, %c0_147, %c0_148] : memref<49x64x256xbf16, #tpu.memory_space<vmem>>, vector<1x64x256xbf16>
    %247 = vector.shape_cast %246 : vector<1x64x256xbf16> to vector<64x256xbf16>
    %cst_149 = arith.constant dense<0.000000e+00> : vector<2x256xf32>
    %248 = tpu.matmul %245, %247, %cst_149 {dimension_numbers = #tpu.dot_dimension_numbers<[1], [0], [0], [1], [0, 0, 1, 1], [], []>} : vector<2x64xbf16>, vector<64x256xbf16>, vector<2x256xf32> -> vector<2x256xf32>
    %249 = arith.addf %225, %248 : vector<2x256xf32>
    %250 = vector.extract_strided_slice %113 {offsets = [0, 3, 1, 0], sizes = [2, 1, 1, 64], strides = [1, 1, 1, 1]} : vector<2x7x7x64xbf16> to vector<2x1x1x64xbf16>
    %251 = vector.shape_cast %250 : vector<2x1x1x64xbf16> to vector<2x64xbf16>
    %c22 = arith.constant 22 : index
    %c0_150 = arith.constant 0 : index
    %c0_151 = arith.constant 0 : index
    %252 = vector.load %arg6[%c22, %c0_150, %c0_151] : memref<49x64x256xbf16, #tpu.memory_space<vmem>>, vector<1x64x256xbf16>
    %253 = vector.shape_cast %252 : vector<1x64x256xbf16> to vector<64x256xbf16>
    %cst_152 = arith.constant dense<0.000000e+00> : vector<2x256xf32>
    %254 = tpu.matmul %251, %253, %cst_152 {dimension_numbers = #tpu.dot_dimension_numbers<[1], [0], [0], [1], [0, 0, 1, 1], [], []>} : vector<2x64xbf16>, vector<64x256xbf16>, vector<2x256xf32> -> vector<2x256xf32>
    %255 = arith.addf %231, %254 : vector<2x256xf32>
    %256 = vector.extract_strided_slice %113 {offsets = [0, 3, 2, 0], sizes = [2, 1, 1, 64], strides = [1, 1, 1, 1]} : vector<2x7x7x64xbf16> to vector<2x1x1x64xbf16>
    %257 = vector.shape_cast %256 : vector<2x1x1x64xbf16> to vector<2x64xbf16>
    %c23 = arith.constant 23 : index
    %c0_153 = arith.constant 0 : index
    %c0_154 = arith.constant 0 : index
    %258 = vector.load %arg6[%c23, %c0_153, %c0_154] : memref<49x64x256xbf16, #tpu.memory_space<vmem>>, vector<1x64x256xbf16>
    %259 = vector.shape_cast %258 : vector<1x64x256xbf16> to vector<64x256xbf16>
    %cst_155 = arith.constant dense<0.000000e+00> : vector<2x256xf32>
    %260 = tpu.matmul %257, %259, %cst_155 {dimension_numbers = #tpu.dot_dimension_numbers<[1], [0], [0], [1], [0, 0, 1, 1], [], []>} : vector<2x64xbf16>, vector<64x256xbf16>, vector<2x256xf32> -> vector<2x256xf32>
    %261 = arith.addf %237, %260 : vector<2x256xf32>
    %262 = vector.extract_strided_slice %113 {offsets = [0, 3, 3, 0], sizes = [2, 1, 1, 64], strides = [1, 1, 1, 1]} : vector<2x7x7x64xbf16> to vector<2x1x1x64xbf16>
    %263 = vector.shape_cast %262 : vector<2x1x1x64xbf16> to vector<2x64xbf16>
    %c24 = arith.constant 24 : index
    %c0_156 = arith.constant 0 : index
    %c0_157 = arith.constant 0 : index
    %264 = vector.load %arg6[%c24, %c0_156, %c0_157] : memref<49x64x256xbf16, #tpu.memory_space<vmem>>, vector<1x64x256xbf16>
    %265 = vector.shape_cast %264 : vector<1x64x256xbf16> to vector<64x256xbf16>
    %cst_158 = arith.constant dense<0.000000e+00> : vector<2x256xf32>
    %266 = tpu.matmul %263, %265, %cst_158 {dimension_numbers = #tpu.dot_dimension_numbers<[1], [0], [0], [1], [0, 0, 1, 1], [], []>} : vector<2x64xbf16>, vector<64x256xbf16>, vector<2x256xf32> -> vector<2x256xf32>
    %267 = arith.addf %243, %266 : vector<2x256xf32>
    %268 = vector.extract_strided_slice %113 {offsets = [0, 3, 4, 0], sizes = [2, 1, 1, 64], strides = [1, 1, 1, 1]} : vector<2x7x7x64xbf16> to vector<2x1x1x64xbf16>
    %269 = vector.shape_cast %268 : vector<2x1x1x64xbf16> to vector<2x64xbf16>
    %c25 = arith.constant 25 : index
    %c0_159 = arith.constant 0 : index
    %c0_160 = arith.constant 0 : index
    %270 = vector.load %arg6[%c25, %c0_159, %c0_160] : memref<49x64x256xbf16, #tpu.memory_space<vmem>>, vector<1x64x256xbf16>
    %271 = vector.shape_cast %270 : vector<1x64x256xbf16> to vector<64x256xbf16>
    %cst_161 = arith.constant dense<0.000000e+00> : vector<2x256xf32>
    %272 = tpu.matmul %269, %271, %cst_161 {dimension_numbers = #tpu.dot_dimension_numbers<[1], [0], [0], [1], [0, 0, 1, 1], [], []>} : vector<2x64xbf16>, vector<64x256xbf16>, vector<2x256xf32> -> vector<2x256xf32>
    %273 = arith.addf %249, %272 : vector<2x256xf32>
    %274 = vector.extract_strided_slice %113 {offsets = [0, 3, 5, 0], sizes = [2, 1, 1, 64], strides = [1, 1, 1, 1]} : vector<2x7x7x64xbf16> to vector<2x1x1x64xbf16>
    %275 = vector.shape_cast %274 : vector<2x1x1x64xbf16> to vector<2x64xbf16>
    %c26 = arith.constant 26 : index
    %c0_162 = arith.constant 0 : index
    %c0_163 = arith.constant 0 : index
    %276 = vector.load %arg6[%c26, %c0_162, %c0_163] : memref<49x64x256xbf16, #tpu.memory_space<vmem>>, vector<1x64x256xbf16>
    %277 = vector.shape_cast %276 : vector<1x64x256xbf16> to vector<64x256xbf16>
    %cst_164 = arith.constant dense<0.000000e+00> : vector<2x256xf32>
    %278 = tpu.matmul %275, %277, %cst_164 {dimension_numbers = #tpu.dot_dimension_numbers<[1], [0], [0], [1], [0, 0, 1, 1], [], []>} : vector<2x64xbf16>, vector<64x256xbf16>, vector<2x256xf32> -> vector<2x256xf32>
    %279 = arith.addf %255, %278 : vector<2x256xf32>
    %280 = vector.extract_strided_slice %113 {offsets = [0, 3, 6, 0], sizes = [2, 1, 1, 64], strides = [1, 1, 1, 1]} : vector<2x7x7x64xbf16> to vector<2x1x1x64xbf16>
    %281 = vector.shape_cast %280 : vector<2x1x1x64xbf16> to vector<2x64xbf16>
    %c27 = arith.constant 27 : index
    %c0_165 = arith.constant 0 : index
    %c0_166 = arith.constant 0 : index
    %282 = vector.load %arg6[%c27, %c0_165, %c0_166] : memref<49x64x256xbf16, #tpu.memory_space<vmem>>, vector<1x64x256xbf16>
    %283 = vector.shape_cast %282 : vector<1x64x256xbf16> to vector<64x256xbf16>
    %cst_167 = arith.constant dense<0.000000e+00> : vector<2x256xf32>
    %284 = tpu.matmul %281, %283, %cst_167 {dimension_numbers = #tpu.dot_dimension_numbers<[1], [0], [0], [1], [0, 0, 1, 1], [], []>} : vector<2x64xbf16>, vector<64x256xbf16>, vector<2x256xf32> -> vector<2x256xf32>
    %285 = arith.addf %261, %284 : vector<2x256xf32>
    %286 = vector.extract_strided_slice %113 {offsets = [0, 4, 0, 0], sizes = [2, 1, 1, 64], strides = [1, 1, 1, 1]} : vector<2x7x7x64xbf16> to vector<2x1x1x64xbf16>
    %287 = vector.shape_cast %286 : vector<2x1x1x64xbf16> to vector<2x64xbf16>
    %c28 = arith.constant 28 : index
    %c0_168 = arith.constant 0 : index
    %c0_169 = arith.constant 0 : index
    %288 = vector.load %arg6[%c28, %c0_168, %c0_169] : memref<49x64x256xbf16, #tpu.memory_space<vmem>>, vector<1x64x256xbf16>
    %289 = vector.shape_cast %288 : vector<1x64x256xbf16> to vector<64x256xbf16>
    %cst_170 = arith.constant dense<0.000000e+00> : vector<2x256xf32>
    %290 = tpu.matmul %287, %289, %cst_170 {dimension_numbers = #tpu.dot_dimension_numbers<[1], [0], [0], [1], [0, 0, 1, 1], [], []>} : vector<2x64xbf16>, vector<64x256xbf16>, vector<2x256xf32> -> vector<2x256xf32>
    %291 = arith.addf %267, %290 : vector<2x256xf32>
    %292 = vector.extract_strided_slice %113 {offsets = [0, 4, 1, 0], sizes = [2, 1, 1, 64], strides = [1, 1, 1, 1]} : vector<2x7x7x64xbf16> to vector<2x1x1x64xbf16>
    %293 = vector.shape_cast %292 : vector<2x1x1x64xbf16> to vector<2x64xbf16>
    %c29 = arith.constant 29 : index
    %c0_171 = arith.constant 0 : index
    %c0_172 = arith.constant 0 : index
    %294 = vector.load %arg6[%c29, %c0_171, %c0_172] : memref<49x64x256xbf16, #tpu.memory_space<vmem>>, vector<1x64x256xbf16>
    %295 = vector.shape_cast %294 : vector<1x64x256xbf16> to vector<64x256xbf16>
    %cst_173 = arith.constant dense<0.000000e+00> : vector<2x256xf32>
    %296 = tpu.matmul %293, %295, %cst_173 {dimension_numbers = #tpu.dot_dimension_numbers<[1], [0], [0], [1], [0, 0, 1, 1], [], []>} : vector<2x64xbf16>, vector<64x256xbf16>, vector<2x256xf32> -> vector<2x256xf32>
    %297 = arith.addf %273, %296 : vector<2x256xf32>
    %298 = vector.extract_strided_slice %113 {offsets = [0, 4, 2, 0], sizes = [2, 1, 1, 64], strides = [1, 1, 1, 1]} : vector<2x7x7x64xbf16> to vector<2x1x1x64xbf16>
    %299 = vector.shape_cast %298 : vector<2x1x1x64xbf16> to vector<2x64xbf16>
    %c30 = arith.constant 30 : index
    %c0_174 = arith.constant 0 : index
    %c0_175 = arith.constant 0 : index
    %300 = vector.load %arg6[%c30, %c0_174, %c0_175] : memref<49x64x256xbf16, #tpu.memory_space<vmem>>, vector<1x64x256xbf16>
    %301 = vector.shape_cast %300 : vector<1x64x256xbf16> to vector<64x256xbf16>
    %cst_176 = arith.constant dense<0.000000e+00> : vector<2x256xf32>
    %302 = tpu.matmul %299, %301, %cst_176 {dimension_numbers = #tpu.dot_dimension_numbers<[1], [0], [0], [1], [0, 0, 1, 1], [], []>} : vector<2x64xbf16>, vector<64x256xbf16>, vector<2x256xf32> -> vector<2x256xf32>
    %303 = arith.addf %279, %302 : vector<2x256xf32>
    %304 = vector.extract_strided_slice %113 {offsets = [0, 4, 3, 0], sizes = [2, 1, 1, 64], strides = [1, 1, 1, 1]} : vector<2x7x7x64xbf16> to vector<2x1x1x64xbf16>
    %305 = vector.shape_cast %304 : vector<2x1x1x64xbf16> to vector<2x64xbf16>
    %c31 = arith.constant 31 : index
    %c0_177 = arith.constant 0 : index
    %c0_178 = arith.constant 0 : index
    %306 = vector.load %arg6[%c31, %c0_177, %c0_178] : memref<49x64x256xbf16, #tpu.memory_space<vmem>>, vector<1x64x256xbf16>
    %307 = vector.shape_cast %306 : vector<1x64x256xbf16> to vector<64x256xbf16>
    %cst_179 = arith.constant dense<0.000000e+00> : vector<2x256xf32>
    %308 = tpu.matmul %305, %307, %cst_179 {dimension_numbers = #tpu.dot_dimension_numbers<[1], [0], [0], [1], [0, 0, 1, 1], [], []>} : vector<2x64xbf16>, vector<64x256xbf16>, vector<2x256xf32> -> vector<2x256xf32>
    %309 = arith.addf %285, %308 : vector<2x256xf32>
    %310 = vector.extract_strided_slice %113 {offsets = [0, 4, 4, 0], sizes = [2, 1, 1, 64], strides = [1, 1, 1, 1]} : vector<2x7x7x64xbf16> to vector<2x1x1x64xbf16>
    %311 = vector.shape_cast %310 : vector<2x1x1x64xbf16> to vector<2x64xbf16>
    %c32 = arith.constant 32 : index
    %c0_180 = arith.constant 0 : index
    %c0_181 = arith.constant 0 : index
    %312 = vector.load %arg6[%c32, %c0_180, %c0_181] : memref<49x64x256xbf16, #tpu.memory_space<vmem>>, vector<1x64x256xbf16>
    %313 = vector.shape_cast %312 : vector<1x64x256xbf16> to vector<64x256xbf16>
    %cst_182 = arith.constant dense<0.000000e+00> : vector<2x256xf32>
    %314 = tpu.matmul %311, %313, %cst_182 {dimension_numbers = #tpu.dot_dimension_numbers<[1], [0], [0], [1], [0, 0, 1, 1], [], []>} : vector<2x64xbf16>, vector<64x256xbf16>, vector<2x256xf32> -> vector<2x256xf32>
    %315 = arith.addf %291, %314 : vector<2x256xf32>
    %316 = vector.extract_strided_slice %113 {offsets = [0, 4, 5, 0], sizes = [2, 1, 1, 64], strides = [1, 1, 1, 1]} : vector<2x7x7x64xbf16> to vector<2x1x1x64xbf16>
    %317 = vector.shape_cast %316 : vector<2x1x1x64xbf16> to vector<2x64xbf16>
    %c33 = arith.constant 33 : index
    %c0_183 = arith.constant 0 : index
    %c0_184 = arith.constant 0 : index
    %318 = vector.load %arg6[%c33, %c0_183, %c0_184] : memref<49x64x256xbf16, #tpu.memory_space<vmem>>, vector<1x64x256xbf16>
    %319 = vector.shape_cast %318 : vector<1x64x256xbf16> to vector<64x256xbf16>
    %cst_185 = arith.constant dense<0.000000e+00> : vector<2x256xf32>
    %320 = tpu.matmul %317, %319, %cst_185 {dimension_numbers = #tpu.dot_dimension_numbers<[1], [0], [0], [1], [0, 0, 1, 1], [], []>} : vector<2x64xbf16>, vector<64x256xbf16>, vector<2x256xf32> -> vector<2x256xf32>
    %321 = arith.addf %297, %320 : vector<2x256xf32>
    %322 = vector.extract_strided_slice %113 {offsets = [0, 4, 6, 0], sizes = [2, 1, 1, 64], strides = [1, 1, 1, 1]} : vector<2x7x7x64xbf16> to vector<2x1x1x64xbf16>
    %323 = vector.shape_cast %322 : vector<2x1x1x64xbf16> to vector<2x64xbf16>
    %c34 = arith.constant 34 : index
    %c0_186 = arith.constant 0 : index
    %c0_187 = arith.constant 0 : index
    %324 = vector.load %arg6[%c34, %c0_186, %c0_187] : memref<49x64x256xbf16, #tpu.memory_space<vmem>>, vector<1x64x256xbf16>
    %325 = vector.shape_cast %324 : vector<1x64x256xbf16> to vector<64x256xbf16>
    %cst_188 = arith.constant dense<0.000000e+00> : vector<2x256xf32>
    %326 = tpu.matmul %323, %325, %cst_188 {dimension_numbers = #tpu.dot_dimension_numbers<[1], [0], [0], [1], [0, 0, 1, 1], [], []>} : vector<2x64xbf16>, vector<64x256xbf16>, vector<2x256xf32> -> vector<2x256xf32>
    %327 = arith.addf %303, %326 : vector<2x256xf32>
    %328 = vector.extract_strided_slice %113 {offsets = [0, 5, 0, 0], sizes = [2, 1, 1, 64], strides = [1, 1, 1, 1]} : vector<2x7x7x64xbf16> to vector<2x1x1x64xbf16>
    %329 = vector.shape_cast %328 : vector<2x1x1x64xbf16> to vector<2x64xbf16>
    %c35 = arith.constant 35 : index
    %c0_189 = arith.constant 0 : index
    %c0_190 = arith.constant 0 : index
    %330 = vector.load %arg6[%c35, %c0_189, %c0_190] : memref<49x64x256xbf16, #tpu.memory_space<vmem>>, vector<1x64x256xbf16>
    %331 = vector.shape_cast %330 : vector<1x64x256xbf16> to vector<64x256xbf16>
    %cst_191 = arith.constant dense<0.000000e+00> : vector<2x256xf32>
    %332 = tpu.matmul %329, %331, %cst_191 {dimension_numbers = #tpu.dot_dimension_numbers<[1], [0], [0], [1], [0, 0, 1, 1], [], []>} : vector<2x64xbf16>, vector<64x256xbf16>, vector<2x256xf32> -> vector<2x256xf32>
    %333 = arith.addf %309, %332 : vector<2x256xf32>
    %334 = vector.extract_strided_slice %113 {offsets = [0, 5, 1, 0], sizes = [2, 1, 1, 64], strides = [1, 1, 1, 1]} : vector<2x7x7x64xbf16> to vector<2x1x1x64xbf16>
    %335 = vector.shape_cast %334 : vector<2x1x1x64xbf16> to vector<2x64xbf16>
    %c36 = arith.constant 36 : index
    %c0_192 = arith.constant 0 : index
    %c0_193 = arith.constant 0 : index
    %336 = vector.load %arg6[%c36, %c0_192, %c0_193] : memref<49x64x256xbf16, #tpu.memory_space<vmem>>, vector<1x64x256xbf16>
    %337 = vector.shape_cast %336 : vector<1x64x256xbf16> to vector<64x256xbf16>
    %cst_194 = arith.constant dense<0.000000e+00> : vector<2x256xf32>
    %338 = tpu.matmul %335, %337, %cst_194 {dimension_numbers = #tpu.dot_dimension_numbers<[1], [0], [0], [1], [0, 0, 1, 1], [], []>} : vector<2x64xbf16>, vector<64x256xbf16>, vector<2x256xf32> -> vector<2x256xf32>
    %339 = arith.addf %315, %338 : vector<2x256xf32>
    %340 = vector.extract_strided_slice %113 {offsets = [0, 5, 2, 0], sizes = [2, 1, 1, 64], strides = [1, 1, 1, 1]} : vector<2x7x7x64xbf16> to vector<2x1x1x64xbf16>
    %341 = vector.shape_cast %340 : vector<2x1x1x64xbf16> to vector<2x64xbf16>
    %c37 = arith.constant 37 : index
    %c0_195 = arith.constant 0 : index
    %c0_196 = arith.constant 0 : index
    %342 = vector.load %arg6[%c37, %c0_195, %c0_196] : memref<49x64x256xbf16, #tpu.memory_space<vmem>>, vector<1x64x256xbf16>
    %343 = vector.shape_cast %342 : vector<1x64x256xbf16> to vector<64x256xbf16>
    %cst_197 = arith.constant dense<0.000000e+00> : vector<2x256xf32>
    %344 = tpu.matmul %341, %343, %cst_197 {dimension_numbers = #tpu.dot_dimension_numbers<[1], [0], [0], [1], [0, 0, 1, 1], [], []>} : vector<2x64xbf16>, vector<64x256xbf16>, vector<2x256xf32> -> vector<2x256xf32>
    %345 = arith.addf %321, %344 : vector<2x256xf32>
    %346 = vector.extract_strided_slice %113 {offsets = [0, 5, 3, 0], sizes = [2, 1, 1, 64], strides = [1, 1, 1, 1]} : vector<2x7x7x64xbf16> to vector<2x1x1x64xbf16>
    %347 = vector.shape_cast %346 : vector<2x1x1x64xbf16> to vector<2x64xbf16>
    %c38 = arith.constant 38 : index
    %c0_198 = arith.constant 0 : index
    %c0_199 = arith.constant 0 : index
    %348 = vector.load %arg6[%c38, %c0_198, %c0_199] : memref<49x64x256xbf16, #tpu.memory_space<vmem>>, vector<1x64x256xbf16>
    %349 = vector.shape_cast %348 : vector<1x64x256xbf16> to vector<64x256xbf16>
    %cst_200 = arith.constant dense<0.000000e+00> : vector<2x256xf32>
    %350 = tpu.matmul %347, %349, %cst_200 {dimension_numbers = #tpu.dot_dimension_numbers<[1], [0], [0], [1], [0, 0, 1, 1], [], []>} : vector<2x64xbf16>, vector<64x256xbf16>, vector<2x256xf32> -> vector<2x256xf32>
    %351 = arith.addf %327, %350 : vector<2x256xf32>
    %352 = vector.extract_strided_slice %113 {offsets = [0, 5, 4, 0], sizes = [2, 1, 1, 64], strides = [1, 1, 1, 1]} : vector<2x7x7x64xbf16> to vector<2x1x1x64xbf16>
    %353 = vector.shape_cast %352 : vector<2x1x1x64xbf16> to vector<2x64xbf16>
    %c39 = arith.constant 39 : index
    %c0_201 = arith.constant 0 : index
    %c0_202 = arith.constant 0 : index
    %354 = vector.load %arg6[%c39, %c0_201, %c0_202] : memref<49x64x256xbf16, #tpu.memory_space<vmem>>, vector<1x64x256xbf16>
    %355 = vector.shape_cast %354 : vector<1x64x256xbf16> to vector<64x256xbf16>
    %cst_203 = arith.constant dense<0.000000e+00> : vector<2x256xf32>
    %356 = tpu.matmul %353, %355, %cst_203 {dimension_numbers = #tpu.dot_dimension_numbers<[1], [0], [0], [1], [0, 0, 1, 1], [], []>} : vector<2x64xbf16>, vector<64x256xbf16>, vector<2x256xf32> -> vector<2x256xf32>
    %357 = arith.addf %333, %356 : vector<2x256xf32>
    %358 = vector.extract_strided_slice %113 {offsets = [0, 5, 5, 0], sizes = [2, 1, 1, 64], strides = [1, 1, 1, 1]} : vector<2x7x7x64xbf16> to vector<2x1x1x64xbf16>
    %359 = vector.shape_cast %358 : vector<2x1x1x64xbf16> to vector<2x64xbf16>
    %c40 = arith.constant 40 : index
    %c0_204 = arith.constant 0 : index
    %c0_205 = arith.constant 0 : index
    %360 = vector.load %arg6[%c40, %c0_204, %c0_205] : memref<49x64x256xbf16, #tpu.memory_space<vmem>>, vector<1x64x256xbf16>
    %361 = vector.shape_cast %360 : vector<1x64x256xbf16> to vector<64x256xbf16>
    %cst_206 = arith.constant dense<0.000000e+00> : vector<2x256xf32>
    %362 = tpu.matmul %359, %361, %cst_206 {dimension_numbers = #tpu.dot_dimension_numbers<[1], [0], [0], [1], [0, 0, 1, 1], [], []>} : vector<2x64xbf16>, vector<64x256xbf16>, vector<2x256xf32> -> vector<2x256xf32>
    %363 = arith.addf %339, %362 : vector<2x256xf32>
    %364 = vector.extract_strided_slice %113 {offsets = [0, 5, 6, 0], sizes = [2, 1, 1, 64], strides = [1, 1, 1, 1]} : vector<2x7x7x64xbf16> to vector<2x1x1x64xbf16>
    %365 = vector.shape_cast %364 : vector<2x1x1x64xbf16> to vector<2x64xbf16>
    %c41 = arith.constant 41 : index
    %c0_207 = arith.constant 0 : index
    %c0_208 = arith.constant 0 : index
    %366 = vector.load %arg6[%c41, %c0_207, %c0_208] : memref<49x64x256xbf16, #tpu.memory_space<vmem>>, vector<1x64x256xbf16>
    %367 = vector.shape_cast %366 : vector<1x64x256xbf16> to vector<64x256xbf16>
    %cst_209 = arith.constant dense<0.000000e+00> : vector<2x256xf32>
    %368 = tpu.matmul %365, %367, %cst_209 {dimension_numbers = #tpu.dot_dimension_numbers<[1], [0], [0], [1], [0, 0, 1, 1], [], []>} : vector<2x64xbf16>, vector<64x256xbf16>, vector<2x256xf32> -> vector<2x256xf32>
    %369 = arith.addf %345, %368 : vector<2x256xf32>
    %370 = vector.extract_strided_slice %113 {offsets = [0, 6, 0, 0], sizes = [2, 1, 1, 64], strides = [1, 1, 1, 1]} : vector<2x7x7x64xbf16> to vector<2x1x1x64xbf16>
    %371 = vector.shape_cast %370 : vector<2x1x1x64xbf16> to vector<2x64xbf16>
    %c42 = arith.constant 42 : index
    %c0_210 = arith.constant 0 : index
    %c0_211 = arith.constant 0 : index
    %372 = vector.load %arg6[%c42, %c0_210, %c0_211] : memref<49x64x256xbf16, #tpu.memory_space<vmem>>, vector<1x64x256xbf16>
    %373 = vector.shape_cast %372 : vector<1x64x256xbf16> to vector<64x256xbf16>
    %cst_212 = arith.constant dense<0.000000e+00> : vector<2x256xf32>
    %374 = tpu.matmul %371, %373, %cst_212 {dimension_numbers = #tpu.dot_dimension_numbers<[1], [0], [0], [1], [0, 0, 1, 1], [], []>} : vector<2x64xbf16>, vector<64x256xbf16>, vector<2x256xf32> -> vector<2x256xf32>
    %375 = arith.addf %351, %374 : vector<2x256xf32>
    %376 = vector.extract_strided_slice %113 {offsets = [0, 6, 1, 0], sizes = [2, 1, 1, 64], strides = [1, 1, 1, 1]} : vector<2x7x7x64xbf16> to vector<2x1x1x64xbf16>
    %377 = vector.shape_cast %376 : vector<2x1x1x64xbf16> to vector<2x64xbf16>
    %c43 = arith.constant 43 : index
    %c0_213 = arith.constant 0 : index
    %c0_214 = arith.constant 0 : index
    %378 = vector.load %arg6[%c43, %c0_213, %c0_214] : memref<49x64x256xbf16, #tpu.memory_space<vmem>>, vector<1x64x256xbf16>
    %379 = vector.shape_cast %378 : vector<1x64x256xbf16> to vector<64x256xbf16>
    %cst_215 = arith.constant dense<0.000000e+00> : vector<2x256xf32>
    %380 = tpu.matmul %377, %379, %cst_215 {dimension_numbers = #tpu.dot_dimension_numbers<[1], [0], [0], [1], [0, 0, 1, 1], [], []>} : vector<2x64xbf16>, vector<64x256xbf16>, vector<2x256xf32> -> vector<2x256xf32>
    %381 = arith.addf %357, %380 : vector<2x256xf32>
    %382 = vector.extract_strided_slice %113 {offsets = [0, 6, 2, 0], sizes = [2, 1, 1, 64], strides = [1, 1, 1, 1]} : vector<2x7x7x64xbf16> to vector<2x1x1x64xbf16>
    %383 = vector.shape_cast %382 : vector<2x1x1x64xbf16> to vector<2x64xbf16>
    %c44 = arith.constant 44 : index
    %c0_216 = arith.constant 0 : index
    %c0_217 = arith.constant 0 : index
    %384 = vector.load %arg6[%c44, %c0_216, %c0_217] : memref<49x64x256xbf16, #tpu.memory_space<vmem>>, vector<1x64x256xbf16>
    %385 = vector.shape_cast %384 : vector<1x64x256xbf16> to vector<64x256xbf16>
    %cst_218 = arith.constant dense<0.000000e+00> : vector<2x256xf32>
    %386 = tpu.matmul %383, %385, %cst_218 {dimension_numbers = #tpu.dot_dimension_numbers<[1], [0], [0], [1], [0, 0, 1, 1], [], []>} : vector<2x64xbf16>, vector<64x256xbf16>, vector<2x256xf32> -> vector<2x256xf32>
    %387 = arith.addf %363, %386 : vector<2x256xf32>
    %388 = vector.extract_strided_slice %113 {offsets = [0, 6, 3, 0], sizes = [2, 1, 1, 64], strides = [1, 1, 1, 1]} : vector<2x7x7x64xbf16> to vector<2x1x1x64xbf16>
    %389 = vector.shape_cast %388 : vector<2x1x1x64xbf16> to vector<2x64xbf16>
    %c45 = arith.constant 45 : index
    %c0_219 = arith.constant 0 : index
    %c0_220 = arith.constant 0 : index
    %390 = vector.load %arg6[%c45, %c0_219, %c0_220] : memref<49x64x256xbf16, #tpu.memory_space<vmem>>, vector<1x64x256xbf16>
    %391 = vector.shape_cast %390 : vector<1x64x256xbf16> to vector<64x256xbf16>
    %cst_221 = arith.constant dense<0.000000e+00> : vector<2x256xf32>
    %392 = tpu.matmul %389, %391, %cst_221 {dimension_numbers = #tpu.dot_dimension_numbers<[1], [0], [0], [1], [0, 0, 1, 1], [], []>} : vector<2x64xbf16>, vector<64x256xbf16>, vector<2x256xf32> -> vector<2x256xf32>
    %393 = arith.addf %369, %392 : vector<2x256xf32>
    %394 = vector.extract_strided_slice %113 {offsets = [0, 6, 4, 0], sizes = [2, 1, 1, 64], strides = [1, 1, 1, 1]} : vector<2x7x7x64xbf16> to vector<2x1x1x64xbf16>
    %395 = vector.shape_cast %394 : vector<2x1x1x64xbf16> to vector<2x64xbf16>
    %c46 = arith.constant 46 : index
    %c0_222 = arith.constant 0 : index
    %c0_223 = arith.constant 0 : index
    %396 = vector.load %arg6[%c46, %c0_222, %c0_223] : memref<49x64x256xbf16, #tpu.memory_space<vmem>>, vector<1x64x256xbf16>
    %397 = vector.shape_cast %396 : vector<1x64x256xbf16> to vector<64x256xbf16>
    %cst_224 = arith.constant dense<0.000000e+00> : vector<2x256xf32>
    %398 = tpu.matmul %395, %397, %cst_224 {dimension_numbers = #tpu.dot_dimension_numbers<[1], [0], [0], [1], [0, 0, 1, 1], [], []>} : vector<2x64xbf16>, vector<64x256xbf16>, vector<2x256xf32> -> vector<2x256xf32>
    %399 = arith.addf %375, %398 : vector<2x256xf32>
    %400 = vector.extract_strided_slice %113 {offsets = [0, 6, 5, 0], sizes = [2, 1, 1, 64], strides = [1, 1, 1, 1]} : vector<2x7x7x64xbf16> to vector<2x1x1x64xbf16>
    %401 = vector.shape_cast %400 : vector<2x1x1x64xbf16> to vector<2x64xbf16>
    %c47 = arith.constant 47 : index
    %c0_225 = arith.constant 0 : index
    %c0_226 = arith.constant 0 : index
    %402 = vector.load %arg6[%c47, %c0_225, %c0_226] : memref<49x64x256xbf16, #tpu.memory_space<vmem>>, vector<1x64x256xbf16>
    %403 = vector.shape_cast %402 : vector<1x64x256xbf16> to vector<64x256xbf16>
    %cst_227 = arith.constant dense<0.000000e+00> : vector<2x256xf32>
    %404 = tpu.matmul %401, %403, %cst_227 {dimension_numbers = #tpu.dot_dimension_numbers<[1], [0], [0], [1], [0, 0, 1, 1], [], []>} : vector<2x64xbf16>, vector<64x256xbf16>, vector<2x256xf32> -> vector<2x256xf32>
    %405 = arith.addf %381, %404 : vector<2x256xf32>
    %406 = vector.extract_strided_slice %113 {offsets = [0, 6, 6, 0], sizes = [2, 1, 1, 64], strides = [1, 1, 1, 1]} : vector<2x7x7x64xbf16> to vector<2x1x1x64xbf16>
    %407 = vector.shape_cast %406 : vector<2x1x1x64xbf16> to vector<2x64xbf16>
    %c48 = arith.constant 48 : index
    %c0_228 = arith.constant 0 : index
    %c0_229 = arith.constant 0 : index
    %408 = vector.load %arg6[%c48, %c0_228, %c0_229] : memref<49x64x256xbf16, #tpu.memory_space<vmem>>, vector<1x64x256xbf16>
    %409 = vector.shape_cast %408 : vector<1x64x256xbf16> to vector<64x256xbf16>
    %cst_230 = arith.constant dense<0.000000e+00> : vector<2x256xf32>
    %410 = tpu.matmul %407, %409, %cst_230 {dimension_numbers = #tpu.dot_dimension_numbers<[1], [0], [0], [1], [0, 0, 1, 1], [], []>} : vector<2x64xbf16>, vector<64x256xbf16>, vector<2x256xf32> -> vector<2x256xf32>
    %411 = arith.addf %387, %410 : vector<2x256xf32>
    %412 = arith.addf %411, %393 : vector<2x256xf32>
    %413 = arith.addf %399, %405 : vector<2x256xf32>
    %414 = arith.addf %412, %413 : vector<2x256xf32>
    %c0_231 = arith.constant 0 : index
    %c0_232 = arith.constant 0 : index
    %415 = vector.load %arg7[%c0_231, %c0_232] : memref<1x256xf32, #tpu.memory_space<vmem>>, vector<1x256xf32>
    %416 = vector.broadcast %415 : vector<1x256xf32> to vector<2x256xf32>
    %417 = arith.addf %414, %416 : vector<2x256xf32>
    %cst_233 = arith.constant 0.000000e+00 : f32
    %418 = vector.broadcast %cst_233 : f32 to vector<2x256xf32>
    %419 = arith.maximumf %417, %418 : vector<2x256xf32>
    %420 = arith.truncf %419 : vector<2x256xf32> to vector<2x256xbf16>
    %c0_234 = arith.constant 0 : index
    %c0_235 = arith.constant 0 : index
    %421 = vector.load %arg8[%c0_234, %c0_235] : memref<256x128xbf16, #tpu.memory_space<vmem>>, vector<256x128xbf16>
    %cst_236 = arith.constant dense<0.000000e+00> : vector<2x128xf32>
    %422 = tpu.matmul %420, %421, %cst_236 {dimension_numbers = #tpu.dot_dimension_numbers<[1], [0], [0], [1], [0, 0, 1, 1], [], []>} : vector<2x256xbf16>, vector<256x128xbf16>, vector<2x128xf32> -> vector<2x128xf32>
    %c0_237 = arith.constant 0 : index
    %c0_238 = arith.constant 0 : index
    %423 = vector.load %arg9[%c0_237, %c0_238] : memref<1x128xf32, #tpu.memory_space<vmem>>, vector<1x128xf32>
    %424 = vector.broadcast %423 : vector<1x128xf32> to vector<2x128xf32>
    %425 = arith.addf %422, %424 : vector<2x128xf32>
    %c0_239 = arith.constant 0 : index
    %c0_240 = arith.constant 0 : index
    %426 = vector.load %arg10[%c0_239, %c0_240] : memref<2x128xf32, #tpu.memory_space<vmem>>, vector<2x128xf32>
    tpu.vector_store %arg10[%c0_239, %c0_240], %425 {strides = array<i32>} : memref<2x128xf32, #tpu.memory_space<vmem>>, vector<2x128xf32>,
    return
  }
}

</mosaic_0001>

<bundles_post_ra>
// kernel: vae_encoder_forward.1
= control target key start
LH: loop header
LB: loop body
LE: loop exit
PB: predicated region body
PF: predicated region fallthrough
CT: control target
= control target key end

     0   :  { %v10984_v0 = vmov 0   ;;  %vm275_vm0 = vcmask 130048   ;;  %vm1226_vm1 = vcmask 261120   ;;  %vm3430_vm2 = vcmask 1041409   ;;  %s13846_s1 = inlined_call_operand.vmem [shape: f32[512,1], index: 1, kind: input, shape index: {}]   ;;  %s13847_s2 = inlined_call_operand.vmem [shape: bf16[16,32], index: 2, kind: input, shape index: {}]   ;;  %s13848_s0 = inlined_call_operand.vmem [shape: bf16[512,16], index: 0, kind: input, shape index: {}]   ;;  %s13849_s4 = inlined_call_operand.vmem [shape: bf16[16,32,64], index: 4, kind: input, shape index: {}]   ;;  %s13850_s3 = inlined_call_operand.vmem [shape: f32[1,32], index: 3, kind: input, shape index: {}]   ;;  %s13851_s6 = inlined_call_operand.vmem [shape: bf16[49,64,256], index: 6, kind: input, shape index: {}]   ;;  %s13852_s5 = inlined_call_operand.vmem [shape: f32[1,64], index: 5, kind: input, shape index: {}]   ;;  %s13853_s8 = inlined_call_operand.vmem [shape: bf16[256,128], index: 8, kind: input, shape index: {}]   ;;  %s13854_s7 = inlined_call_operand.vmem [shape: f32[1,256], index: 7, kind: input, shape index: {}]   ;;  %s13855_s9 = inlined_call_operand.vmem [shape: f32[1,128], index: 9, kind: input, shape index: {}]   ;;  %s13856_s10 = inlined_call_operand.vmem [shape: f32[2,128], index: 10, kind: output, shape index: {}]  }
   0x1   :  { %10313 = vset.pattern.permute.xlu0 %v10984_v0  ;;  %10314 = vset.pattern.permute.xlu1 %v10984_v0  ;;  %v741_v1 = vld [vmem:[%s13846_s1 + $0x80] sm:$0xff]  ;;  %v743_v3 = vld [vmem:[%s13846_s1 + $0x90] sm:$0xff]  ;;  %v742_v4 = vld [vmem:[%s13846_s1 + $0x88] sm:$0xff]  ;;  %vm3473_vm3 = vcmask 523264  }
   0x2   :  { %871 = vperm.xlu0 %10313, %v741_v1   ;;  %v10315_v2 = vld [vmem:[%s13847_s2] sm:$0xff]   ;;  %881 = vperm.xlu1 %10314, %v743_v3   ;;  %v744_v6 = vld [vmem:[%s13846_s1 + $0x98] sm:$0xff]  ;;  %v10317_v7 = vld [vmem:[%s13848_s0 + $0x8] sm:$0xff]  }
   0x3   :  { %v10316_v5 = vld [vmem:[%s13848_s0] sm:$0xff]   ;;  %9778 = vmatprep.subr.bf16.mxu0 %v10315_v2  ;;  %v10318_v9 = vld [vmem:[%s13848_s0 + $0x10] sm:$0xff]   ;;  %v746_v10 = vld [vmem:[%s13846_s1 + $0xa8] sm:$0xff] }
   0x4   :  { %9779 = vmatpush3.bf16.msra.mxu0 %v10315_v2  ;;  %9780 = vmatprep.mubr.msk.bf16.mxu0 %vm275_vm0, %v10316_v5  ;;  %v745_v8 = vld [vmem:[%s13846_s1 + $0xa0] sm:$0xff]  ;;  %v747_v11 = vld [vmem:[%s13846_s1 + $0xb0] sm:$0xff]  ;;  %v748_v12 = vld [vmem:[%s13846_s1 + $0xb8] sm:$0xff] }
   0x5   :  { %v10319_v13 = vld [vmem:[%s13848_s0 + $0x18] sm:$0xff]   ;;  %v10320_v14 = vld [vmem:[%s13848_s0 + $0x20] sm:$0xff]   ;;  %v750_v16 = vld [vmem:[%s13846_s1 + $0xc8] sm:$0xff] }
   0x6   :  { %876 = vperm.xlu0 %10313, %v742_v4   ;;  %886 = vperm.xlu1 %10314, %v744_v6   ;;  %v749_v15 = vld [vmem:[%s13846_s1 + $0xc0] sm:$0xff]  ;;  %v751_v17 = vld [vmem:[%s13846_s1 + $0xd0] sm:$0xff]  ;;  %v752_v18 = vld [vmem:[%s13846_s1 + $0xd8] sm:$0xff] }
   0x7   :  { %9781 = vmatmul.mubr.msk.bf16.vlgmr.msra.gmra.mrb[0].mxu0 %vm275_vm0, %v10317_v7  ;;  %v10321_v19 = vld [vmem:[%s13848_s0 + $0x28] sm:$0xff]   ;;  %v10322_v20 = vld [vmem:[%s13848_s0 + $0x30] sm:$0xff]   ;;  %v753_v21 = vld [vmem:[%s13846_s1 + $0xe0] sm:$0xff] }
   0x8   :  { %9784 = vmatprep.mubr.msk.bf16.mxu0 %vm275_vm0, %v10318_v9  ;;  %v754_v22 = vld [vmem:[%s13846_s1 + $0xe8] sm:$0xff]  ;;  %v755_v23 = vld [vmem:[%s13846_s1 + $0xf0] sm:$0xff]  ;;  %v756_v24 = vld [vmem:[%s13846_s1 + $0xf8] sm:$0xff] }
   0x9   :  { %v10323_v25 = vld [vmem:[%s13848_s0 + $0x38] sm:$0xff]   ;;  %v10324_v26 = vld [vmem:[%s13848_s0 + $0x40] sm:$0xff]   ;;  %v726_v28 = vld [vmem:[%s13846_s1 + $0x8] sm:$0xff] }
   0xa   :  { %891 = vperm.xlu0 %10313, %v745_v8   ;;  %896 = vperm.xlu1 %10314, %v746_v10   ;;  %v725_v27 = vld [vmem:[%s13846_s1] sm:$0xff]  ;;  %v727_v29 = vld [vmem:[%s13846_s1 + $0x10] sm:$0xff]  ;;  %v728_v30 = vld [vmem:[%s13846_s1 + $0x18] sm:$0xff] }
   0xb   :  { %v10325_v31 = vld [vmem:[%s13848_s0 + $0x48] sm:$0xff]   ;;  %v10326_v32 = vld [vmem:[%s13848_s0 + $0x50] sm:$0xff]   ;;  %v729_v33 = vld [vmem:[%s13846_s1 + $0x20] sm:$0xff] }
   0xc   :  { %v730_v34 = vld [vmem:[%s13846_s1 + $0x28] sm:$0xff]  ;;  %v731_v35 = vld [vmem:[%s13846_s1 + $0x30] sm:$0xff]  ;;  %v732_v36 = vld [vmem:[%s13846_s1 + $0x38] sm:$0xff] }
   0xd   :  { %v10327_v37 = vld [vmem:[%s13848_s0 + $0x58] sm:$0xff]   ;;  %v10328_v38 = vld [vmem:[%s13848_s0 + $0x60] sm:$0xff]   ;;  %v734_v40 = vld [vmem:[%s13846_s1 + $0x48] sm:$0xff] }
   0xe   :  { %901 = vperm.xlu0 %10313, %v747_v11   ;;  %906 = vperm.xlu1 %10314, %v748_v12   ;;  %v733_v39 = vld [vmem:[%s13846_s1 + $0x40] sm:$0xff]  ;;  %v735_v41 = vld [vmem:[%s13846_s1 + $0x50] sm:$0xff]  ;;  %v736_v42 = vld [vmem:[%s13846_s1 + $0x58] sm:$0xff] }
   0xf   :  { %9785 = vmatmul.mubr.msk.bf16.gmra.mrb[4].mxu0 %vm275_vm0, %v10319_v13  ;;  %v10329_v43 = vld [vmem:[%s13848_s0 + $0x68] sm:$0xff]   ;;  %v10330_v44 = vld [vmem:[%s13848_s0 + $0x70] sm:$0xff]   ;;  %v737_v45 = vld [vmem:[%s13846_s1 + $0x60] sm:$0xff] }
  0x10   :  { %9788 = vmatprep.mubr.msk.bf16.mxu0 %vm275_vm0, %v10320_v14  ;;  %v738_v46 = vld [vmem:[%s13846_s1 + $0x68] sm:$0xff]  ;;  %v10348_v47 = vld [vmem:[%s13849_s4 + $0x10] sm:$0xff]   ;;  %v740_v49 = vld [vmem:[%s13846_s1 + $0x78] sm:$0xff] }
  0x11   :  { %v739_v48 = vld [vmem:[%s13846_s1 + $0x70] sm:$0xff]  ;;  %v10331_v50 = vld [vmem:[%s13848_s0 + $0x78] sm:$0xff]   ;;  %9844 = vmatprep.subr.bf16.mxu0 %v10348_v47  ;;  %v10332_v51 = vld [vmem:[%s13848_s0 + $0x80] sm:$0xff]   ;;  %10164 = vmatprep.subr.bf16.mxu1 %v10348_v47 }
  0x12   :  { %911 = vperm.xlu0 %10313, %v749_v15   ;;  %916 = vperm.xlu1 %10314, %v750_v16   ;;  %v757_v52 = vld [vmem:[%s13846_s1 + $0x100] sm:$0xff]  ;;  %v758_v53 = vld [vmem:[%s13846_s1 + $0x108] sm:$0xff]  ;;  %v759_v54 = vld [vmem:[%s13846_s1 + $0x110] sm:$0xff] }
  0x13   :  { %9845 = vmatpush3.bf16.msra.mxu0 %v10348_v47  ;;  %10166 = vmatpush3.bf16.msra.mxu1 %v10348_v47  ;;  %v760_v55 = vld [vmem:[%s13846_s1 + $0x118] sm:$0xff]  ;;  %v10333_v56 = vld [vmem:[%s13848_s0 + $0x88] sm:$0xff]   ;;  %v10334_v57 = vld [vmem:[%s13848_s0 + $0x90] sm:$0xff]  }
  0x14   :  { %v761_v58 = vld [vmem:[%s13846_s1 + $0x120] sm:$0xff]  ;;  %v762_v59 = vld [vmem:[%s13846_s1 + $0x128] sm:$0xff]  ;;  %v10349_v60 = vld [vmem:[%s13849_s4 + $0x18] sm:$0xff]  }
  0x15   :  { %9846 = vmatprep.subr.bf16.mxu0 %v10349_v60  ;;  %v763_v61 = vld [vmem:[%s13846_s1 + $0x130] sm:$0xff]  ;;  %v764_v62 = vld [vmem:[%s13846_s1 + $0x138] sm:$0xff]  ;;  %10165 = vmatprep.subr.bf16.mxu1 %v10349_v60  ;;  %v10336_v1 = vld [vmem:[%s13848_s0 + $0xa0] sm:$0xff]  }
  0x16   :  { %921 = vperm.xlu0 %10313, %v751_v17   ;;  %926 = vperm.xlu1 %10314, %v752_v18   ;;  %v10335_v63 = vld [vmem:[%s13848_s0 + $0x98] sm:$0xff]   ;;  %v765_v2 = vld [vmem:[%s13846_s1 + $0x140] sm:$0xff]  ;;  %v766_v3 = vld [vmem:[%s13846_s1 + $0x148] sm:$0xff] }
  0x17   :  { %9789 = vmatmul.mubr.msk.bf16.gmra.mrb[8].mxu0 %vm275_vm0, %v10321_v19  ;;  %10167 = vmatpush3.bf16.msra.mxu1 %v10349_v60  ;;  %v767_v4 = vld [vmem:[%s13846_s1 + $0x150] sm:$0xff]  ;;  %v768_v5 = vld [vmem:[%s13846_s1 + $0x158] sm:$0xff]  ;;  %v10337_v6 = vld [vmem:[%s13848_s0 + $0xa8] sm:$0xff]  }
  0x18   :  { %9792 = vmatprep.mubr.msk.bf16.mxu0 %vm275_vm0, %v10322_v20  ;;  %9847 = vmatpush3.bf16.msra.mxu0 %v10349_v60  ;;  %v10338_v7 = vld [vmem:[%s13848_s0 + $0xb0] sm:$0xff]   ;;  %v769_v8 = vld [vmem:[%s13846_s1 + $0x160] sm:$0xff]  ;;  %v770_v9 = vld [vmem:[%s13846_s1 + $0x168] sm:$0xff] }
  0x19   :  { %v771_v10 = vld [vmem:[%s13846_s1 + $0x170] sm:$0xff]  ;;  %v772_v11 = vld [vmem:[%s13846_s1 + $0x178] sm:$0xff]  ;;  %v10340_v13 = vld [vmem:[%s13848_s0 + $0xc0] sm:$0xff]  }
  0x1a   :  { %931 = vperm.xlu0 %10313, %v753_v21   ;;  %936 = vperm.xlu1 %10314, %v754_v22   ;;  %v10339_v12 = vld [vmem:[%s13848_s0 + $0xb8] sm:$0xff]   ;;  %v773_v14 = vld [vmem:[%s13846_s1 + $0x180] sm:$0xff]  ;;  %v774_v15 = vld [vmem:[%s13846_s1 + $0x188] sm:$0xff] }
  0x1b   :  { %v775_v16 = vld [vmem:[%s13846_s1 + $0x190] sm:$0xff]  ;;  %v776_v17 = vld [vmem:[%s13846_s1 + $0x198] sm:$0xff]  ;;  %v10341_v18 = vld [vmem:[%s13848_s0 + $0xc8] sm:$0xff]  }
  0x1c   :  { %v10342_v19 = vld [vmem:[%s13848_s0 + $0xd0] sm:$0xff]   ;;  %v777_v20 = vld [vmem:[%s13846_s1 + $0x1a0] sm:$0xff]  ;;  %v778_v21 = vld [vmem:[%s13846_s1 + $0x1a8] sm:$0xff] }
  0x1d   :  { %v779_v22 = vld [vmem:[%s13846_s1 + $0x1b0] sm:$0xff] }
  0x1e   :  { %941 = vperm.xlu0 %10313, %v755_v23   ;;  %946 = vperm.xlu1 %10314, %v756_v24   ;;  %v780_v23 = vld [vmem:[%s13846_s1 + $0x1b8] sm:$0xff] }
  0x1f   :  { %9793 = vmatmul.mubr.msk.bf16.gmra.mrb[12].mxu0 %vm275_vm0, %v10323_v25  ;;  %v10343_v24 = vld [vmem:[%s13848_s0 + $0xd8] sm:$0xff]   ;;  %v10344_v25 = vld [vmem:[%s13848_s0 + $0xe0] sm:$0xff]  }
  0x20   :  { %9796 = vmatprep.mubr.msk.bf16.mxu0 %vm275_vm0, %v10324_v26  ;;  %v781_v26 = vld [vmem:[%s13846_s1 + $0x1c0] sm:$0xff] }
  0x22   :  { %791 = vperm.xlu0 %10313, %v725_v27   ;;  %796 = vperm.xlu1 %10314, %v726_v28   ;;  %v782_v27 = vld [vmem:[%s13846_s1 + $0x1c8] sm:$0xff]  ;;  %v783_v28 = vld [vmem:[%s13846_s1 + $0x1d0] sm:$0xff] }
  0x26   :  { %801 = vperm.xlu0 %10313, %v727_v29   ;;  %806 = vperm.xlu1 %10314, %v728_v30   ;;  %v784_v29 = vld [vmem:[%s13846_s1 + $0x1d8] sm:$0xff]  ;;  %v10345_v30 = vld [vmem:[%s13848_s0 + $0xe8] sm:$0xff]  }
  0x27   :  { %9797 = vmatmul.mubr.msk.bf16.gmra.mrb[16].mxu0 %vm275_vm0, %v10325_v31  ;;  %v10346_v31 = vld [vmem:[%s13848_s0 + $0xf0] sm:$0xff]  }
  0x28   :  { %9800 = vmatprep.mubr.msk.bf16.mxu0 %vm275_vm0, %v10326_v32  ;;  %v785_v32 = vld [vmem:[%s13846_s1 + $0x1e0] sm:$0xff] }
  0x2a   :  { %811 = vperm.xlu0 %10313, %v729_v33   ;;  %816 = vperm.xlu1 %10314, %v730_v34   ;;  %v786_v33 = vld [vmem:[%s13846_s1 + $0x1e8] sm:$0xff]  ;;  %v787_v34 = vld [vmem:[%s13846_s1 + $0x1f0] sm:$0xff] }
  0x2e   :  { %821 = vperm.xlu0 %10313, %v731_v35   ;;  %826 = vperm.xlu1 %10314, %v732_v36   ;;  %v788_v35 = vld [vmem:[%s13846_s1 + $0x1f8] sm:$0xff] }
  0x2f   :  { %9801 = vmatmul.mubr.msk.bf16.gmra.mrb[20].mxu0 %vm275_vm0, %v10327_v37  ;;  %v10347_v36 = vld [vmem:[%s13848_s0 + $0xf8] sm:$0xff]   ;;  %v11374_v37 = vld [vmem:[%s13849_s4 + $0x90] sm:$0xff]  }
  0x30   :  { %9804 = vmatprep.mubr.msk.bf16.mxu0 %vm275_vm0, %v10328_v38  ;;  %10004 = vmatprep.subr.bf16.mxu0 %v11374_v37  ;;  %v11380_v38 = vld [vmem:[%s13849_s4] sm:$0xff]  }
  0x31   :  { %9864 = vmatprep.subr.bf16.mxu1 %v11380_v38 }
  0x32   :  { %831 = vperm.xlu0 %10313, %v733_v39   ;;  %836 = vperm.xlu1 %10314, %v734_v40  }
  0x36   :  { %841 = vperm.xlu0 %10313, %v735_v41   ;;  %846 = vperm.xlu1 %10314, %v736_v42  }
  0x37   :  { %9805 = vmatmul.mubr.msk.bf16.gmra.mrb[24].mxu0 %vm275_vm0, %v10329_v43 }
  0x38   :  { %9808 = vmatprep.mubr.msk.bf16.mxu0 %vm275_vm0, %v10330_v44 }
  0x3a   :  { %851 = vperm.xlu0 %10313, %v737_v45   ;;  %856 = vperm.xlu1 %10314, %v738_v46  }
  0x3e   :  { %861 = vperm.xlu0 %10313, %v739_v48   ;;  %866 = vperm.xlu1 %10314, %v740_v49  }
  0x3f   :  { %9809 = vmatmul.mubr.msk.bf16.gmra.mrb[28].mxu0 %vm275_vm0, %v10331_v50 }
  0x40   :  { %9812 = vmatprep.mubr.msk.bf16.mxu0 %vm275_vm0, %v10332_v51 }
  0x42   :  { %951 = vperm.xlu0 %10313, %v757_v52   ;;  %956 = vperm.xlu1 %10314, %v758_v53  }
  0x46   :  { %961 = vperm.xlu0 %10313, %v759_v54   ;;  %966 = vperm.xlu1 %10314, %v760_v55  }
  0x47   :  { %9813 = vmatmul.mubr.msk.bf16.gmra.mrb[32].mxu0 %vm275_vm0, %v10333_v56 }
  0x48   :  { %9816 = vmatprep.mubr.msk.bf16.mxu0 %vm275_vm0, %v10334_v57 }
  0x4a   :  { %971 = vperm.xlu0 %10313, %v761_v58   ;;  %976 = vperm.xlu1 %10314, %v762_v59   ;;  %v11418_v59 = vld [vmem:[%s13850_s3] ss:$0 sm:$0xff] }
  0x4e   :  { %981 = vperm.xlu0 %10313, %v763_v61   ;;  %986 = vperm.xlu1 %10314, %v764_v62  }
  0x4f   :  { %9817 = vmatmul.mubr.msk.bf16.gmra.mrb[36].mxu0 %vm275_vm0, %v10335_v63 }
  0x50   :  { %9820 = vmatprep.mubr.msk.bf16.mxu0 %vm275_vm0, %v10336_v1 }
  0x52   :  { %991 = vperm.xlu0 %10313, %v765_v2   ;;  %996 = vperm.xlu1 %10314, %v766_v3  }
  0x56   :  { %1001 = vperm.xlu0 %10313, %v767_v4   ;;  %1006 = vperm.xlu1 %10314, %v768_v5  }
  0x57   :  { %9821 = vmatmul.mubr.msk.bf16.gmra.mrb[40].mxu0 %vm275_vm0, %v10337_v6 }
  0x58   :  { %9824 = vmatprep.mubr.msk.bf16.mxu0 %vm275_vm0, %v10338_v7 }
  0x5a   :  { %1011 = vperm.xlu0 %10313, %v769_v8   ;;  %1016 = vperm.xlu1 %10314, %v770_v9  }
  0x5e   :  { %1021 = vperm.xlu0 %10313, %v771_v10   ;;  %1026 = vperm.xlu1 %10314, %v772_v11  }
  0x5f   :  { %9825 = vmatmul.mubr.msk.bf16.gmra.mrb[44].mxu0 %vm275_vm0, %v10339_v12 }
  0x60   :  { %9828 = vmatprep.mubr.msk.bf16.mxu0 %vm275_vm0, %v10340_v13 }
  0x62   :  { %1031 = vperm.xlu0 %10313, %v773_v14   ;;  %1036 = vperm.xlu1 %10314, %v774_v15  }
  0x66   :  { %1041 = vperm.xlu0 %10313, %v775_v16   ;;  %1046 = vperm.xlu1 %10314, %v776_v17  }
  0x67   :  { %9829 = vmatmul.mubr.msk.bf16.gmra.mrb[48].mxu0 %vm275_vm0, %v10341_v18 }
  0x68   :  { %9832 = vmatprep.mubr.msk.bf16.mxu0 %vm275_vm0, %v10342_v19 }
  0x6a   :  { %1051 = vperm.xlu0 %10313, %v777_v20   ;;  %1056 = vperm.xlu1 %10314, %v778_v21  }
  0x6e   :  { %1061 = vperm.xlu0 %10313, %v779_v22   ;;  %1066 = vperm.xlu1 %10314, %v780_v23  }
  0x6f   :  { %9833 = vmatmul.mubr.msk.bf16.gmra.mrb[52].mxu0 %vm275_vm0, %v10343_v24 }
  0x70   :  { %9836 = vmatprep.mubr.msk.bf16.mxu0 %vm275_vm0, %v10344_v25 }
  0x72   :  { %1071 = vperm.xlu0 %10313, %v781_v26   ;;  %1076 = vperm.xlu1 %10314, %v782_v27  }
  0x76   :  { %1081 = vperm.xlu0 %10313, %v783_v28   ;;  %1086 = vperm.xlu1 %10314, %v784_v29  }
  0x77   :  { %9837 = vmatmul.mubr.msk.bf16.gmra.mrb[56].mxu0 %vm275_vm0, %v10345_v30 }
  0x78   :  { %9840 = vmatprep.mubr.msk.bf16.mxu0 %vm275_vm0, %v10346_v31 }
  0x7a   :  { %1091 = vperm.xlu0 %10313, %v785_v32   ;;  %1096 = vperm.xlu1 %10314, %v786_v33  }
  0x7e   :  { %1101 = vperm.xlu0 %10313, %v787_v34   ;;  %1106 = vperm.xlu1 %10314, %v788_v35  }
  0x7f   :  { %9841 = vmatmul.mubr.msk.bf16.gmra.mrb[60].mxu0 %vm275_vm0, %v10347_v36 }
  0x81   :  { %v11382_v39 = vpop.permute.xlu0 %871  ;;  %v11384_v40 = vpop.permute.xlu1 %881 }
  0x85   :  { %v11387_v41 = vpop.permute.xlu0 %876  ;;  %v11389_v42 = vpop.permute.xlu1 %886 }
  0x89   :  { %v11391_v43 = vpop.permute.xlu0 %891  ;;  %v11393_v44 = vpop.permute.xlu1 %896 }
  0x8d   :  { %v11395_v45 = vpop.permute.xlu0 %901  ;;  %v11397_v46 = vpop.permute.xlu1 %906 }
  0x91   :  { %v11399_v47 = vpop.permute.xlu0 %911  ;;  %v11401_v48 = vpop.permute.xlu1 %916 }
  0x95   :  { %v11403_v49 = vpop.permute.xlu0 %921  ;;  %v11405_v50 = vpop.permute.xlu1 %926 }
  0x99   :  { %v11407_v51 = vpop.permute.xlu0 %931  ;;  %v11409_v52 = vpop.permute.xlu1 %936 }
  0x9d   :  { %v11411_v53 = vpop.permute.xlu0 %941  ;;  %v11413_v54 = vpop.permute.xlu1 %946 }
  0xa1   :  { %v792_v55 = vpop.permute.xlu0 %791  ;;  %v797_v56 = vpop.permute.xlu1 %796 }
  0xa5   :  { %v802_v57 = vpop.permute.xlu0 %801  ;;  %v807_v58 = vpop.permute.xlu1 %806 }
  0xa9   :  { %v812_v60 = vpop.permute.xlu0 %811  ;;  %v817_v61 = vpop.permute.xlu1 %816 }
  0xad   :  { %v822_v9 = vpop.permute.xlu0 %821  ;;  %v827_v11 = vpop.permute.xlu1 %826 }
  0xb1   :  { %v832_v24 = vpop.permute.xlu0 %831  ;;  %v837_v28 = vpop.permute.xlu1 %836 }
  0xda   :  { %v9782_v62 = vpop.f32.mrb[0].mxu0 }
  0xdb   :  { %v415_v63 = vadd.f32 %v9782_v62, %v11418_v59  ;;  %v406_v1 = vpop.f32.mrb[1].mxu0 }
  0xdc   :  { %v407_v2 = vadd.f32 %v11418_v59, %v406_v1  ;;  %v9783_v3 = vpop.f32.mrb[2].mxu0 }
  0xdd   :  { %v663_v4 = vmax.f32 %v415_v63, 0.0  ;;  %v418_v5 = vadd.f32 %v9783_v3, %v11418_v59  ;;  %v409_v6 = vpop.f32.mrb[3].mxu0  ;;  %v847_v63 = vpop.permute.xlu1 %846 }
  0xde   :  { %v661_v7 = vmax.f32 %v407_v2, 0.0  ;;  %v410_v8 = vadd.f32 %v11418_v59, %v409_v6 }
  0xdf   :  { %v664_v10 = vmax.f32 %v418_v5, 0.0  ;;  %v1111_v13 = vmul.f32 %v802_v57, %v663_v4 }
  0xe0   :  { %v662_v12 = vmax.f32 %v410_v8, 0.0  ;;  %v1109_v15 = vmul.f32 %v792_v55, %v661_v7 }
  0xe1   :  { %v1112_v14 = vmul.f32 %v807_v58, %v664_v10 }
  0xe2   :  { %v1110_v16 = vmul.f32 %v797_v56, %v662_v12  ;;  %v9786_v17 = vpop.f32.mrb[4].mxu0  ;;  %v842_v56 = vpop.permute.xlu0 %841 }
  0xe3   :  { %v11424_v18 = vpack.c.bf16 %v1112_v14, %v1111_v13  ;;  %v431_v19 = vadd.f32 %v9786_v17, %v11418_v59  ;;  %v422_v20 = vpop.f32.mrb[5].mxu0  ;;  %v857_v12 = vpop.permute.xlu1 %856 }
  0xe4   :  { %v11427_v21 = vpack.c.bf16 %v1110_v16, %v1109_v15  ;;  %v423_v22 = vadd.f32 %v11418_v59, %v422_v20  ;;  %v9787_v23 = vpop.f32.mrb[6].mxu0 }
  0xe5   :  { %v667_v25 = vmax.f32 %v431_v19, 0.0  ;;  %v434_v26 = vadd.f32 %v9787_v23, %v11418_v59  ;;  %v425_v27 = vpop.f32.mrb[7].mxu0 }
  0xe6   :  { %v665_v29 = vmax.f32 %v423_v22, 0.0  ;;  %v426_v30 = vadd.f32 %v11418_v59, %v425_v27 }
  0xe7   :  { %v668_v31 = vmax.f32 %v434_v26, 0.0  ;;  %v1115_v33 = vmul.f32 %v822_v9, %v667_v25  ;;  %v852_v9 = vpop.permute.xlu0 %851 }
  0xe8   :  { %v666_v32 = vmax.f32 %v426_v30, 0.0  ;;  %v1113_v35 = vmul.f32 %v812_v60, %v665_v29 }
  0xe9   :  { %v1116_v34 = vmul.f32 %v827_v11, %v668_v31  ;;  %v867_v31 = vpop.permute.xlu1 %866 }
  0xea   :  { %v1114_v36 = vmul.f32 %v817_v61, %v666_v32  ;;  %v9790_v55 = vpop.f32.mrb[8].mxu0 }
  0xeb   :  { %v11432_v57 = vpack.c.bf16 %v1116_v34, %v1115_v33  ;;  %v447_v58 = vadd.f32 %v9790_v55, %v11418_v59  ;;  %v438_v62 = vpop.f32.mrb[9].mxu0 }
  0xec   :  { %v11435_v1 = vpack.c.bf16 %v1114_v36, %v1113_v35  ;;  %v439_v2 = vadd.f32 %v11418_v59, %v438_v62  ;;  %v9791_v3 = vpop.f32.mrb[10].mxu0 }
  0xed   :  { %v671_v4 = vmax.f32 %v447_v58, 0.0  ;;  %v450_v5 = vadd.f32 %v9791_v3, %v11418_v59  ;;  %v441_v6 = vpop.f32.mrb[11].mxu0 }
  0xee   :  { %v669_v7 = vmax.f32 %v439_v2, 0.0  ;;  %v442_v60 = vadd.f32 %v11418_v59, %v441_v6 }
  0xef   :  { %v672_v61 = vmax.f32 %v450_v5, 0.0  ;;  %v1119_v10 = vmul.f32 %v842_v56, %v671_v4 }
  0xf0   :  { %v670_v8 = vmax.f32 %v442_v60, 0.0  ;;  %v1117_v13 = vmul.f32 %v832_v24, %v669_v7  ;;  %v862_v24 = vpop.permute.xlu0 %861  ;;  %v11457_v60 = vpop.permute.xlu1 %956 }
  0xf1   :  { %v1120_v11 = vmul.f32 %v847_v63, %v672_v61 }
  0xf2   :  { %v1118_v14 = vmul.f32 %v837_v28, %v670_v8  ;;  %v9794_v15 = vpop.f32.mrb[12].mxu0 }
  0xf3   :  { %v11440_v16 = vpack.c.bf16 %v1120_v11, %v1119_v10  ;;  %v463_v17 = vadd.f32 %v9794_v15, %v11418_v59  ;;  %v454_v19 = vpop.f32.mrb[13].mxu0 }
  0xf4   :  { %v11443_v20 = vpack.c.bf16 %v1118_v14, %v1117_v13  ;;  %v455_v22 = vadd.f32 %v11418_v59, %v454_v19  ;;  %v9795_v23 = vpop.f32.mrb[14].mxu0  ;;  %v11454_v4 = vpop.permute.xlu0 %951 }
  0xf5   :  { %v675_v25 = vmax.f32 %v463_v17, 0.0  ;;  %v466_v26 = vadd.f32 %v9795_v23, %v11418_v59  ;;  %v457_v27 = vpop.f32.mrb[15].mxu0 }
  0xf6   :  { %v673_v29 = vmax.f32 %v455_v22, 0.0  ;;  %v458_v30 = vadd.f32 %v11418_v59, %v457_v27 }
  0xf7   :  { %v676_v28 = vmax.f32 %v466_v26, 0.0  ;;  %v1123_v33 = vmul.f32 %v862_v24, %v675_v25  ;;  %v11469_v25 = vpop.permute.xlu1 %966 }
  0xf8   :  { %v674_v32 = vmax.f32 %v458_v30, 0.0  ;;  %v1121_v35 = vmul.f32 %v852_v9, %v673_v29  ;;  %v11464_v17 = vpop.permute.xlu0 %961  ;;  %v10351_v29 = vld [vmem:[%s13849_s4 + $0x98] sm:$0xff]  }
  0xf9   :  { %v1124_v34 = vmul.f32 %v867_v31, %v676_v28 }
  0xfa   :  { %v1122_v36 = vmul.f32 %v857_v12, %v674_v32  ;;  %v9798_v55 = vpop.f32.mrb[16].mxu0 }
  0xfb   :  { %v11448_v56 = vpack.c.bf16 %v1124_v34, %v1123_v33  ;;  %v479_v58 = vadd.f32 %v9798_v55, %v11418_v59  ;;  %v470_v62 = vpop.f32.mrb[17].mxu0 }
  0xfc   :  { %v11451_v63 = vpack.c.bf16 %v1122_v36, %v1121_v35  ;;  %v471_v2 = vadd.f32 %v11418_v59, %v470_v62  ;;  %v9799_v3 = vpop.f32.mrb[18].mxu0  ;;  %v11486_v32 = vpop.permute.xlu0 %971  ;;  %v10352_v35 = vld [vmem:[%s13849_s4 + $0x80] sm:$0xff]  }
  0xfd   :  { %v679_v5 = vmax.f32 %v479_v58, 0.0  ;;  %v482_v6 = vadd.f32 %v9799_v3, %v11418_v59  ;;  %v473_v7 = vpop.f32.mrb[19].mxu0  ;;  %v11493_v36 = vpop.permute.xlu1 %976 }
  0xfe   :  { %v677_v61 = vmax.f32 %v471_v2, 0.0  ;;  %v474_v8 = vadd.f32 %v11418_v59, %v473_v7 }
  0xff   :  { %v680_v9 = vmax.f32 %v482_v6, 0.0  ;;  %v1127_v11 = vmul.f32 %v11384_v40, %v679_v5 }
 0x100   :  { %v678_v10 = vmax.f32 %v474_v8, 0.0  ;;  %v1125_v13 = vmul.f32 %v11382_v39, %v677_v61 }
 0x101   :  { %v1128_v12 = vmul.f32 %v11389_v42, %v680_v9  ;;  %v10355_v9 = vld [vmem:[%s13849_s4 + $0x8] sm:$0xff]  }
 0x102   :  { %v1126_v14 = vmul.f32 %v11387_v41, %v678_v10  ;;  %v9802_v15 = vpop.f32.mrb[20].mxu0  ;;  %v11513_v10 = vpop.permute.xlu0 %981 }
 0x103   :  { %v11466_v19 = vpack.c.bf16 %v1128_v12, %v1127_v11  ;;  %v495_v22 = vadd.f32 %v9802_v15, %v11418_v59  ;;  %v486_v23 = vpop.f32.mrb[21].mxu0  ;;  %v11519_v12 = vpop.permute.xlu1 %986 }
 0x104   :  { %v11471_v26 = vpack.c.bf16 %v1126_v14, %v1125_v13  ;;  %v487_v40 = vadd.f32 %v11418_v59, %v486_v23  ;;  %v9803_v42 = vpop.f32.mrb[22].mxu0 }
 0x105   :  { %v683_v27 = vmax.f32 %v495_v22, 0.0  ;;  %v498_v39 = vadd.f32 %v9803_v42, %v11418_v59  ;;  %v489_v41 = vpop.f32.mrb[23].mxu0  ;;  %v11529_v22 = vld [vmem:[%s13849_s4 + $0xb0] sm:$0xff]  }
 0x106   :  { %v681_v30 = vmax.f32 %v487_v40, 0.0  ;;  %v490_v24 = vadd.f32 %v11418_v59, %v489_v41  ;;  %9848 = vmatprep.mubr.msk.bf16.mxu0 %vm1226_vm1, %v11471_v26 }
 0x107   :  { %v684_v28 = vmax.f32 %v498_v39, 0.0  ;;  %9849 = vmatmul.mubr.msk.bf16.vlgmr.msra.gmra.mrb[64].mxu0 %vm1226_vm1, %v11466_v19  ;;  %v1131_v33 = vmul.f32 %v11395_v45, %v683_v27 }
 0x108   :  { %v682_v31 = vmax.f32 %v490_v24, 0.0  ;;  %10005 = vmatpush3.bf16.msra.mxu0 %v11374_v37  ;;  %10008 = vmatprep.mubr.msk.bf16.mxu0 %vm1226_vm1, %v11471_v26  ;;  %v1129_v55 = vmul.f32 %v11391_v43, %v681_v30  ;;  %v10354_v43 = vld [vmem:[%s13849_s4 + $0x88] sm:$0xff]  }
 0x109   :  { %v1132_v34 = vmul.f32 %v11397_v46, %v684_v28  ;;  %10006 = vmatprep.subr.bf16.mxu0 %v10351_v29  ;;  %v11548_v28 = vpop.permute.xlu1 %996 }
 0x10a   :  { %v1130_v37 = vmul.f32 %v11393_v44, %v682_v31  ;;  %v9806_v58 = vpop.f32.mrb[24].mxu0 }
 0x10b   :  { %v11497_v62 = vpack.c.bf16 %v1132_v34, %v1131_v33  ;;  %v511_v2 = vadd.f32 %v9806_v58, %v11418_v59  ;;  %v502_v3 = vpop.f32.mrb[25].mxu0 }
 0x10c   :  { %v11500_v45 = vpack.c.bf16 %v1130_v37, %v1129_v55  ;;  %v503_v46 = vadd.f32 %v11418_v59, %v502_v3  ;;  %10007 = vmatpush3.bf16.msra.mxu0 %v10351_v29  ;;  %v9807_v5 = vpop.f32.mrb[26].mxu0 }
 0x10d   :  { %v687_v6 = vmax.f32 %v511_v2, 0.0  ;;  %v514_v7 = vadd.f32 %v9807_v5, %v11418_v59  ;;  %v505_v61 = vpop.f32.mrb[27].mxu0  ;;  %10024 = vmatprep.subr.bf16.mxu0 %v10352_v35 }
 0x10e   :  { %v685_v44 = vmax.f32 %v503_v46, 0.0  ;;  %v506_v8 = vadd.f32 %v11418_v59, %v505_v61  ;;  %9852 = vmatprep.mubr.msk.bf16.mxu1 %vm1226_vm1, %v11500_v45  ;;  %v11569_v61 = vpop.permute.xlu1 %1006 }
 0x10f   :  { %v688_v11 = vmax.f32 %v514_v7, 0.0  ;;  %9853 = vmatmul.mubr.msk.bf16.vlgmr.msra.gmra.mrb[0].mxu1 %vm1226_vm1, %v11497_v62  ;;  %10009 = vmatmul.mubr.msk.bf16.vlgmr.msra.gmra.mrb[68].mxu0 %vm1226_vm1, %v11466_v19  ;;  %v1135_v14 = vmul.f32 %v11403_v49, %v687_v6  ;;  %v11536_v49 = vld [vmem:[%s13849_s4 + $0x30] sm:$0xff]  }
 0x110   :  { %v686_v13 = vmax.f32 %v506_v8, 0.0  ;;  %10025 = vmatpush3.bf16.msra.mxu0 %v10352_v35  ;;  %10012 = vmatprep.mubr.msk.bf16.mxu0 %vm1226_vm1, %v11500_v45  ;;  %v1133_v23 = vmul.f32 %v11399_v47, %v685_v44  ;;  %v11544_v47 = vpop.permute.xlu0 %991 }
 0x111   :  { %v1136_v15 = vmul.f32 %v11405_v50, %v688_v11  ;;  %9865 = vmatpush3.bf16.msra.mxu1 %v11380_v38  ;;  %10026 = vmatprep.subr.bf16.mxu0 %v10354_v43 }
 0x112   :  { %v1134_v40 = vmul.f32 %v11401_v48, %v686_v13  ;;  %v9810_v42 = vpop.f32.mrb[28].mxu0  ;;  %9866 = vmatprep.subr.bf16.mxu1 %v10355_v9 }
 0x113   :  { %v11538_v50 = vpack.c.bf16 %v1136_v15, %v1135_v14  ;;  %v527_v38 = vadd.f32 %v9810_v42, %v11418_v59  ;;  %v518_v27 = vpop.f32.mrb[29].mxu0 }
 0x114   :  { %v11541_v39 = vpack.c.bf16 %v1134_v40, %v1133_v23  ;;  %v519_v41 = vadd.f32 %v11418_v59, %v518_v27  ;;  %v9811_v29 = vpop.f32.mrb[30].mxu0  ;;  %10027 = vmatpush3.bf16.msra.mxu0 %v10354_v43  ;;  %v11564_v46 = vpop.permute.xlu0 %1001 }
 0x115   :  { %v691_v48 = vmax.f32 %v527_v38, 0.0  ;;  %v530_v30 = vadd.f32 %v9811_v29, %v11418_v59  ;;  %v521_v24 = vpop.f32.mrb[31].mxu0  ;;  %9867 = vmatpush3.bf16.msra.mxu1 %v10355_v9  ;;  %10044 = vmatprep.subr.bf16.mxu0 %v11529_v22  ;;  %v11590_v40 = vpop.permute.xlu1 %1016 }
 0x116   :  { %v689_v31 = vmax.f32 %v519_v41, 0.0  ;;  %v522_v33 = vadd.f32 %v11418_v59, %v521_v24  ;;  %9856 = vmatprep.mubr.msk.bf16.mxu1 %vm1226_vm1, %v11541_v39  ;;  %9884 = vmatprep.subr.bf16.mxu1 %v11536_v49 }
 0x117   :  { %v692_v34 = vmax.f32 %v530_v30, 0.0  ;;  %9857 = vmatmul.mubr.msk.bf16.gmra.mrb[4].mxu1 %vm1226_vm1, %v11538_v50  ;;  %10013 = vmatmul.mubr.msk.bf16.gmra.mrb[72].mxu0 %vm1226_vm1, %v11497_v62  ;;  %v1139_v55 = vmul.f32 %v11411_v53, %v691_v48 }
 0x118   :  { %v690_v35 = vmax.f32 %v522_v33, 0.0  ;;  %10016 = vmatprep.mubr.msk.bf16.mxu0 %vm1226_vm1, %v11541_v39  ;;  %v1137_v58 = vmul.f32 %v11407_v51, %v689_v31  ;;  %v11586_v14 = vpop.permute.xlu0 %1011 }
 0x119   :  { %v1140_v37 = vmul.f32 %v11413_v54, %v692_v34 }
 0x11a   :  { %v1138_v2 = vmul.f32 %v11409_v52, %v690_v35  ;;  %v9814_v3 = vpop.f32.mrb[32].mxu0 }
 0x11b   :  { %v11566_v5 = vpack.c.bf16 %v1140_v37, %v1139_v55  ;;  %v543_v6 = vadd.f32 %v9814_v3, %v11418_v59  ;;  %v534_v7 = vpop.f32.mrb[33].mxu0  ;;  %v11611_v37 = vpop.permute.xlu1 %1026 }
 0x11c   :  { %v11571_v43 = vpack.c.bf16 %v1138_v2, %v1137_v58  ;;  %v535_v53 = vadd.f32 %v11418_v59, %v534_v7  ;;  %v9815_v44 = vpop.f32.mrb[34].mxu0  ;;  %v11605_v35 = vpop.permute.xlu0 %1021 }
 0x11d   :  { %v695_v54 = vmax.f32 %v543_v6, 0.0  ;;  %v546_v51 = vadd.f32 %v9815_v44, %v11418_v59  ;;  %v537_v8 = vpop.f32.mrb[35].mxu0  ;;  %v11625_v44 = vld [vmem:[%s13849_s4 + $0x20] sm:$0xff]  }
 0x11e   :  { %v693_v52 = vmax.f32 %v535_v53, 0.0  ;;  %v538_v9 = vadd.f32 %v11418_v59, %v537_v8  ;;  %9860 = vmatprep.mubr.msk.bf16.mxu1 %vm1226_vm1, %v11571_v43 }
 0x11f   :  { %v696_v11 = vmax.f32 %v546_v51, 0.0  ;;  %9861 = vmatmul.mubr.msk.bf16.gmra.mrb[8].mxu1 %vm1226_vm1, %v11566_v5  ;;  %10017 = vmatmul.mubr.msk.bf16.gmra.mrb[76].mxu0 %vm1226_vm1, %v11538_v50  ;;  %v1143_v15 = vmul.f32 %v11464_v17, %v695_v54 }
 0x120   :  { %v694_v13 = vmax.f32 %v538_v9, 0.0  ;;  %9868 = vmatprep.mubr.msk.bf16.mxu1 %vm1226_vm1, %v11427_v21  ;;  %10020 = vmatprep.mubr.msk.bf16.mxu0 %vm1226_vm1, %v11571_v43  ;;  %v1141_v42 = vmul.f32 %v11454_v4, %v693_v52 }
 0x121   :  { %v1144_v23 = vmul.f32 %v11469_v25, %v696_v11  ;;  %v10358_v11 = vld [vmem:[%s13849_s4 + $0xb8] sm:$0xff]  }
 0x122   :  { %v1142_v38 = vmul.f32 %v11457_v60, %v694_v13  ;;  %v9818_v27 = vpop.f32.mrb[36].mxu0  ;;  %v10359_v60 = vld [vmem:[%s13849_s4 + $0x38] sm:$0xff]   ;;  %v11639_v13 = vpop.permute.xlu1 %1036 }
 0x123   :  { %v11594_v41 = vpack.c.bf16 %v1144_v23, %v1143_v15  ;;  %v559_v29 = vadd.f32 %v9818_v27, %v11418_v59  ;;  %v550_v48 = vpop.f32.mrb[37].mxu0 }
 0x124   :  { %v11597_v30 = vpack.c.bf16 %v1142_v38, %v1141_v42  ;;  %v551_v24 = vadd.f32 %v11418_v59, %v550_v48  ;;  %v9819_v31 = vpop.f32.mrb[38].mxu0  ;;  %v11657_v48 = vld [vmem:[%s13849_s4 + $0xa0] sm:$0xff]  }
 0x125   :  { %v699_v17 = vmax.f32 %v559_v29, 0.0  ;;  %v562_v25 = vadd.f32 %v9819_v31, %v11418_v59  ;;  %v553_v33 = vpop.f32.mrb[39].mxu0 }
 0x126   :  { %v697_v34 = vmax.f32 %v551_v24, 0.0  ;;  %v554_v4 = vadd.f32 %v11418_v59, %v553_v33  ;;  %v1047_v33 = vpop.permute.xlu1 %1046 }
 0x127   :  { %v700_v55 = vmax.f32 %v562_v25, 0.0  ;;  %9869 = vmatmul.mubr.msk.bf16.vlgmr.msra.gmra.mrb[12].mxu1 %vm1226_vm1, %v11424_v18  ;;  %10021 = vmatmul.mubr.msk.bf16.gmra.mrb[80].mxu0 %vm1226_vm1, %v11566_v5  ;;  %v1147_v2 = vmul.f32 %v11513_v10, %v699_v17 }
 0x128   :  { %v698_v58 = vmax.f32 %v554_v4, 0.0  ;;  %9872 = vmatprep.mubr.msk.bf16.mxu1 %vm1226_vm1, %v11435_v1  ;;  %10028 = vmatprep.mubr.msk.bf16.mxu0 %vm1226_vm1, %v11427_v21  ;;  %v1145_v6 = vmul.f32 %v11486_v32, %v697_v34  ;;  %v11633_v32 = vpop.permute.xlu0 %1031 }
 0x129   :  { %v1148_v3 = vmul.f32 %v11519_v12, %v700_v55  ;;  %9885 = vmatpush3.bf16.msra.mxu1 %v11536_v49 }
 0x12a   :  { %v1146_v7 = vmul.f32 %v11493_v36, %v698_v58  ;;  %v9822_v53 = vpop.f32.mrb[40].mxu0  ;;  %9886 = vmatprep.subr.bf16.mxu1 %v10359_v60 }
 0x12b   :  { %v11627_v54 = vpack.c.bf16 %v1148_v3, %v1147_v2  ;;  %v575_v51 = vadd.f32 %v9822_v53, %v11418_v59  ;;  %v566_v10 = vpop.f32.mrb[41].mxu0 }
 0x12c   :  { %v11630_v8 = vpack.c.bf16 %v1146_v7, %v1145_v6  ;;  %v567_v12 = vadd.f32 %v11418_v59, %v566_v10  ;;  %v9823_v49 = vpop.f32.mrb[42].mxu0  ;;  %v1042_v17 = vpop.permute.xlu0 %1041 }
 0x12d   :  { %v703_v36 = vmax.f32 %v575_v51, 0.0  ;;  %v578_v52 = vadd.f32 %v9823_v49, %v11418_v59  ;;  %v569_v9 = vpop.f32.mrb[43].mxu0  ;;  %9887 = vmatpush3.bf16.msra.mxu1 %v10359_v60  ;;  %v1057_v10 = vpop.permute.xlu1 %1056 }
 0x12e   :  { %v701_v15 = vmax.f32 %v567_v12, 0.0  ;;  %v570_v23 = vadd.f32 %v11418_v59, %v569_v9  ;;  %9904 = vmatprep.subr.bf16.mxu1 %v11625_v44 }
 0x12f   :  { %v704_v42 = vmax.f32 %v578_v52, 0.0  ;;  %9873 = vmatmul.mubr.msk.bf16.gmra.mrb[16].mxu1 %vm1226_vm1, %v11432_v57  ;;  %10029 = vmatmul.mubr.msk.bf16.vlgmr.msra.gmra.mrb[84].mxu0 %vm1226_vm1, %v11424_v18  ;;  %v1151_v27 = vmul.f32 %v11564_v46, %v703_v36 }
 0x130   :  { %v702_v38 = vmax.f32 %v570_v23, 0.0  ;;  %10045 = vmatpush3.bf16.msra.mxu0 %v11529_v22  ;;  %9876 = vmatprep.mubr.msk.bf16.mxu1 %vm1226_vm1, %v11443_v20  ;;  %v1149_v24 = vmul.f32 %v11544_v47, %v701_v15  ;;  %v1052_v7 = vpop.permute.xlu0 %1051 }
 0x131   :  { %v1152_v29 = vmul.f32 %v11569_v61, %v704_v42  ;;  %10032 = vmatprep.mubr.msk.bf16.mxu0 %vm1226_vm1, %v11435_v1  ;;  %10046 = vmatprep.subr.bf16.mxu0 %v10358_v11 }
 0x132   :  { %v1150_v22 = vmul.f32 %v11548_v28, %v702_v38  ;;  %v9826_v31 = vpop.f32.mrb[44].mxu0 }
 0x133   :  { %v11661_v25 = vpack.c.bf16 %v1152_v29, %v1151_v27  ;;  %v591_v46 = vadd.f32 %v9826_v31, %v11418_v59  ;;  %v582_v61 = vpop.f32.mrb[45].mxu0 }
 0x134   :  { %v11664_v34 = vpack.c.bf16 %v1150_v22, %v1149_v24  ;;  %v583_v4 = vadd.f32 %v11418_v59, %v582_v61  ;;  %v9827_v60 = vpop.f32.mrb[46].mxu0  ;;  %10047 = vmatpush3.bf16.msra.mxu0 %v10358_v11  ;;  %v1062_v29 = vpop.permute.xlu0 %1061 }
 0x135   :  { %v707_v55 = vmax.f32 %v591_v46, 0.0  ;;  %v594_v58 = vadd.f32 %v9827_v60, %v11418_v59  ;;  %v585_v47 = vpop.f32.mrb[47].mxu0  ;;  %10064 = vmatprep.subr.bf16.mxu0 %v11657_v48  ;;  %v1067_v24 = vpop.permute.xlu1 %1066 }
 0x136   :  { %v705_v28 = vmax.f32 %v583_v4, 0.0  ;;  %v586_v2 = vadd.f32 %v11418_v59, %v585_v47 }
 0x137   :  { %v708_v3 = vmax.f32 %v594_v58, 0.0  ;;  %9877 = vmatmul.mubr.msk.bf16.gmra.mrb[4].mxu1 %vm1226_vm1, %v11440_v16  ;;  %10033 = vmatmul.mubr.msk.bf16.gmra.mrb[72].mxu0 %vm1226_vm1, %v11432_v57  ;;  %v1155_v53 = vmul.f32 %v11605_v35, %v707_v55 }
 0x138   :  { %v706_v6 = vmax.f32 %v586_v2, 0.0  ;;  %9880 = vmatprep.mubr.msk.bf16.mxu1 %vm1226_vm1, %v11451_v63  ;;  %10036 = vmatprep.mubr.msk.bf16.mxu0 %vm1226_vm1, %v11443_v20  ;;  %v1153_v12 = vmul.f32 %v11586_v14, %v705_v28 }
 0x139   :  { %v1156_v51 = vmul.f32 %v11611_v37, %v708_v3 }
 0x13a   :  { %v1154_v49 = vmul.f32 %v11590_v40, %v706_v6  ;;  %v9830_v36 = vpop.f32.mrb[48].mxu0  ;;  %v1072_v6 = vpop.permute.xlu0 %1071 }
 0x13b   :  { %v11682_v52 = vpack.c.bf16 %v1156_v51, %v1155_v53  ;;  %v607_v9 = vadd.f32 %v9830_v36, %v11418_v59  ;;  %v598_v11 = vpop.f32.mrb[49].mxu0  ;;  %v1077_v51 = vpop.permute.xlu1 %1076 }
 0x13c   :  { %v11685_v15 = vpack.c.bf16 %v1154_v49, %v1153_v12  ;;  %v599_v23 = vadd.f32 %v11418_v59, %v598_v11  ;;  %v9831_v42 = vpop.f32.mrb[50].mxu0  ;;  %v10363_v12 = vld [vmem:[%s13849_s4 + $0x28] sm:$0xff]  }
 0x13d   :  { %v711_v38 = vmax.f32 %v607_v9, 0.0  ;;  %v610_v35 = vadd.f32 %v9831_v42, %v11418_v59  ;;  %v601_v37 = vpop.f32.mrb[51].mxu0 }
 0x13e   :  { %v709_v27 = vmax.f32 %v599_v23, 0.0  ;;  %v602_v14 = vadd.f32 %v11418_v59, %v601_v37  ;;  %v1082_v37 = vpop.permute.xlu0 %1081 }
 0x13f   :  { %v712_v40 = vmax.f32 %v610_v35, 0.0  ;;  %9881 = vmatmul.mubr.msk.bf16.gmra.mrb[20].mxu1 %vm1226_vm1, %v11448_v56  ;;  %10037 = vmatmul.mubr.msk.bf16.gmra.mrb[88].mxu0 %vm1226_vm1, %v11440_v16  ;;  %v1159_v31 = vmul.f32 %v1042_v17, %v711_v38  ;;  %v11723_v35 = vld [vmem:[%s13849_s4 + $0x40] sm:$0xff]  }
 0x140   :  { %v710_v22 = vmax.f32 %v602_v14, 0.0  ;;  %9888 = vmatprep.mubr.msk.bf16.mxu1 %vm1226_vm1, %v11471_v26  ;;  %10040 = vmatprep.mubr.msk.bf16.mxu0 %vm1226_vm1, %v11451_v63  ;;  %v1157_v61 = vmul.f32 %v11633_v32, %v709_v27 }
 0x141   :  { %v1160_v46 = vmul.f32 %v1047_v33, %v712_v40 }
 0x142   :  { %v1158_v4 = vmul.f32 %v11639_v13, %v710_v22  ;;  %v9834_v60 = vpop.f32.mrb[52].mxu0 }
 0x143   :  { %v11700_v55 = vpack.c.bf16 %v1160_v46, %v1159_v31  ;;  %v623_v58 = vadd.f32 %v9834_v60, %v11418_v59  ;;  %v614_v47 = vpop.f32.mrb[53].mxu0  ;;  %v10362_v31 = vld [vmem:[%s13849_s4 + $0xa8] sm:$0xff]  }
 0x144   :  { %v11703_v28 = vpack.c.bf16 %v1158_v4, %v1157_v61  ;;  %v615_v2 = vadd.f32 %v11418_v59, %v614_v47  ;;  %v9835_v3 = vpop.f32.mrb[54].mxu0 }
 0x145   :  { %v715_v53 = vmax.f32 %v623_v58, 0.0  ;;  %v626_v17 = vadd.f32 %v9835_v3, %v11418_v59  ;;  %v617_v33 = vpop.f32.mrb[55].mxu0  ;;  %v1092_v58 = vpop.permute.xlu0 %1091  ;;  %v10364_v3 = vld [vmem:[%s13849_s4 + $0xc0] sm:$0xff]  }
 0x146   :  { %v713_v32 = vmax.f32 %v615_v2, 0.0  ;;  %v618_v13 = vadd.f32 %v11418_v59, %v617_v33 }
 0x147   :  { %v716_v49 = vmax.f32 %v626_v17, 0.0  ;;  %9889 = vmatmul.mubr.msk.bf16.vlgmr.msra.gmra.mrb[24].mxu1 %vm1226_vm1, %v11466_v19  ;;  %10041 = vmatmul.mubr.msk.bf16.gmra.mrb[80].mxu0 %vm1226_vm1, %v11448_v56  ;;  %v1163_v9 = vmul.f32 %v1062_v29, %v715_v53 }
 0x148   :  { %v714_v36 = vmax.f32 %v618_v13, 0.0  ;;  %9892 = vmatprep.mubr.msk.bf16.mxu1 %vm1226_vm1, %v11500_v45  ;;  %10048 = vmatprep.mubr.msk.bf16.mxu0 %vm1226_vm1, %v11471_v26  ;;  %v1161_v23 = vmul.f32 %v1052_v7, %v713_v32  ;;  %v1087_v26 = vpop.permute.xlu1 %1086 }
 0x149   :  { %v1164_v11 = vmul.f32 %v1067_v24, %v716_v49  ;;  %9905 = vmatpush3.bf16.msra.mxu1 %v11625_v44 }
 0x14a   :  { %v1162_v42 = vmul.f32 %v1057_v10, %v714_v36  ;;  %v9838_v38 = vpop.f32.mrb[56].mxu0  ;;  %9906 = vmatprep.subr.bf16.mxu1 %v10363_v12 }
 0x14b   :  { %v11725_v27 = vpack.c.bf16 %v1164_v11, %v1163_v9  ;;  %v639_v14 = vadd.f32 %v9838_v38, %v11418_v59  ;;  %v630_v40 = vpop.f32.mrb[57].mxu0 }
 0x14c   :  { %v11728_v29 = vpack.c.bf16 %v1162_v42, %v1161_v23  ;;  %v631_v44 = vadd.f32 %v11418_v59, %v630_v40  ;;  %v9839_v7 = vpop.f32.mrb[58].mxu0  ;;  %v1097_v53 = vpop.permute.xlu1 %1096 }
 0x14d   :  { %v719_v10 = vmax.f32 %v639_v14, 0.0  ;;  %v642_v24 = vadd.f32 %v9839_v7, %v11418_v59  ;;  %v633_v22 = vpop.f32.mrb[59].mxu0  ;;  %9907 = vmatpush3.bf16.msra.mxu1 %v10363_v12  ;;  %v1102_v42 = vpop.permute.xlu0 %1101 }
 0x14e   :  { %v717_v46 = vmax.f32 %v631_v44, 0.0  ;;  %v634_v61 = vadd.f32 %v11418_v59, %v633_v22  ;;  %9924 = vmatprep.subr.bf16.mxu1 %v11723_v35 }
 0x14f   :  { %v720_v4 = vmax.f32 %v642_v24, 0.0  ;;  %9893 = vmatmul.mubr.msk.bf16.gmra.mrb[28].mxu1 %vm1226_vm1, %v11497_v62  ;;  %10049 = vmatmul.mubr.msk.bf16.vlgmr.msra.gmra.mrb[92].mxu0 %vm1226_vm1, %v11466_v19  ;;  %v1167_v47 = vmul.f32 %v1082_v37, %v719_v10 }
 0x150   :  { %v718_v60 = vmax.f32 %v634_v61, 0.0  ;;  %10065 = vmatpush3.bf16.msra.mxu0 %v11657_v48  ;;  %9896 = vmatprep.mubr.msk.bf16.mxu1 %vm1226_vm1, %v11541_v39  ;;  %v1165_v17 = vmul.f32 %v1072_v6, %v717_v46  ;;  %v1107_v38 = vpop.permute.xlu1 %1106 }
 0x151   :  { %v1168_v2 = vmul.f32 %v1087_v26, %v720_v4  ;;  %10052 = vmatprep.mubr.msk.bf16.mxu0 %vm1226_vm1, %v11500_v45  ;;  %10066 = vmatprep.subr.bf16.mxu0 %v10362_v31 }
 0x152   :  { %v1166_v19 = vmul.f32 %v1077_v51, %v718_v60  ;;  %v9842_v33 = vpop.f32.mrb[60].mxu0 }
 0x153   :  { %v11749_v32 = vpack.c.bf16 %v1168_v2, %v1167_v47  ;;  %v655_v48 = vadd.f32 %v9842_v33, %v11418_v59  ;;  %v646_v13 = vpop.f32.mrb[61].mxu0 }
 0x154   :  { %v11752_v12 = vpack.c.bf16 %v1166_v19, %v1165_v17  ;;  %v647_v49 = vadd.f32 %v11418_v59, %v646_v13  ;;  %v9843_v36 = vpop.f32.mrb[62].mxu0  ;;  %10067 = vmatpush3.bf16.msra.mxu0 %v10362_v31 }
 0x155   :  { %v723_v45 = vmax.f32 %v655_v48, 0.0  ;;  %v658_v9 = vadd.f32 %v9843_v36, %v11418_v59  ;;  %v649_v11 = vpop.f32.mrb[63].mxu0  ;;  %10084 = vmatprep.subr.bf16.mxu0 %v10364_v3 }
 0x156   :  { %v721_v23 = vmax.f32 %v647_v49, 0.0  ;;  %v650_v6 = vadd.f32 %v11418_v59, %v649_v11 }
 0x157   :  { %v724_v51 = vmax.f32 %v658_v9, 0.0  ;;  %9897 = vmatmul.mubr.msk.bf16.gmra.mrb[32].mxu1 %vm1226_vm1, %v11538_v50  ;;  %10053 = vmatmul.mubr.msk.bf16.gmra.mrb[96].mxu0 %vm1226_vm1, %v11497_v62  ;;  %v1171_v14 = vmul.f32 %v1102_v42, %v723_v45  ;;  %v10367_v62 = vld [vmem:[%s13849_s4 + $0x48] sm:$0xff]  }
 0x158   :  { %v722_v37 = vmax.f32 %v650_v6, 0.0  ;;  %9900 = vmatprep.mubr.msk.bf16.mxu1 %vm1226_vm1, %v11571_v43  ;;  %10056 = vmatprep.mubr.msk.bf16.mxu0 %vm1226_vm1, %v11541_v39  ;;  %v1169_v26 = vmul.f32 %v1092_v58, %v721_v23  ;;  %v10366_v39 = vld [vmem:[%s13849_s4 + $0xc8] sm:$0xff]  }
 0x159   :  { %v1172_v40 = vmul.f32 %v1107_v38, %v724_v51 }
 0x15a   :  { %v1170_v59 = vmul.f32 %v1097_v53, %v722_v37 }
 0x15b   :  { %v11765_v44 = vpack.c.bf16 %v1172_v40, %v1171_v14 }
 0x15c   :  { %v11767_v7 = vpack.c.bf16 %v1170_v59, %v1169_v26 }
 0x15f   :  { %9901 = vmatmul.mubr.msk.bf16.gmra.mrb[36].mxu1 %vm1226_vm1, %v11566_v5  ;;  %10057 = vmatmul.mubr.msk.bf16.gmra.mrb[100].mxu0 %vm1226_vm1, %v11538_v50  ;;  %v10369_v50 = vld [vmem:[%s13849_s4 + $0x50] sm:$0xff]  }
 0x160   :  { %9908 = vmatprep.mubr.msk.bf16.mxu1 %vm1226_vm1, %v11427_v21  ;;  %10060 = vmatprep.mubr.msk.bf16.mxu0 %vm1226_vm1, %v11571_v43  ;;  %v10379_v43 = vld [vmem:[%s13849_s4 + $0x78] sm:$0xff]  }
 0x167   :  { %9909 = vmatmul.mubr.msk.bf16.vlgmr.msra.gmra.mrb[24].mxu1 %vm1226_vm1, %v11424_v18  ;;  %10061 = vmatmul.mubr.msk.bf16.gmra.mrb[104].mxu0 %vm1226_vm1, %v11566_v5  ;;  %v10376_v5 = vld [vmem:[%s13849_s4 + $0xf0] sm:$0xff]  }
 0x168   :  { %9912 = vmatprep.mubr.msk.bf16.mxu1 %vm1226_vm1, %v11435_v1  ;;  %10068 = vmatprep.mubr.msk.bf16.mxu0 %vm1226_vm1, %v11427_v21  ;;  %v10368_v21 = vld [vmem:[%s13849_s4 + $0xd0] sm:$0xff]  }
 0x169   :  { %9925 = vmatpush3.bf16.msra.mxu1 %v11723_v35  ;;  %v10378_v35 = vld [vmem:[%s13849_s4 + $0xf8] sm:$0xff]  }
 0x16a   :  { %9926 = vmatprep.subr.bf16.mxu1 %v10367_v62 }
 0x16d   :  { %9927 = vmatpush3.bf16.msra.mxu1 %v10367_v62  ;;  %v10382_v62 = vld [vmem:[%s13851_s6 + $0x104] ss:$8 sps:$4 sm:$0xff]  }
 0x16e   :  { %9944 = vmatprep.subr.bf16.mxu1 %v10369_v50 }
 0x16f   :  { %9913 = vmatmul.mubr.msk.bf16.gmra.mrb[28].mxu1 %vm1226_vm1, %v11432_v57  ;;  %10069 = vmatmul.mubr.msk.bf16.vlgmr.msra.gmra.mrb[92].mxu0 %vm1226_vm1, %v11424_v18  ;;  %v10371_v18 = vld [vmem:[%s13849_s4 + $0x58] sm:$0xff]  }
 0x170   :  { %10085 = vmatpush3.bf16.msra.mxu0 %v10364_v3  ;;  %9916 = vmatprep.mubr.msk.bf16.mxu1 %vm1226_vm1, %v11443_v20 }
 0x171   :  { %10072 = vmatprep.mubr.msk.bf16.mxu0 %vm1226_vm1, %v11435_v1  ;;  %10086 = vmatprep.subr.bf16.mxu0 %v10366_v39  ;;  %v10370_v1 = vld [vmem:[%s13849_s4 + $0xd8] sm:$0xff]  }
 0x174   :  { %10087 = vmatpush3.bf16.msra.mxu0 %v10366_v39  ;;  %v10386_v39 = vld [vmem:[%s13851_s6 + $0x200] ss:$8 sps:$4 sm:$0xff]  }
 0x175   :  { %10104 = vmatprep.subr.bf16.mxu0 %v10368_v21 }
 0x177   :  { %9917 = vmatmul.mubr.msk.bf16.gmra.mrb[32].mxu1 %vm1226_vm1, %v11440_v16  ;;  %10073 = vmatmul.mubr.msk.bf16.gmra.mrb[96].mxu0 %vm1226_vm1, %v11432_v57  ;;  %v10373_v57 = vld [vmem:[%s13849_s4 + $0x60] sm:$0xff]  }
 0x178   :  { %9920 = vmatprep.mubr.msk.bf16.mxu1 %vm1226_vm1, %v11451_v63  ;;  %10076 = vmatprep.mubr.msk.bf16.mxu0 %vm1226_vm1, %v11443_v20  ;;  %v10375_v20 = vld [vmem:[%s13849_s4 + $0x68] sm:$0xff]  }
 0x17f   :  { %9921 = vmatmul.mubr.msk.bf16.gmra.mrb[36].mxu1 %vm1226_vm1, %v11448_v56  ;;  %10077 = vmatmul.mubr.msk.bf16.gmra.mrb[100].mxu0 %vm1226_vm1, %v11440_v16  ;;  %v10372_v16 = vld [vmem:[%s13849_s4 + $0xe0] sm:$0xff]  }
 0x180   :  { %9928 = vmatprep.mubr.msk.bf16.mxu1 %vm1226_vm1, %v11597_v30  ;;  %10080 = vmatprep.mubr.msk.bf16.mxu0 %vm1226_vm1, %v11451_v63  ;;  %v10374_v63 = vld [vmem:[%s13849_s4 + $0xe8] sm:$0xff]  }
 0x187   :  { %9929 = vmatmul.mubr.msk.bf16.vlgmr.msra.gmra.mrb[12].mxu1 %vm1226_vm1, %v11594_v41  ;;  %10081 = vmatmul.mubr.msk.bf16.gmra.mrb[104].mxu0 %vm1226_vm1, %v11448_v56  ;;  %v10377_v56 = vld [vmem:[%s13849_s4 + $0x70] sm:$0xff]  }
 0x188   :  { %9932 = vmatprep.mubr.msk.bf16.mxu1 %vm1226_vm1, %v11630_v8  ;;  %10088 = vmatprep.mubr.msk.bf16.mxu0 %vm1226_vm1, %v11597_v30 }
 0x189   :  { %9945 = vmatpush3.bf16.msra.mxu1 %v10369_v50  ;;  %v10388_v50 = vld [vmem:[%s13851_s6 + $0x204] ss:$8 sps:$4 sm:$0xff]  }
 0x18a   :  { %9946 = vmatprep.subr.bf16.mxu1 %v10371_v18 }
 0x18d   :  { %9947 = vmatpush3.bf16.msra.mxu1 %v10371_v18  ;;  %v10389_v18 = vld [vmem:[%s13851_s6 + $0x210] ss:$8 sps:$4 sm:$0xff]  }
 0x18e   :  { %9964 = vmatprep.subr.bf16.mxu1 %v10373_v57 }
 0x18f   :  { %9933 = vmatmul.mubr.msk.bf16.gmra.mrb[40].mxu1 %vm1226_vm1, %v11627_v54  ;;  %10089 = vmatmul.mubr.msk.bf16.vlgmr.msra.gmra.mrb[108].mxu0 %vm1226_vm1, %v11594_v41 }
 0x190   :  { %10105 = vmatpush3.bf16.msra.mxu0 %v10368_v21  ;;  %9936 = vmatprep.mubr.msk.bf16.mxu1 %vm1226_vm1, %v11664_v34  ;;  %v10391_v21 = vld [vmem:[%s13851_s6 + $0x214] ss:$8 sps:$4 sm:$0xff]  }
 0x191   :  { %10092 = vmatprep.mubr.msk.bf16.mxu0 %vm1226_vm1, %v11630_v8  ;;  %10106 = vmatprep.subr.bf16.mxu0 %v10370_v1 }
 0x194   :  { %10107 = vmatpush3.bf16.msra.mxu0 %v10370_v1  ;;  %v10383_v1 = vld [vmem:[%s13851_s6 + $0x110] ss:$8 sps:$4 sm:$0xff]  }
 0x195   :  { %10124 = vmatprep.subr.bf16.mxu0 %v10372_v16 }
 0x197   :  { %9937 = vmatmul.mubr.msk.bf16.gmra.mrb[4].mxu1 %vm1226_vm1, %v11661_v25  ;;  %10093 = vmatmul.mubr.msk.bf16.gmra.mrb[72].mxu0 %vm1226_vm1, %v11627_v54 }
 0x198   :  { %9940 = vmatprep.mubr.msk.bf16.mxu1 %vm1226_vm1, %v11685_v15  ;;  %10096 = vmatprep.mubr.msk.bf16.mxu0 %vm1226_vm1, %v11664_v34 }
 0x19f   :  { %9941 = vmatmul.mubr.msk.bf16.gmra.mrb[44].mxu1 %vm1226_vm1, %v11682_v52  ;;  %10097 = vmatmul.mubr.msk.bf16.gmra.mrb[112].mxu0 %vm1226_vm1, %v11661_v25 }
 0x1a0   :  { %9948 = vmatprep.mubr.msk.bf16.mxu1 %vm1226_vm1, %v11703_v28  ;;  %10100 = vmatprep.mubr.msk.bf16.mxu0 %vm1226_vm1, %v11685_v15 }
 0x1a7   :  { %9949 = vmatmul.mubr.msk.bf16.vlgmr.msra.gmra.mrb[12].mxu1 %vm1226_vm1, %v11700_v55  ;;  %10101 = vmatmul.mubr.msk.bf16.gmra.mrb[80].mxu0 %vm1226_vm1, %v11682_v52 }
 0x1a8   :  { %9952 = vmatprep.mubr.msk.bf16.mxu1 %vm1226_vm1, %v11728_v29  ;;  %10108 = vmatprep.mubr.msk.bf16.mxu0 %vm1226_vm1, %v11703_v28 }
 0x1a9   :  { %9965 = vmatpush3.bf16.msra.mxu1 %v10373_v57  ;;  %v10397_v57 = vld [vmem:[%s13851_s6 + $0x224] ss:$8 sps:$4 sm:$0xff]  }
 0x1aa   :  { %9966 = vmatprep.subr.bf16.mxu1 %v10375_v20 }
 0x1ad   :  { %9967 = vmatpush3.bf16.msra.mxu1 %v10375_v20  ;;  %v10395_v20 = vld [vmem:[%s13851_s6 + $0x220] ss:$8 sps:$4 sm:$0xff]  }
 0x1ae   :  { %9984 = vmatprep.subr.bf16.mxu1 %v10377_v56 }
 0x1af   :  { %9953 = vmatmul.mubr.msk.bf16.gmra.mrb[48].mxu1 %vm1226_vm1, %v11725_v27  ;;  %10109 = vmatmul.mubr.msk.bf16.vlgmr.msra.gmra.mrb[116].mxu0 %vm1226_vm1, %v11700_v55 }
 0x1b0   :  { %10125 = vmatpush3.bf16.msra.mxu0 %v10372_v16  ;;  %9956 = vmatprep.mubr.msk.bf16.mxu1 %vm1226_vm1, %v11752_v12  ;;  %v10385_v16 = vld [vmem:[%s13851_s6 + $0x114] ss:$8 sps:$4 sm:$0xff]  }
 0x1b1   :  { %10112 = vmatprep.mubr.msk.bf16.mxu0 %vm1226_vm1, %v11728_v29  ;;  %10126 = vmatprep.subr.bf16.mxu0 %v10374_v63 }
 0x1b4   :  { %10127 = vmatpush3.bf16.msra.mxu0 %v10374_v63  ;;  %v10394_v63 = vld [vmem:[%s13851_s6 + $0x124] ss:$8 sps:$4 sm:$0xff]  }
 0x1b5   :  { %10144 = vmatprep.subr.bf16.mxu0 %v10376_v5 }
 0x1b7   :  { %9957 = vmatmul.mubr.msk.bf16.gmra.mrb[4].mxu1 %vm1226_vm1, %v11749_v32  ;;  %10113 = vmatmul.mubr.msk.bf16.gmra.mrb[72].mxu0 %vm1226_vm1, %v11725_v27 }
 0x1b8   :  { %9960 = vmatprep.mubr.msk.bf16.mxu1 %vm1226_vm1, %v11767_v7  ;;  %10116 = vmatprep.mubr.msk.bf16.mxu0 %vm1226_vm1, %v11752_v12 }
 0x1bf   :  { %9961 = vmatmul.mubr.msk.bf16.gmra.mrb[52].mxu1 %vm1226_vm1, %v11765_v44  ;;  %10117 = vmatmul.mubr.msk.bf16.gmra.mrb[120].mxu0 %vm1226_vm1, %v11749_v32 }
 0x1c0   :  { %9968 = vmatprep.mubr.msk.bf16.mxu1 %vm1226_vm1, %v11597_v30  ;;  %10120 = vmatprep.mubr.msk.bf16.mxu0 %vm1226_vm1, %v11767_v7 }
 0x1c7   :  { %9969 = vmatmul.mubr.msk.bf16.vlgmr.msra.gmra.mrb[24].mxu1 %vm1226_vm1, %v11594_v41  ;;  %10121 = vmatmul.mubr.msk.bf16.gmra.mrb[80].mxu0 %vm1226_vm1, %v11765_v44 }
 0x1c8   :  { %9972 = vmatprep.mubr.msk.bf16.mxu1 %vm1226_vm1, %v11630_v8  ;;  %10128 = vmatprep.mubr.msk.bf16.mxu0 %vm1226_vm1, %v11597_v30 }
 0x1c9   :  { %9985 = vmatpush3.bf16.msra.mxu1 %v10377_v56  ;;  %v10400_v56 = vld [vmem:[%s13851_s6 + $0x234] ss:$8 sps:$4 sm:$0xff]  }
 0x1ca   :  { %9986 = vmatprep.subr.bf16.mxu1 %v10379_v43 }
 0x1cd   :  { %9987 = vmatpush3.bf16.msra.mxu1 %v10379_v43 }
 0x1ce   :  { %3477 = vmatprep.subr.bf16.mxu1 %v10382_v62 }
 0x1cf   :  { %9973 = vmatmul.mubr.msk.bf16.gmra.mrb[28].mxu1 %vm1226_vm1, %v11627_v54  ;;  %10129 = vmatmul.mubr.msk.bf16.vlgmr.msra.gmra.mrb[92].mxu0 %vm1226_vm1, %v11594_v41 }
 0x1d0   :  { %10145 = vmatpush3.bf16.msra.mxu0 %v10376_v5  ;;  %9976 = vmatprep.mubr.msk.bf16.mxu1 %vm1226_vm1, %v11664_v34  ;;  %v10398_v5 = vld [vmem:[%s13851_s6 + $0x230] ss:$8 sps:$4 sm:$0xff]  }
 0x1d1   :  { %10132 = vmatprep.mubr.msk.bf16.mxu0 %vm1226_vm1, %v11630_v8  ;;  %10146 = vmatprep.subr.bf16.mxu0 %v10378_v35 }
 0x1d4   :  { %10147 = vmatpush3.bf16.msra.mxu0 %v10378_v35 }
 0x1d5   :  { %4217 = vmatprep.subr.bf16.mxu0 %v10388_v50 }
 0x1d7   :  { %9977 = vmatmul.mubr.msk.bf16.gmra.mrb[32].mxu1 %vm1226_vm1, %v11661_v25  ;;  %10133 = vmatmul.mubr.msk.bf16.gmra.mrb[96].mxu0 %vm1226_vm1, %v11627_v54 }
 0x1d8   :  { %9980 = vmatprep.mubr.msk.bf16.mxu1 %vm1226_vm1, %v11685_v15  ;;  %10136 = vmatprep.mubr.msk.bf16.mxu0 %vm1226_vm1, %v11664_v34 }
 0x1da   :  { %v11940_v41 = vpop.f32.mrb[64].mxu0 }
 0x1db   :  { %v11942_v30 = vpop.f32.mrb[65].mxu0 }
 0x1dc   :  { %v11944_v10 = vpop.f32.mrb[66].mxu0 }
 0x1dd   :  { %v11946_v8 = vpop.f32.mrb[67].mxu0 }
 0x1df   :  { %9981 = vmatmul.mubr.msk.bf16.gmra.mrb[36].mxu1 %vm1226_vm1, %v11682_v52  ;;  %10137 = vmatmul.mubr.msk.bf16.gmra.mrb[100].mxu0 %vm1226_vm1, %v11661_v25 }
 0x1e0   :  { %9988 = vmatprep.mubr.msk.bf16.mxu1 %vm1226_vm1, %v11703_v28  ;;  %10140 = vmatprep.mubr.msk.bf16.mxu0 %vm1226_vm1, %v11685_v15 }
 0x1e2   :  { %v9854_v54 = vpop.f32.mrb[0].mxu1  ;;  %v10010_v34 = vpop.f32.mrb[68].mxu0 }
 0x1e3   :  { %v1301_v24 = vpop.f32.mrb[1].mxu1  ;;  %v2309_v22 = vpop.f32.mrb[69].mxu0 }
 0x1e4   :  { %v9855_v31 = vpop.f32.mrb[2].mxu1  ;;  %v10011_v46 = vpop.f32.mrb[70].mxu0 }
 0x1e5   :  { %v1304_v61 = vpop.f32.mrb[3].mxu1  ;;  %v2311_v4 = vpop.f32.mrb[71].mxu0 }
 0x1e7   :  { %9989 = vmatmul.mubr.msk.bf16.vlgmr.msra.gmra.mrb[24].mxu1 %vm1226_vm1, %v11700_v55  ;;  %10141 = vmatmul.mubr.msk.bf16.gmra.mrb[104].mxu0 %vm1226_vm1, %v11682_v52 }
 0x1e8   :  { %9992 = vmatprep.mubr.msk.bf16.mxu1 %vm1226_vm1, %v11728_v29  ;;  %10148 = vmatprep.mubr.msk.bf16.mxu0 %vm1226_vm1, %v11703_v28 }
 0x1ef   :  { %9993 = vmatmul.mubr.msk.bf16.gmra.mrb[28].mxu1 %vm1226_vm1, %v11725_v27  ;;  %10149 = vmatmul.mubr.msk.bf16.vlgmr.msra.gmra.mrb[92].mxu0 %vm1226_vm1, %v11700_v55 }
 0x1f0   :  { %9996 = vmatprep.mubr.msk.bf16.mxu1 %vm1226_vm1, %v11752_v12  ;;  %10152 = vmatprep.mubr.msk.bf16.mxu0 %vm1226_vm1, %v11728_v29 }
 0x1f1   :  { %4218 = vmatpush1.bf16.msra.mxu0 %v10386_v39 }
 0x1f2   :  { %v9862_v25 = vpop.f32.mrb[8].mxu1  ;;  %v10018_v52 = vpop.f32.mrb[76].mxu0  ;;  %4219 = vmatprep.subr.bf16.mxu0 %v10391_v21 }
 0x1f3   :  { %v1332_v15 = vpop.f32.mrb[9].mxu1  ;;  %v2340_v60 = vpop.f32.mrb[77].mxu0 }
 0x1f4   :  { %v9863_v58 = vpop.f32.mrb[10].mxu1  ;;  %v10019_v47 = vpop.f32.mrb[78].mxu0 }
 0x1f5   :  { %v1335_v2 = vpop.f32.mrb[11].mxu1  ;;  %v2342_v28 = vpop.f32.mrb[79].mxu0  ;;  %4220 = vmatpush1.bf16.msra.mxu0 %v10389_v18  ;;  %v10403_v58 = vld [vmem:[%s13851_s6 + $0x134] ss:$8 sps:$4 sm:$0xff]  }
 0x1f6   :  { %4221 = vmatprep.subr.bf16.mxu0 %v10397_v57 }
 0x1f7   :  { %9997 = vmatmul.mubr.msk.bf16.gmra.mrb[32].mxu1 %vm1226_vm1, %v11749_v32  ;;  %10153 = vmatmul.mubr.msk.bf16.gmra.mrb[96].mxu0 %vm1226_vm1, %v11725_v27 }
 0x1f8   :  { %10000 = vmatprep.mubr.msk.bf16.mxu1 %vm1226_vm1, %v11767_v7  ;;  %10156 = vmatprep.mubr.msk.bf16.mxu0 %vm1226_vm1, %v11752_v12 }
 0x1f9   :  { %4222 = vmatpush1.bf16.msra.mxu0 %v10395_v20 }
 0x1fa   :  { %4223 = vmatprep.subr.bf16.mxu0 %v10400_v56 }
 0x1fd   :  { %4224 = vmatpush1.bf16.msra.mxu0 %v10398_v5 }
 0x1ff   :  { %10001 = vmatmul.mubr.msk.bf16.gmra.mrb[36].mxu1 %vm1226_vm1, %v11765_v44  ;;  %10157 = vmatmul.mubr.msk.bf16.gmra.mrb[100].mxu0 %vm1226_vm1, %v11749_v32 }
 0x200   :  { %10160 = vmatprep.mubr.msk.bf16.mxu0 %vm1226_vm1, %v11767_v7  ;;  %3509 = vmatprep.mubr.bf16.mxu1 %v10984_v0  ;;  %v10380_v7 = vld [vmem:[%s13851_s6 + $0x100] ss:$8 sps:$4 sm:$0xff]  }
 0x201   :  { %3478 = vmatpush1.bf16.msra.mxu1 %v10380_v7 }
 0x202   :  { %v9874_v55 = vpop.f32.mrb[16].mxu1  ;;  %v10030_v29 = vpop.f32.mrb[84].mxu0  ;;  %3479 = vmatprep.subr.bf16.mxu1 %v10385_v16 }
 0x203   :  { %v1441_v27 = vadd.f32 %v9874_v55, %v9854_v54  ;;  %v2424_v3 = vadd.f32 %v10030_v29, %v10010_v34  ;;  %v1432_v53 = vpop.f32.mrb[17].mxu1  ;;  %v2416_v17 = vpop.f32.mrb[85].mxu0  ;;  %v10392_v54 = vld [vmem:[%s13851_s6 + $0x120] ss:$8 sps:$4 sm:$0xff]   ;;  %v10412_v55 = vld [vmem:[%s13851_s6 + $0x4] ss:$8 sps:$4 sm:$0xff]  }
 0x204   :  { %v1433_v19 = vadd.f32 %v1432_v53, %v1301_v24  ;;  %v9875_v33 = vpop.f32.mrb[18].mxu1  ;;  %v10031_v48 = vpop.f32.mrb[86].mxu0 }
 0x205   :  { %v2427_v13 = vadd.f32 %v10031_v48, %v10011_v46  ;;  %v1435_v12 = vpop.f32.mrb[19].mxu1  ;;  %v2418_v49 = vpop.f32.mrb[87].mxu0  ;;  %3480 = vmatpush1.bf16.msra.mxu1 %v10383_v1 }
 0x206   :  { %v1436_v36 = vadd.f32 %v1435_v12, %v1304_v61  ;;  %v2419_v45 = vadd.f32 %v2418_v49, %v2311_v4  ;;  %3481 = vmatprep.subr.bf16.mxu1 %v10394_v63 }
 0x207   :  { %10161 = vmatmul.mubr.msk.bf16.gmra.mrb[104].mxu0 %vm1226_vm1, %v11765_v44 }
 0x208   :  { %4249 = vmatprep.mubr.bf16.mxu0 %v10984_v0 }
 0x209   :  { %3482 = vmatpush1.bf16.msra.mxu1 %v10392_v54 }
 0x20a   :  { %3483 = vmatprep.subr.bf16.mxu1 %v10403_v58 }
 0x212   :  { %v9882_v32 = vpop.f32.mrb[20].mxu1  ;;  %v10038_v9 = vpop.f32.mrb[88].mxu0 }
 0x213   :  { %v11990_v11 = vadd.f32 %v9882_v32, %v9862_v25  ;;  %v11992_v23 = vadd.f32 %v10038_v9, %v10018_v52  ;;  %v1463_v6 = vpop.f32.mrb[21].mxu1  ;;  %v2447_v51 = vpop.f32.mrb[89].mxu0  ;;  %v10406_v25 = vld [vmem:[%s13851_s6 + $0x284] ss:$8 sps:$4 sm:$0xff]  }
 0x214   :  { %v11994_v42 = vadd.f32 %v1463_v6, %v1332_v15  ;;  %v9883_v38 = vpop.f32.mrb[22].mxu1  ;;  %v10039_v37 = vpop.f32.mrb[90].mxu0  ;;  %4415 = vmatprep.subr.bf16.mxu0 %v10406_v25 }
 0x215   :  { %v11996_v14 = vadd.f32 %v10039_v37, %v10019_v47  ;;  %v1466_v40 = vpop.f32.mrb[23].mxu1  ;;  %v2449_v26 = vpop.f32.mrb[91].mxu0 }
 0x216   :  { %v11998_v59 = vadd.f32 %v1466_v40, %v1335_v2  ;;  %v12000_v44 = vadd.f32 %v2449_v26, %v2342_v28  ;;  %v10401_v28 = vld [vmem:[%s13851_s6 + $0x130] ss:$8 sps:$4 sm:$0xff]  }
 0x217   :  { %3484 = vmatpush1.bf16.msra.mxu1 %v10401_v28 }
 0x218   :  { %3564 = vmatprep.subr.bf16.mxu1 %v10412_v55 }
 0x262   :  { %v9934_v43 = vpop.f32.mrb[40].mxu1  ;;  %v10090_v35 = vpop.f32.mrb[108].mxu0 }
 0x263   :  { %v1843_v34 = vadd.f32 %v9934_v43, %v1441_v27  ;;  %v2814_v24 = vadd.f32 %v10090_v35, %v2424_v3  ;;  %v1792_v22 = vpop.f32.mrb[41].mxu1  ;;  %v2752_v31 = vpop.f32.mrb[109].mxu0 }
 0x264   :  { %v1841_v46 = vadd.f32 %v1792_v22, %v1433_v19  ;;  %v9935_v61 = vpop.f32.mrb[42].mxu1  ;;  %v10091_v4 = vpop.f32.mrb[110].mxu0 }
 0x265   :  { %v2815_v52 = vadd.f32 %v10091_v4, %v2427_v13  ;;  %v1795_v15 = vpop.f32.mrb[43].mxu1  ;;  %v2754_v60 = vpop.f32.mrb[111].mxu0 }
 0x266   :  { %v1842_v47 = vadd.f32 %v1795_v15, %v1436_v36  ;;  %v2813_v2 = vadd.f32 %v2754_v60, %v2419_v45 }
 0x272   :  { %v9942_v29 = vpop.f32.mrb[44].mxu1  ;;  %v10098_v27 = vpop.f32.mrb[112].mxu0 }
 0x273   :  { %v1850_v3 = vadd.f32 %v9942_v29, %v11990_v11  ;;  %v2821_v53 = vadd.f32 %v10098_v27, %v11992_v23  ;;  %v1823_v17 = vpop.f32.mrb[45].mxu1  ;;  %v2783_v19 = vpop.f32.mrb[113].mxu0 }
 0x274   :  { %v1848_v33 = vadd.f32 %v1823_v17, %v11994_v42  ;;  %v9943_v48 = vpop.f32.mrb[46].mxu1  ;;  %v10099_v13 = vpop.f32.mrb[114].mxu0 }
 0x275   :  { %v2822_v12 = vadd.f32 %v10099_v13, %v11996_v14  ;;  %v1826_v49 = vpop.f32.mrb[47].mxu1  ;;  %v2785_v36 = vpop.f32.mrb[115].mxu0 }
 0x276   :  { %v1849_v45 = vadd.f32 %v1826_v49, %v11998_v59  ;;  %v2820_v32 = vadd.f32 %v2785_v36, %v12000_v44 }
 0x27a   :  { %v9950_v9 = vpop.f32.mrb[12].mxu1 }
 0x27b   :  { %v10168_v6 = vadd.f32 %v9950_v9, %v11940_v41  ;;  %v1926_v11 = vpop.f32.mrb[13].mxu1 }
 0x27c   :  { %v10169_v23 = vadd.f32 %v1926_v11, %v11942_v30  ;;  %v9951_v51 = vpop.f32.mrb[14].mxu1 }
 0x27d   :  { %v10170_v38 = vadd.f32 %v9951_v51, %v11944_v10  ;;  %v1929_v42 = vpop.f32.mrb[15].mxu1 }
 0x27e   :  { %v10171_v37 = vadd.f32 %v1929_v42, %v11946_v8 }
 0x282   :  { %v9954_v40 = vpop.f32.mrb[48].mxu1  ;;  %v10110_v14 = vpop.f32.mrb[116].mxu0 }
 0x283   :  { %v1993_v26 = vadd.f32 %v9954_v40, %v1843_v34  ;;  %v2940_v7 = vadd.f32 %v10110_v14, %v2814_v24  ;;  %v1942_v62 = vpop.f32.mrb[49].mxu1  ;;  %v2878_v59 = vpop.f32.mrb[117].mxu0 }
 0x284   :  { %v1991_v50 = vadd.f32 %v1942_v62, %v1841_v46  ;;  %v9955_v44 = vpop.f32.mrb[50].mxu1  ;;  %v10111_v39 = vpop.f32.mrb[118].mxu0 }
 0x285   :  { %v2941_v21 = vadd.f32 %v10111_v39, %v2815_v52  ;;  %v1945_v41 = vpop.f32.mrb[51].mxu1  ;;  %v2880_v18 = vpop.f32.mrb[119].mxu0 }
 0x286   :  { %v1992_v57 = vadd.f32 %v1945_v41, %v1842_v47  ;;  %v2939_v30 = vadd.f32 %v2880_v18, %v2813_v2 }
 0x28a   :  { %v12066_v1 = vpop.f32.mrb[4].mxu1  ;;  %v12068_v10 = vpop.f32.mrb[72].mxu0 }
 0x28b   :  { %v12070_v16 = vpop.f32.mrb[5].mxu1  ;;  %v12072_v8 = vpop.f32.mrb[73].mxu0 }
 0x28c   :  { %v12074_v20 = vpop.f32.mrb[6].mxu1  ;;  %v12076_v56 = vpop.f32.mrb[74].mxu0 }
 0x28d   :  { %v12078_v63 = vpop.f32.mrb[7].mxu1  ;;  %v12080_v5 = vpop.f32.mrb[75].mxu0 }
 0x292   :  { %v9962_v43 = vpop.f32.mrb[52].mxu1  ;;  %v10118_v35 = vpop.f32.mrb[120].mxu0 }
 0x293   :  { %v12082_v54 = vadd.f32 %v9962_v43, %v1850_v3  ;;  %v12084_v34 = vadd.f32 %v10118_v35, %v2821_v53  ;;  %v1973_v24 = vpop.f32.mrb[53].mxu1  ;;  %v2909_v22 = vpop.f32.mrb[121].mxu0 }
 0x294   :  { %v12086_v31 = vadd.f32 %v1973_v24, %v1848_v33  ;;  %v9963_v46 = vpop.f32.mrb[54].mxu1  ;;  %v10119_v61 = vpop.f32.mrb[122].mxu0 }
 0x295   :  { %v12088_v4 = vadd.f32 %v10119_v61, %v2822_v12  ;;  %v1976_v25 = vpop.f32.mrb[55].mxu1  ;;  %v2911_v52 = vpop.f32.mrb[123].mxu0 }
 0x296   :  { %v12090_v15 = vadd.f32 %v1976_v25, %v1849_v45  ;;  %v12092_v60 = vadd.f32 %v2911_v52, %v2820_v32 }
 0x29a   :  { %v12094_v58 = vpop.f32.mrb[80].mxu0 }
 0x29b   :  { %v12096_v47 = vpop.f32.mrb[81].mxu0 }
 0x29c   :  { %v12098_v2 = vpop.f32.mrb[82].mxu0 }
 0x29d   :  { %v12100_v28 = vpop.f32.mrb[83].mxu0 }
 0x2ba   :  { %v9990_v55 = vpop.f32.mrb[24].mxu1 }
 0x2bb   :  { %v3221_v29 = vrot.slane %v9990_v55, 1  ;;  %v2178_v27 = vpop.f32.mrb[25].mxu1 }
 0x2bc   :  { %v3219_v3 = vrot.slane %v2178_v27, 1  ;;  %v9991_v53 = vpop.f32.mrb[26].mxu1 }
 0x2bd   :  { %v3249_v17 = vadd.f32 %v10168_v6, %v3221_v29  ;;  %v3222_v19 = vrot.slane %v9991_v53, 1  ;;  %v2181_v33 = vpop.f32.mrb[27].mxu1 }
 0x2be   :  { %v3247_v48 = vadd.f32 %v10169_v23, %v3219_v3  ;;  %v3220_v13 = vrot.slane %v2181_v33, 1 }
 0x2bf   :  { %v3250_v12 = vadd.f32 %v10170_v38, %v3222_v19 }
 0x2c0   :  { %v3248_v49 = vadd.f32 %v10171_v37, %v3220_v13 }
 0x2c2   :  { %v9994_v36 = vpop.f32.mrb[28].mxu1  ;;  %v10150_v45 = vpop.f32.mrb[92].mxu0 }
 0x2c3   :  { %v3225_v32 = vrot.slane %v9994_v36, 1  ;;  %v3276_v9 = vrot.slane %v10150_v45, 1  ;;  %v2194_v11 = vpop.f32.mrb[29].mxu1  ;;  %v3130_v51 = vpop.f32.mrb[93].mxu0 }
 0x2c4   :  { %v3223_v42 = vrot.slane %v2194_v11, 1  ;;  %v9995_v40 = vpop.f32.mrb[30].mxu1  ;;  %v10151_v14 = vpop.f32.mrb[94].mxu0 }
 0x2c5   :  { %v3253_v62 = vadd.f32 %v3225_v32, %v1993_v26  ;;  %v3304_v59 = vadd.f32 %v3276_v9, %v2940_v7  ;;  %v3277_v44 = vrot.slane %v10151_v14, 1  ;;  %v2197_v39 = vpop.f32.mrb[31].mxu1  ;;  %v3132_v6 = vpop.f32.mrb[95].mxu0  ;;  %v12105_v26 = vld [vmem:[%s13852_s5] ss:$0 sm:$0xff] }
 0x2c6   :  { %v3251_v41 = vadd.f32 %v3223_v42, %v1991_v50  ;;  %v3224_v18 = vrot.slane %v2197_v39, 1  ;;  %v3275_v23 = vrot.slane %v3132_v6, 1 }
 0x2c7   :  { %v3318_v43 = vadd.f32 %v3304_v59, %v3248_v49  ;;  %v3305_v38 = vadd.f32 %v3277_v44, %v2941_v21 }
 0x2c8   :  { %v3252_v37 = vadd.f32 %v3224_v18, %v1992_v57  ;;  %v3303_v35 = vadd.f32 %v3275_v23, %v2939_v30 }
 0x2c9   :  { %v3319_v24 = vadd.f32 %v3305_v38, %v3249_v17 }
 0x2ca   :  { %v3317_v22 = vadd.f32 %v3303_v35, %v3247_v48  ;;  %v9998_v46 = vpop.f32.mrb[32].mxu1  ;;  %v10154_v61 = vpop.f32.mrb[96].mxu0  ;;  %v3339_v48 = vadd.f32 %v12105_v26, %v3318_v43 }
 0x2cb   :  { %v3228_v25 = vrot.slane %v9998_v46, 1  ;;  %v3280_v52 = vrot.slane %v10154_v61, 1  ;;  %v2209_v55 = vpop.f32.mrb[33].mxu1  ;;  %v3145_v29 = vpop.f32.mrb[97].mxu0  ;;  %v3340_v39 = vadd.f32 %v12105_v26, %v3319_v24 }
 0x2cc   :  { %v3226_v7 = vrot.slane %v2209_v55, 1  ;;  %v3278_v50 = vrot.slane %v3145_v29, 1  ;;  %v9999_v27 = vpop.f32.mrb[34].mxu1  ;;  %v10155_v3 = vpop.f32.mrb[98].mxu0 }
 0x2cd   :  { %v3256_v21 = vadd.f32 %v12066_v1, %v3228_v25  ;;  %v3308_v57 = vadd.f32 %v12068_v10, %v3280_v52  ;;  %v2212_v30 = vpop.f32.mrb[35].mxu1  ;;  %v3148_v53 = vpop.f32.mrb[99].mxu0  ;;  %v3229_v33 = vrot.slane %v9999_v27, 1  ;;  %v3281_v49 = vrot.slane %v10155_v3, 1 }
 0x2ce   :  { %v3254_v17 = vadd.f32 %v3226_v7, %v12070_v16  ;;  %v3306_v19 = vadd.f32 %v3278_v50, %v12072_v8  ;;  %v3227_v32 = vrot.slane %v2212_v30, 1  ;;  %v3338_v1 = vadd.f32 %v12105_v26, %v3317_v22 }
 0x2cf   :  { %v3322_v13 = vadd.f32 %v3308_v57, %v3252_v37  ;;  %v12113_v45 = vadd.f32 %v12074_v20, %v3229_v33  ;;  %v3309_v9 = vadd.f32 %v12076_v56, %v3281_v49  ;;  %v3279_v16 = vrot.slane %v3148_v53, 1 }
 0x2d0   :  { %v3320_v36 = vadd.f32 %v3306_v19, %v3250_v12  ;;  %v3255_v11 = vadd.f32 %v3227_v32, %v12078_v63  ;;  %v3353_v12 = vmax.f32 %v3339_v48, 0.0  ;;  %v3352_v43 = vmax.f32 %v3338_v1, 0.0 }
 0x2d1   :  { %v12117_v10 = vadd.f32 %v12105_v26, %v3322_v13  ;;  %v3323_v40 = vadd.f32 %v3309_v9, %v3253_v62  ;;  %v3307_v20 = vadd.f32 %v3279_v16, %v12080_v5  ;;  %v3354_v7 = vmax.f32 %v3340_v39, 0.0 }
 0x2d2   :  { %v12121_v8 = vadd.f32 %v12105_v26, %v3320_v36  ;;  %v10002_v51 = vpop.f32.mrb[36].mxu1  ;;  %v10158_v42 = vpop.f32.mrb[100].mxu0  ;;  %v3367_v61 = vpack.c.bf16 %v3353_v12, %v3353_v12 }
 0x2d3   :  { %v3232_v14 = vrot.slane %v10002_v51, 1  ;;  %v2225_v59 = vpop.f32.mrb[37].mxu1  ;;  %v3161_v44 = vpop.f32.mrb[101].mxu0  ;;  %v3283_v6 = vrot.slane %v10158_v42, 1  ;;  %v12127_v38 = vadd.f32 %v12105_v26, %v3323_v40  ;;  %v3321_v63 = vadd.f32 %v3307_v20, %v3251_v41 }
 0x2d4   :  { %v3230_v18 = vrot.slane %v2225_v59, 1  ;;  %v10003_v56 = vpop.f32.mrb[38].mxu1  ;;  %v10159_v23 = vpop.f32.mrb[102].mxu0  ;;  %v3366_v41 = vpack.c.bf16 %v3352_v43, %v3352_v43  ;;  %v12139_v3 = vunpack.c.l.b16 %v3367_v61  ;;  %v3368_v13 = vpack.c.bf16 %v3354_v7, %v3354_v7  ;;  %v10409_v44 = vld [vmem:[%s13851_s6 + $0x294] ss:$8 sps:$4 sm:$0xff]  }
 0x2d5   :  { %v3260_v37 = vadd.f32 %v3232_v14, %v12082_v54  ;;  %v2228_v35 = vpop.f32.mrb[39].mxu1  ;;  %v3163_v62 = vpop.f32.mrb[103].mxu0  ;;  %v3311_v5 = vadd.f32 %v3283_v6, %v12084_v34  ;;  %v3284_v46 = vrot.slane %v10159_v23, 1  ;;  %v12133_v24 = vadd.f32 %v12105_v26, %v3321_v63 }
 0x2d6   :  { %v3258_v22 = vadd.f32 %v3230_v18, %v12086_v31  ;;  %v3231_v25 = vrot.slane %v2228_v35, 1  ;;  %v3282_v29 = vrot.slane %v3163_v62, 1  ;;  %v3355_v20 = vmax.f32 %v12121_v8, 0.0 }
 0x2d7   :  { %v3325_v52 = vadd.f32 %v3311_v5, %v3255_v11  ;;  %v3312_v55 = vadd.f32 %v3284_v46, %v12088_v4  ;;  %v4368_v63 = vrot.slane %v12139_v3, 3  ;;  %v4566_v61 = vrot.slane %v12139_v3, 5 }
 0x2d8   :  { %v3259_v54 = vadd.f32 %v3231_v25, %v12090_v15  ;;  %v3310_v34 = vadd.f32 %v3282_v29, %v12092_v60  ;;  %v12142_v15 = vunpack.c.l.b16 %v3366_v41  ;;  %v3369_v62 = vpack.c.bf16 %v3355_v20, %v3355_v20  ;;  %v10410_v25 = vld [vmem:[%s13851_s6] ss:$8 sps:$4 sm:$0xff]  }
 0x2d9   :  { %v3346_v50 = vadd.f32 %v12105_v26, %v3325_v52  ;;  %v3326_v27 = vadd.f32 %v3312_v55, %v3256_v21  ;;  %v10415_v55 = vld [vmem:[%s13851_s6 + $0x2a4] ss:$8 sps:$4 sm:$0xff]   ;;  %v12196_v41 = vunpack.c.l.b16 %v3368_v13 }
 0x2da   :  { %v10162_v31 = vpop.f32.mrb[104].mxu0  ;;  %v3324_v19 = vadd.f32 %v3310_v34, %v3254_v17  ;;  %v4171_v17 = vrot.slane %v12139_v3, 1  ;;  %v3428_v23 = vrot.slane %v12142_v15, 4  ;;  %v3886_v20 = vrot.slane %v12142_v15, 2 }
 0x2db   :  { %v3287_v57 = vrot.slane %v10162_v31, 1  ;;  %v3176_v30 = vpop.f32.mrb[105].mxu0  ;;  %v3360_v53 = vmax.f32 %v3346_v50, 0.0  ;;  %v3347_v4 = vadd.f32 %v12105_v26, %v3326_v27  ;;  %v10413_v50 = vld [vmem:[%s13851_s6 + $0x2a0] ss:$8 sps:$4 sm:$0xff]  }
 0x2dc   :  { %v3285_v33 = vrot.slane %v3176_v30, 1  ;;  %v10163_v48 = vpop.f32.mrb[106].mxu0  ;;  %v3345_v1 = vadd.f32 %v12105_v26, %v3324_v19  ;;  %v10418_v27 = vld [vmem:[%s13851_s6 + $0x14] ss:$8 sps:$4 sm:$0xff]   ;;  %v12213_v30 = vunpack.c.l.b16 %v3369_v62 }
 0x2dd   :  { %v3315_v21 = vadd.f32 %v12094_v58, %v3287_v57  ;;  %v3288_v49 = vrot.slane %v10163_v48, 1  ;;  %v3179_v60 = vpop.f32.mrb[107].mxu0  ;;  %v3374_v36 = vpack.c.bf16 %v3360_v53, %v3360_v53  ;;  %v3361_v32 = vmax.f32 %v3347_v4, 0.0  ;;  %v10421_v19 = vld [vmem:[%s13851_s6 + $0x2b4] ss:$8 sps:$4 sm:$0xff]  }
 0x2de   :  { %v3313_v9 = vadd.f32 %v3285_v33, %v12096_v47  ;;  %v3286_v51 = vrot.slane %v3179_v60, 1  ;;  %v3359_v40 = vmax.f32 %v3345_v1, 0.0  ;;  %v3702_v57 = vrot.slane %v12142_v15, 1 }
 0x2df   :  { %v3329_v16 = vadd.f32 %v3315_v21, %v3259_v54  ;;  %v3316_v11 = vadd.f32 %v12098_v2, %v3288_v49  ;;  %v12149_v42 = vunpack.c.l.b16 %v3374_v36  ;;  %v3375_v12 = vpack.c.bf16 %v3361_v32, %v3361_v32  ;;  %v10404_v2 = vld [vmem:[%s13851_s6 + $0x280] ss:$8 sps:$4 sm:$0xff]  }
 0x2e0   :  { %v3327_v58 = vadd.f32 %v3313_v9, %v12113_v45  ;;  %v3314_v47 = vadd.f32 %v3286_v51, %v12100_v28  ;;  %v3373_v6 = vpack.c.bf16 %v3359_v40, %v3359_v40  ;;  %v3614_v33 = vrot.slane %v12142_v15, 5  ;;  %v10416_v9 = vld [vmem:[%s13851_s6 + $0x10] ss:$8 sps:$4 sm:$0xff]   ;;  %v10424_v40 = vld [vmem:[%s13851_s6 + $0x24] ss:$8 sps:$4 sm:$0xff]  }
 0x2e1   :  { %v12154_v14 = vadd.f32 %v12105_v26, %v3329_v16  ;;  %v3330_v59 = vadd.f32 %v3316_v11, %v3260_v37  ;;  %v12163_v39 = vunpack.c.l.b16 %v3375_v12  ;;  %v4172_v8 = vsel %vm3430_vm2, %v12149_v42, %v4171_v17  ;;  %v10419_v12 = vld [vmem:[%s13851_s6 + $0x2b0] ss:$8 sps:$4 sm:$0xff]  }
 0x2e2   :  { %v3348_v45 = vadd.f32 %v12105_v26, %v3327_v58  ;;  %v3328_v28 = vadd.f32 %v3314_v47, %v3258_v22  ;;  %v4173_v56 = vpack.c.b16 %v4172_v8, %v4172_v8  ;;  %v12172_v43 = vunpack.c.l.b16 %v3373_v6  ;;  %v10407_v22 = vld [vmem:[%s13851_s6 + $0x290] ss:$8 sps:$4 sm:$0xff]  }
 0x2e3   :  { %v12169_v18 = vadd.f32 %v12105_v26, %v3330_v59  ;;  %v4369_v37 = vrot.slane %v12149_v42, 2  ;;  %v4567_v35 = vrot.slane %v12149_v42, 4  ;;  %v4768_v7 = vrot.slane %v12163_v39, 7 }
 0x2e4   :  { %v3362_v5 = vmax.f32 %v3348_v45, 0.0  ;;  %v3349_v46 = vadd.f32 %v12105_v26, %v3328_v28  ;;  %8865 = vmatmul.mubr.msk.bf16.vlgmr.msra.gmra.mrb[124].mxu0 %vm3473_vm3, %v4173_v56  ;;  %v3429_v52 = vrot.slane %v12172_v43, 3  ;;  %v3518_v29 = vrot.slane %v12172_v43, 7 }
 0x2e5   :  { %4416 = vmatpush1.bf16.msra.mxu0 %v10404_v2  ;;  %4447 = vmatprep.mubr.bf16.mxu0 %v10984_v0  ;;  %v12192_v26 = vsel %vm3430_vm2, %v4369_v37, %v4368_v63  ;;  %v12210_v31 = vsel %vm3430_vm2, %v4567_v35, %v4566_v61  ;;  %v3615_v13 = vrot.slane %v12172_v43, 4  ;;  %v12222_v21 = vsel %vm3430_vm2, %v4768_v7, %v12196_v41  ;;  %v10422_v2 = vld [vmem:[%s13851_s6 + $0x20] ss:$8 sps:$4 sm:$0xff]  }
 0x2e6   :  { %4417 = vmatprep.subr.bf16.mxu0 %v10409_v44  ;;  %v3431_v54 = vsel %vm3430_vm2, %v3429_v52, %v3428_v23  ;;  %v12207_v34 = vsel %vm3430_vm2, %v3518_v29, %v12142_v15  ;;  %v3376_v53 = vpack.c.bf16 %v3362_v5, %v3362_v5  ;;  %v3363_v48 = vmax.f32 %v3349_v46, 0.0  ;;  %v10427_v44 = vld [vmem:[%s13851_s6 + $0x304] ss:$8 sps:$4 sm:$0xff]   ;;  %v10425_v37 = vld [vmem:[%s13851_s6 + $0x300] ss:$8 sps:$4 sm:$0xff]  }
 0x2e7   :  { %v3432_v4 = vpack.c.b16 %v3431_v54, %v3431_v54  ;;  %v12226_v49 = vsel %vm3430_vm2, %v12172_v43, %v3702_v57  ;;  %v3356_v60 = vmax.f32 %v12133_v24, 0.0  ;;  %v4964_v36 = vrot.slane %v12196_v41, 2  ;;  %v10430_v5 = vld [vmem:[%s13851_s6 + $0x34] ss:$8 sps:$4 sm:$0xff]  }
 0x2e8   :  { %v4965_v32 = vrot.slane %v12163_v39, 1  ;;  %v3798_v1 = vrot.slane %v12142_v15, 6  ;;  %v12238_v16 = vsel %vm3430_vm2, %v3615_v13, %v3614_v33  ;;  %v3799_v24 = vrot.slane %v12172_v43, 5  ;;  %v10434_v13 = vld [vmem:[%s13851_s6 + $0x140] ss:$8 sps:$4 sm:$0xff]  }
 0x2e9   :  { %4418 = vmatpush1.bf16.msra.mxu0 %v10407_v22  ;;  %8761 = vmatmul.mubr.msk.bf16.vlgmr.msra.gmra.mrb[56].mxu1 %vm3473_vm3, %v3432_v4  ;;  %v5162_v11 = vrot.slane %v12196_v41, 4  ;;  %v5163_v51 = vrot.slane %v12163_v39, 3  ;;  %v12243_v17 = vunpack.c.l.b16 %v3376_v53  ;;  %v3887_v59 = vrot.slane %v12172_v43, 1 }
 0x2ea   :  { %4419 = vmatprep.subr.bf16.mxu0 %v10415_v55  ;;  %3565 = vmatpush1.bf16.msra.mxu1 %v10410_v25  ;;  %v12252_v58 = vsel %vm3430_vm2, %v4965_v32, %v4964_v36  ;;  %v3377_v47 = vpack.c.bf16 %v3363_v48, %v3363_v48  ;;  %v12263_v6 = vsel %vm3430_vm2, %v3799_v24, %v3798_v1  ;;  %v3357_v8 = vmax.f32 %v12117_v10, 0.0  ;;  %v10433_v55 = vld [vmem:[%s13851_s6 + $0x314] ss:$8 sps:$4 sm:$0xff]  }
 0x2eb   :  { %3596 = vmatprep.mubr.bf16.mxu1 %v10984_v0  ;;  %3566 = vmatprep.subr.bf16.mxu1 %v10418_v27  ;;  %v12266_v45 = vsel %vm3430_vm2, %v5163_v51, %v5162_v11  ;;  %v12270_v28 = vsel %vm3430_vm2, %v3887_v59, %v3886_v20  ;;  %v5360_v56 = vrot.slane %v12196_v41, 6  ;;  %v5361_v23 = vrot.slane %v12163_v39, 5  ;;  %v10437_v59 = vld [vmem:[%s13851_s6 + $0x320] ss:$8 sps:$4 sm:$0xff]  }
 0x2ec   :  { %v3370_v63 = vpack.c.bf16 %v3356_v60, %v3356_v60  ;;  %v3987_v35 = vrot.slane %v12149_v42, 7  ;;  %v5561_v62 = vrot.slane %v12213_v30, 1  ;;  %v4074_v10 = vrot.slane %v12142_v15, 3  ;;  %v10428_v15 = vld [vmem:[%s13851_s6 + $0x30] ss:$8 sps:$4 sm:$0xff]  }
 0x2ed   :  { %4420 = vmatpush1.bf16.msra.mxu0 %v10413_v50  ;;  %v12284_v46 = vsel %vm3430_vm2, %v5361_v23, %v5360_v56  ;;  %v4075_v22 = vrot.slane %v12172_v43, 2  ;;  %v5758_v61 = vrot.slane %v12213_v30, 3  ;;  %v5759_v25 = vrot.slane %v12243_v17, 2  ;;  %v10439_v60 = vld [vmem:[%s13851_s6 + $0x324] ss:$8 sps:$4 sm:$0xff]  }
 0x2ee   :  { %4421 = vmatprep.subr.bf16.mxu0 %v10421_v19  ;;  %3567 = vmatpush1.bf16.msra.mxu1 %v10416_v9  ;;  %v12289_v52 = vunpack.c.l.b16 %v3377_v47  ;;  %v12299_v29 = vsel %vm3430_vm2, %v3987_v35, %v12139_v3  ;;  %v12303_v43 = vsel %vm3430_vm2, %v12243_v17, %v5561_v62  ;;  %v3364_v7 = vmax.f32 %v12154_v14, 0.0  ;;  %v10431_v14 = vld [vmem:[%s13851_s6 + $0x310] ss:$8 sps:$4 sm:$0xff]   ;;  %v10442_v47 = vld [vmem:[%s13851_s6 + $0x154] ss:$8 sps:$4 sm:$0xff]  }
 0x2ef   :  { %3568 = vmatprep.subr.bf16.mxu1 %v10424_v40  ;;  %v4371_v54 = vpack.c.b16 %v12192_v26, %v12192_v26  ;;  %v12309_v50 = vsel %vm3430_vm2, %v4075_v22, %v4074_v10  ;;  %v12312_v27 = vsel %vm3430_vm2, %v5759_v25, %v5758_v61  ;;  %v4269_v57 = vrot.slane %v12139_v3, 2  ;;  %v10436_v26 = vld [vmem:[%s13851_s6 + $0x144] ss:$8 sps:$4 sm:$0xff]   ;;  %v10440_v22 = vld [vmem:[%s13851_s6 + $0x150] ss:$8 sps:$4 sm:$0xff]  }
 0x2f0   :  { %v4270_v53 = vrot.slane %v12149_v42, 1  ;;  %v3371_v4 = vpack.c.bf16 %v3357_v8, %v3357_v8  ;;  %v12316_v19 = vunpack.c.l.b16 %v3370_v63  ;;  %v5956_v33 = vrot.slane %v12213_v30, 5  ;;  %v10443_v61 = vld [vmem:[%s13851_s6 + $0x330] ss:$8 sps:$4 sm:$0xff]   ;;  %v10448_v25 = vld [vmem:[%s13851_s6 + $0x164] ss:$8 sps:$4 sm:$0xff]  }
 0x2f1   :  { %4422 = vmatpush1.bf16.msra.mxu0 %v10419_v12  ;;  %v5957_v48 = vrot.slane %v12243_v17, 4  ;;  %v4467_v32 = vrot.slane %v12139_v3, 4  ;;  %v4468_v1 = vrot.slane %v12149_v42, 3  ;;  %v6158_v9 = vrot.slane %v12289_v52, 7 }
 0x2f2   :  { %4613 = vmatprep.subr.bf16.mxu0 %v10427_v44  ;;  %3569 = vmatpush1.bf16.msra.mxu1 %v10422_v2  ;;  %v12335_v36 = vsel %vm3430_vm2, %v4270_v53, %v4269_v57  ;;  %v3378_v24 = vpack.c.bf16 %v3364_v7, %v3364_v7  ;;  %v4665_v51 = vrot.slane %v12139_v3, 6  ;;  %v4666_v12 = vrot.slane %v12149_v42, 5  ;;  %v10451_v7 = vld [vmem:[%s13851_s6 + $0x384] ss:$8 sps:$4 sm:$0xff]  }
 0x2f3   :  { %3570 = vmatprep.subr.bf16.mxu1 %v10430_v5  ;;  %v12341_v11 = vsel %vm3430_vm2, %v5957_v48, %v5956_v33  ;;  %v3358_v40 = vmax.f32 %v12127_v38, 0.0  ;;  %v3365_v20 = vmax.f32 %v12169_v18, 0.0  ;;  %v12354_v2 = vsel %vm3430_vm2, %v4468_v1, %v4467_v32  ;;  %v10449_v1 = vld [vmem:[%s13851_s6 + $0x380] ss:$8 sps:$4 sm:$0xff]  }
 0x2f4   :  { %8899 = vmatmul.mubr.msk.bf16.vlgmr.msra.gmra.mrb[128].mxu0 %vm3473_vm3, %v4371_v54  ;;  %v12358_v3 = vsel %vm3430_vm2, %v6158_v9, %v12316_v19  ;;  %v3520_v38 = vpack.c.b16 %v12207_v34, %v12207_v34  ;;  %v12363_v42 = vsel %vm3430_vm2, %v4666_v12, %v4665_v51  ;;  %v6354_v18 = vrot.slane %v12316_v19, 2  ;;  %v10445_v34 = vld [vmem:[%s13851_s6 + $0x334] ss:$8 sps:$4 sm:$0xff]  }
 0x2f5   :  { %4614 = vmatpush1.bf16.msra.mxu0 %v10425_v37  ;;  %4645 = vmatprep.mubr.bf16.mxu0 %v10984_v0  ;;  %v6355_v44 = vrot.slane %v12289_v52, 1  ;;  %v12367_v8 = vunpack.c.l.b16 %v3371_v4  ;;  %v4866_v56 = vrot.slane %v12196_v41, 1  ;;  %v6552_v23 = vrot.slane %v12316_v19, 4  ;;  %v10446_v4 = vld [vmem:[%s13851_s6 + $0x160] ss:$8 sps:$4 sm:$0xff]  }
 0x2f6   :  { %4615 = vmatprep.subr.bf16.mxu0 %v10433_v55  ;;  %3571 = vmatpush1.bf16.msra.mxu1 %v10428_v15  ;;  %v6553_v63 = vrot.slane %v12289_v52, 3  ;;  %v12372_v37 = vunpack.c.l.b16 %v3378_v24  ;;  %v5063_v62 = vrot.slane %v12196_v41, 3  ;;  %v5064_v10 = vrot.slane %v12163_v39, 2  ;;  %v10457_v51 = vld [vmem:[%s13851_s6 + $0x394] ss:$8 sps:$4 sm:$0xff]  }
 0x2f7   :  { %3661 = vmatprep.subr.bf16.mxu1 %v10436_v26  ;;  %v12379_v35 = vsel %vm3430_vm2, %v6355_v44, %v6354_v18  ;;  %v3379_v5 = vpack.c.bf16 %v3365_v20, %v3365_v20  ;;  %v12395_v15 = vsel %vm3430_vm2, %v12163_v39, %v4866_v56  ;;  %v6750_v57 = vrot.slane %v12316_v19, 6 }
 0x2f8   :  { %v12398_v55 = vsel %vm3430_vm2, %v6553_v63, %v6552_v23  ;;  %v12404_v54 = vsel %vm3430_vm2, %v5064_v10, %v5063_v62  ;;  %v3372_v53 = vpack.c.bf16 %v3358_v40, %v3358_v40  ;;  %v5261_v26 = vrot.slane %v12196_v41, 5  ;;  %v10454_v41 = vld [vmem:[%s13851_s6 + $0x174] ss:$8 sps:$4 sm:$0xff]   ;;  %v10460_v10 = vld [vmem:[%s13851_s6 + $0x44] ss:$8 sps:$4 sm:$0xff]  }
 0x2f9   :  { %4616 = vmatpush1.bf16.msra.mxu0 %v10431_v14  ;;  %8770 = vmatmul.mubr.msk.bf16.vlgmr.msra.gmra.mrb[60].mxu1 %vm3473_vm3, %v3520_v38  ;;  %v6751_v14 = vrot.slane %v12289_v52, 5  ;;  %v5262_v33 = vrot.slane %v12163_v39, 4  ;;  %v6951_v48 = vrot.slane %v12367_v8, 1  ;;  %v12416_v32 = vunpack.c.l.b16 %v3379_v5 }
 0x2fa   :  { %4617 = vmatprep.subr.bf16.mxu0 %v10439_v60  ;;  %3662 = vmatpush1.bf16.msra.mxu1 %v10434_v13  ;;  %v5463_v13 = vrot.slane %v12243_v17, 7  ;;  %v7149_v60 = vrot.slane %v12372_v37, 2  ;;  %v7148_v24 = vrot.slane %v12367_v8, 3  ;;  %v12442_v20 = vunpack.c.l.b16 %v3372_v53 }
 0x2fb   :  { %3693 = vmatprep.mubr.bf16.mxu1 %v10984_v0  ;;  %3663 = vmatprep.subr.bf16.mxu1 %v10442_v47  ;;  %v12425_v39 = vsel %vm3430_vm2, %v6751_v14, %v6750_v57  ;;  %v12428_v9 = vsel %vm3430_vm2, %v5262_v33, %v5261_v26  ;;  %v12436_v12 = vsel %vm3430_vm2, %v12372_v37, %v6951_v48  ;;  %v5659_v38 = vrot.slane %v12213_v30, 2  ;;  %v10461_v33 = vld [vmem:[%s13851_s6 + $0x3a0] ss:$8 sps:$4 sm:$0xff]  }
 0x2fc   :  { %v12440_v40 = vsel %vm3430_vm2, %v5463_v13, %v12213_v30  ;;  %v12448_v47 = vsel %vm3430_vm2, %v7149_v60, %v7148_v24  ;;  %v4569_v18 = vpack.c.b16 %v12210_v31, %v12210_v31  ;;  %v5660_v44 = vrot.slane %v12243_v17, 1  ;;  %v10455_v31 = vld [vmem:[%s13851_s6 + $0x390] ss:$8 sps:$4 sm:$0xff]  }
 0x2fd   :  { %4618 = vmatpush1.bf16.msra.mxu0 %v10437_v59  ;;  %v10452_v59 = vld [vmem:[%s13851_s6 + $0x170] ss:$8 sps:$4 sm:$0xff]   ;;  %v7346_v56 = vrot.slane %v12367_v8, 5  ;;  %v7347_v23 = vrot.slane %v12372_v37, 4  ;;  %v5857_v63 = vrot.slane %v12213_v30, 4  ;;  %v7548_v62 = vrot.slane %v12416_v32, 7 }
 0x2fe   :  { %4619 = vmatprep.subr.bf16.mxu0 %v10445_v34  ;;  %3664 = vmatpush1.bf16.msra.mxu1 %v10440_v22  ;;  %v5858_v34 = vrot.slane %v12243_v17, 3  ;;  %v12467_v5 = vsel %vm3430_vm2, %v5660_v44, %v5659_v38  ;;  %v6055_v57 = vrot.slane %v12213_v30, 6  ;;  %v6056_v53 = vrot.slane %v12243_v17, 5  ;;  %v10466_v30 = vld [vmem:[%s13851_s6 + $0x54] ss:$8 sps:$4 sm:$0xff]  }
 0x2ff   :  { %3665 = vmatprep.subr.bf16.mxu1 %v10448_v25  ;;  %v12470_v22 = vsel %vm3430_vm2, %v7347_v23, %v7346_v56  ;;  %v10463_v25 = vld [vmem:[%s13851_s6 + $0x3a4] ss:$8 sps:$4 sm:$0xff]   ;;  %v7744_v14 = vrot.slane %v12442_v20, 2  ;;  %v7745_v26 = vrot.slane %v12416_v32, 1  ;;  %v6256_v48 = vrot.slane %v12316_v19, 1 }
 0x300   :  { %v12497_v17 = vsel %vm3430_vm2, %v6056_v53, %v6055_v57  ;;  %v3617_v13 = vpack.c.b16 %v12238_v16, %v12238_v16  ;;  %v10469_v16 = vld [vmem:[%s13851_s6 + $0x3b4] ss:$8 sps:$4 sm:$0xff]   ;;  %v8141_v44 = vrot.slane %v12416_v32, 5  ;;  %v10464_v56 = vld [vmem:[%s13851_s6 + $0x50] ss:$8 sps:$4 sm:$0xff]   ;;  %v7049_v57 = vrot.slane %v12367_v8, 2 }
 0x301   :  { %4620 = vmatpush1.bf16.msra.mxu0 %v10443_v61  ;;  %v10458_v61 = vld [vmem:[%s13851_s6 + $0x40] ss:$8 sps:$4 sm:$0xff]   ;;  %v12503_v60 = vsel %vm3430_vm2, %v7745_v26, %v7744_v14  ;;  %v12509_v24 = vsel %vm3430_vm2, %v12289_v52, %v6256_v48  ;;  %v10467_v23 = vld [vmem:[%s13851_s6 + $0x3b0] ss:$8 sps:$4 sm:$0xff]   ;;  %v7050_v53 = vrot.slane %v12372_v37, 1 }
 0x302   :  { %4814 = vmatprep.subr.bf16.mxu0 %v10451_v7  ;;  %3666 = vmatpush1.bf16.msra.mxu1 %v10446_v4  ;;  %v12480_v7 = vsel %vm3430_vm2, %v5858_v34, %v5857_v63  ;;  %v12486_v4 = vsel %vm3430_vm2, %v7548_v62, %v12442_v20  ;;  %v10472_v63 = vld [vmem:[%s13851_s6 + $0x64] ss:$8 sps:$4 sm:$0xff]   ;;  %v10478_v48 = vld [vmem:[%s13851_s6 + $0x74] ss:$8 sps:$4 sm:$0xff]  }
 0x303   :  { %3667 = vmatprep.subr.bf16.mxu1 %v10454_v41  ;;  %v7943_v41 = vrot.slane %v12416_v32, 3  ;;  %v10475_v62 = vld [vmem:[%s13851_s6 + $0x404] ss:$8 sps:$4 sm:$0xff]  }
 0x304   :  { %8933 = vmatmul.mubr.msk.bf16.vlgmr.msra.gmra.mrb[132].mxu0 %vm3473_vm3, %v4569_v18  ;;  %v8140_v18 = vrot.slane %v12442_v20, 6 }
 0x305   :  { %4815 = vmatpush1.bf16.msra.mxu0 %v10449_v1  ;;  %4846 = vmatprep.mubr.bf16.mxu0 %v10984_v0  ;;  %v7942_v1 = vrot.slane %v12442_v20, 4 }
 0x306   :  { %4816 = vmatprep.subr.bf16.mxu0 %v10457_v51  ;;  %3668 = vmatpush1.bf16.msra.mxu1 %v10452_v59  ;;  %v6453_v51 = vrot.slane %v12316_v19, 3  ;;  %v6454_v59 = vrot.slane %v12289_v52, 2 }
 0x307   :  { %3748 = vmatprep.subr.bf16.mxu1 %v10460_v10  ;;  %v12518_v38 = vsel %vm3430_vm2, %v7943_v41, %v7942_v1  ;;  %v6651_v10 = vrot.slane %v12316_v19, 5  ;;  %v7248_v19 = vrot.slane %v12372_v37, 3  ;;  %v10481_v1 = vld [vmem:[%s13851_s6 + $0x414] ss:$8 sps:$4 sm:$0xff]  }
 0x308   :  { %v12533_v34 = vsel %vm3430_vm2, %v6454_v59, %v6453_v51  ;;  %v7445_v51 = vrot.slane %v12367_v8, 6  ;;  %v7446_v59 = vrot.slane %v12372_v37, 5 }
 0x309   :  { %4817 = vmatpush1.bf16.msra.mxu0 %v10455_v31  ;;  %8787 = vmatmul.mubr.msk.bf16.vlgmr.msra.gmra.mrb[64].mxu1 %vm3473_vm3, %v3617_v13  ;;  %v12539_v31 = vsel %vm3430_vm2, %v8141_v44, %v8140_v18  ;;  %v12565_v13 = vsel %vm3430_vm2, %v7050_v53, %v7049_v57  ;;  %v4770_v18 = vpack.c.b16 %v12222_v21, %v12222_v21  ;;  %v10476_v44 = vld [vmem:[%s13851_s6 + $0x70] ss:$8 sps:$4 sm:$0xff]   ;;  %v8042_v21 = vrot.slane %v12416_v32, 4  ;;  %v10485_v57 = vld [vmem:[%s13851_s6 + $0x420] ss:$8 sps:$4 sm:$0xff]  }
 0x30a   :  { %4818 = vmatprep.subr.bf16.mxu0 %v10463_v25  ;;  %3749 = vmatpush1.bf16.msra.mxu1 %v10458_v61  ;;  %v6652_v61 = vrot.slane %v12289_v52, 4  ;;  %v6853_v25 = vrot.slane %v12372_v37, 7  ;;  %v10470_v52 = vld [vmem:[%s13851_s6 + $0x60] ss:$8 sps:$4 sm:$0xff]   ;;  %v8041_v37 = vrot.slane %v12442_v20, 5 }
 0x30b   :  { %3780 = vmatprep.mubr.bf16.mxu1 %v10984_v0  ;;  %3750 = vmatprep.subr.bf16.mxu1 %v10466_v30  ;;  %v7247_v30 = vrot.slane %v12367_v8, 4  ;;  %v10490_v53 = vld [vmem:[%s13851_s6 + $0x194] ss:$8 sps:$4 sm:$0xff]  }
 0x30c   :  { %v12547_v14 = vsel %vm3430_vm2, %v6652_v61, %v6651_v10  ;;  %v12551_v26 = vsel %vm3430_vm2, %v6853_v25, %v12367_v8  ;;  %v12584_v10 = vsel %vm3430_vm2, %v7446_v59, %v7445_v51  ;;  %v10484_v61 = vld [vmem:[%s13851_s6 + $0x184] ss:$8 sps:$4 sm:$0xff]   ;;  %v12603_v25 = vsel %vm3430_vm2, %v8042_v21, %v8041_v37  ;;  %v10497_v51 = vld [vmem:[%s13851_s6 + $0x480] ss:$8 sps:$4 sm:$0xff]   ;;  %v10502_v59 = vld [vmem:[%s13851_s6 + $0x1b4] ss:$8 sps:$4 sm:$0xff]  }
 0x30d   :  { %4819 = vmatpush1.bf16.msra.mxu0 %v10461_v33  ;;  %v10473_v33 = vld [vmem:[%s13851_s6 + $0x400] ss:$8 sps:$4 sm:$0xff]   ;;  %v12571_v41 = vsel %vm3430_vm2, %v7248_v19, %v7247_v30  ;;  %v3704_v30 = vpack.c.b16 %v12226_v49, %v12226_v49  ;;  %v10493_v19 = vld [vmem:[%s13851_s6 + $0x434] ss:$8 sps:$4 sm:$0xff]   ;;  %v10496_v49 = vld [vmem:[%s13851_s6 + $0x1a4] ss:$8 sps:$4 sm:$0xff]   ;;  %v3801_v21 = vpack.c.b16 %v12263_v6, %v12263_v6 }
 0x30e   :  { %4820 = vmatprep.subr.bf16.mxu0 %v10469_v16  ;;  %3751 = vmatpush1.bf16.msra.mxu1 %v10464_v56  ;;  %v7646_v16 = vrot.slane %v12442_v20, 1  ;;  %v7843_v56 = vrot.slane %v12442_v20, 3  ;;  %v10487_v20 = vld [vmem:[%s13851_s6 + $0x424] ss:$8 sps:$4 sm:$0xff]   ;;  %v10512_v6 = vld [vmem:[%s13851_s6 + $0x90] ss:$8 sps:$4 sm:$0xff]  }
 0x30f   :  { %3752 = vmatprep.subr.bf16.mxu1 %v10472_v63  ;;  %v7844_v63 = vrot.slane %v12416_v32, 2  ;;  %v10511_v37 = vld [vmem:[%s13851_s6 + $0x4a4] ss:$8 sps:$4 sm:$0xff]  }
 0x310   :  { %v12588_v8 = vsel %vm3430_vm2, %v12416_v32, %v7646_v16  ;;  %v10482_v32 = vld [vmem:[%s13851_s6 + $0x180] ss:$8 sps:$4 sm:$0xff]   ;;  %v10505_v16 = vld [vmem:[%s13851_s6 + $0x494] ss:$8 sps:$4 sm:$0xff]  }
 0x311   :  { %4821 = vmatpush1.bf16.msra.mxu0 %v10467_v23  ;;  %v12593_v23 = vsel %vm3430_vm2, %v7844_v63, %v7843_v56  ;;  %v10503_v56 = vld [vmem:[%s13851_s6 + $0x490] ss:$8 sps:$4 sm:$0xff]   ;;  %v10508_v63 = vld [vmem:[%s13851_s6 + $0x84] ss:$8 sps:$4 sm:$0xff]  }
 0x312   :  { %5011 = vmatprep.subr.bf16.mxu0 %v10475_v62  ;;  %3753 = vmatpush1.bf16.msra.mxu1 %v10470_v52  ;;  %v10479_v62 = vld [vmem:[%s13851_s6 + $0x410] ss:$8 sps:$4 sm:$0xff]  }
 0x313   :  { %3754 = vmatprep.subr.bf16.mxu1 %v10478_v48  ;;  %v10488_v52 = vld [vmem:[%s13851_s6 + $0x190] ss:$8 sps:$4 sm:$0xff]   ;;  %v10499_v48 = vld [vmem:[%s13851_s6 + $0x484] ss:$8 sps:$4 sm:$0xff]  }
 0x314   :  { %8967 = vmatmul.mubr.msk.bf16.vlgmr.msra.gmra.mrb[136].mxu0 %vm3473_vm3, %v4770_v18  ;;  %v10500_v18 = vld [vmem:[%s13851_s6 + $0x1b0] ss:$8 sps:$4 sm:$0xff]  }
 0x315   :  { %5012 = vmatpush1.bf16.msra.mxu0 %v10473_v33  ;;  %5043 = vmatprep.mubr.bf16.mxu0 %v10984_v0  ;;  %v10491_v33 = vld [vmem:[%s13851_s6 + $0x430] ss:$8 sps:$4 sm:$0xff]  }
 0x316   :  { %5013 = vmatprep.subr.bf16.mxu0 %v10481_v1  ;;  %3755 = vmatpush1.bf16.msra.mxu1 %v10476_v44  ;;  %v10494_v1 = vld [vmem:[%s13851_s6 + $0x1a0] ss:$8 sps:$4 sm:$0xff]   ;;  %v4967_v44 = vpack.c.b16 %v12252_v58, %v12252_v58 }
 0x317   :  { %3845 = vmatprep.subr.bf16.mxu1 %v10484_v61  ;;  %v10506_v58 = vld [vmem:[%s13851_s6 + $0x80] ss:$8 sps:$4 sm:$0xff]  }
 0x318   :  { %v10509_v61 = vld [vmem:[%s13851_s6 + $0x4a0] ss:$8 sps:$4 sm:$0xff]  }
 0x319   :  { %5014 = vmatpush1.bf16.msra.mxu0 %v10479_v62  ;;  %8796 = vmatmul.mubr.msk.bf16.vlgmr.msra.gmra.mrb[68].mxu1 %vm3473_vm3, %v3704_v30  ;;  %v10514_v62 = vld [vmem:[%s13851_s6 + $0x94] ss:$8 sps:$4 sm:$0xff]   ;;  %v10518_v30 = vld [vmem:[%s13851_s6 + $0xa0] ss:$8 sps:$4 sm:$0xff]  }
 0x31a   :  { %5015 = vmatprep.subr.bf16.mxu0 %v10487_v20  ;;  %3846 = vmatpush1.bf16.msra.mxu1 %v10482_v32  ;;  %v10517_v32 = vld [vmem:[%s13851_s6 + $0x4b4] ss:$8 sps:$4 sm:$0xff]   ;;  %v10520_v20 = vld [vmem:[%s13851_s6 + $0xa4] ss:$8 sps:$4 sm:$0xff]  }
 0x31b   :  { %3877 = vmatprep.mubr.bf16.mxu1 %v10984_v0  ;;  %3847 = vmatprep.subr.bf16.mxu1 %v10490_v53  ;;  %v10523_v53 = vld [vmem:[%s13851_s6 + $0x504] ss:$8 sps:$4 sm:$0xff]  }
 0x31d   :  { %5016 = vmatpush1.bf16.msra.mxu0 %v10485_v57  ;;  %v10515_v57 = vld [vmem:[%s13851_s6 + $0x4b0] ss:$8 sps:$4 sm:$0xff]  }
 0x31e   :  { %5017 = vmatprep.subr.bf16.mxu0 %v10493_v19  ;;  %3848 = vmatpush1.bf16.msra.mxu1 %v10488_v52  ;;  %v10526_v19 = vld [vmem:[%s13851_s6 + $0xb4] ss:$8 sps:$4 sm:$0xff]   ;;  %v10521_v52 = vld [vmem:[%s13851_s6 + $0x500] ss:$8 sps:$4 sm:$0xff]  }
 0x31f   :  { %3849 = vmatprep.subr.bf16.mxu1 %v10496_v49  ;;  %v10529_v49 = vld [vmem:[%s13851_s6 + $0x514] ss:$8 sps:$4 sm:$0xff]  }
 0x321   :  { %5018 = vmatpush1.bf16.msra.mxu0 %v10491_v33  ;;  %v5165_v33 = vpack.c.b16 %v12266_v45, %v12266_v45  ;;  %v10527_v45 = vld [vmem:[%s13851_s6 + $0x510] ss:$8 sps:$4 sm:$0xff]  }
 0x322   :  { %5209 = vmatprep.subr.bf16.mxu0 %v10499_v48  ;;  %3850 = vmatpush1.bf16.msra.mxu1 %v10494_v1  ;;  %v10524_v48 = vld [vmem:[%s13851_s6 + $0xb0] ss:$8 sps:$4 sm:$0xff]   ;;  %v10532_v1 = vld [vmem:[%s13851_s6 + $0x1c4] ss:$8 sps:$4 sm:$0xff]  }
 0x323   :  { %3851 = vmatprep.subr.bf16.mxu1 %v10502_v59  ;;  %v10530_v59 = vld [vmem:[%s13851_s6 + $0x1c0] ss:$8 sps:$4 sm:$0xff]  }
 0x324   :  { %9001 = vmatmul.mubr.msk.bf16.vlgmr.msra.gmra.mrb[140].mxu0 %vm3473_vm3, %v4967_v44  ;;  %v10533_v44 = vld [vmem:[%s13851_s6 + $0x520] ss:$8 sps:$4 sm:$0xff]  }
 0x325   :  { %5210 = vmatpush1.bf16.msra.mxu0 %v10497_v51  ;;  %5241 = vmatprep.mubr.bf16.mxu0 %v10984_v0  ;;  %v10535_v51 = vld [vmem:[%s13851_s6 + $0x524] ss:$8 sps:$4 sm:$0xff]  }
 0x326   :  { %5211 = vmatprep.subr.bf16.mxu0 %v10505_v16  ;;  %3852 = vmatpush1.bf16.msra.mxu1 %v10500_v18  ;;  %v3889_v16 = vpack.c.b16 %v12270_v28, %v12270_v28  ;;  %v10538_v18 = vld [vmem:[%s13851_s6 + $0x1d4] ss:$8 sps:$4 sm:$0xff]   ;;  %v10536_v28 = vld [vmem:[%s13851_s6 + $0x1d0] ss:$8 sps:$4 sm:$0xff]  }
 0x327   :  { %3933 = vmatprep.subr.bf16.mxu1 %v10508_v63  ;;  %v10544_v63 = vld [vmem:[%s13851_s6 + $0x1e4] ss:$8 sps:$4 sm:$0xff]  }
 0x329   :  { %5212 = vmatpush1.bf16.msra.mxu0 %v10503_v56  ;;  %8813 = vmatmul.mubr.msk.bf16.vlgmr.msra.gmra.mrb[72].mxu1 %vm3473_vm3, %v3801_v21  ;;  %v10541_v56 = vld [vmem:[%s13851_s6 + $0x534] ss:$8 sps:$4 sm:$0xff]   ;;  %v10542_v21 = vld [vmem:[%s13851_s6 + $0x1e0] ss:$8 sps:$4 sm:$0xff]  }
 0x32a   :  { %5213 = vmatprep.subr.bf16.mxu0 %v10511_v37  ;;  %3934 = vmatpush1.bf16.msra.mxu1 %v10506_v58  ;;  %v10539_v37 = vld [vmem:[%s13851_s6 + $0x530] ss:$8 sps:$4 sm:$0xff]   ;;  %v10547_v58 = vld [vmem:[%s13851_s6 + $0x584] ss:$8 sps:$4 sm:$0xff]  }
 0x32b   :  { %3965 = vmatprep.mubr.bf16.mxu1 %v10984_v0  ;;  %3935 = vmatprep.subr.bf16.mxu1 %v10514_v62  ;;  %v10550_v62 = vld [vmem:[%s13851_s6 + $0x1f4] ss:$8 sps:$4 sm:$0xff]  }
 0x32d   :  { %5214 = vmatpush1.bf16.msra.mxu0 %v10509_v61  ;;  %v10545_v61 = vld [vmem:[%s13851_s6 + $0x580] ss:$8 sps:$4 sm:$0xff]  }
 0x32e   :  { %5215 = vmatprep.subr.bf16.mxu0 %v10517_v32  ;;  %3936 = vmatpush1.bf16.msra.mxu1 %v10512_v6  ;;  %v5363_v32 = vpack.c.b16 %v12284_v46, %v12284_v46  ;;  %v10553_v6 = vld [vmem:[%s13851_s6 + $0x594] ss:$8 sps:$4 sm:$0xff]   ;;  %v10551_v46 = vld [vmem:[%s13851_s6 + $0x590] ss:$8 sps:$4 sm:$0xff]  }
 0x32f   :  { %3937 = vmatprep.subr.bf16.mxu1 %v10520_v20  ;;  %v10548_v20 = vld [vmem:[%s13851_s6 + $0x1f0] ss:$8 sps:$4 sm:$0xff]  }
 0x331   :  { %5216 = vmatpush1.bf16.msra.mxu0 %v10515_v57  ;;  %v10556_v57 = vld [vmem:[%s13851_s6 + $0xc4] ss:$8 sps:$4 sm:$0xff]  }
 0x332   :  { %5407 = vmatprep.subr.bf16.mxu0 %v10523_v53  ;;  %3938 = vmatpush1.bf16.msra.mxu1 %v10518_v30  ;;  %v10559_v53 = vld [vmem:[%s13851_s6 + $0x5a4] ss:$8 sps:$4 sm:$0xff]   ;;  %v10554_v30 = vld [vmem:[%s13851_s6 + $0xc0] ss:$8 sps:$4 sm:$0xff]  }
 0x333   :  { %3939 = vmatprep.subr.bf16.mxu1 %v10526_v19  ;;  %v3989_v19 = vpack.c.b16 %v12299_v29, %v12299_v29  ;;  %v10560_v29 = vld [vmem:[%s13851_s6 + $0xd0] ss:$8 sps:$4 sm:$0xff]  }
 0x334   :  { %9035 = vmatmul.mubr.msk.bf16.vlgmr.msra.gmra.mrb[144].mxu0 %vm3473_vm3, %v5165_v33  ;;  %v10557_v33 = vld [vmem:[%s13851_s6 + $0x5a0] ss:$8 sps:$4 sm:$0xff]  }
 0x335   :  { %5408 = vmatpush1.bf16.msra.mxu0 %v10521_v52  ;;  %5439 = vmatprep.mubr.bf16.mxu0 %v10984_v0  ;;  %v10562_v52 = vld [vmem:[%s13851_s6 + $0xd4] ss:$8 sps:$4 sm:$0xff]  }
 0x336   :  { %5409 = vmatprep.subr.bf16.mxu0 %v10529_v49  ;;  %3940 = vmatpush1.bf16.msra.mxu1 %v10524_v48  ;;  %v10565_v49 = vld [vmem:[%s13851_s6 + $0x5b4] ss:$8 sps:$4 sm:$0xff]   ;;  %v10568_v48 = vld [vmem:[%s13851_s6 + $0xe4] ss:$8 sps:$4 sm:$0xff]  }
 0x337   :  { %4033 = vmatprep.subr.bf16.mxu1 %v10532_v1  ;;  %v10563_v1 = vld [vmem:[%s13851_s6 + $0x5b0] ss:$8 sps:$4 sm:$0xff]  }
 0x339   :  { %5410 = vmatpush1.bf16.msra.mxu0 %v10527_v45  ;;  %8822 = vmatmul.mubr.msk.bf16.vlgmr.msra.gmra.mrb[76].mxu1 %vm3473_vm3, %v3889_v16  ;;  %v10571_v45 = vld [vmem:[%s13851_s6 + $0x604] ss:$8 sps:$4 sm:$0xff]   ;;  %v10569_v16 = vld [vmem:[%s13851_s6 + $0x600] ss:$8 sps:$4 sm:$0xff]  }
 0x33a   :  { %5411 = vmatprep.subr.bf16.mxu0 %v10535_v51  ;;  %4034 = vmatpush1.bf16.msra.mxu1 %v10530_v59  ;;  %v10566_v51 = vld [vmem:[%s13851_s6 + $0xe0] ss:$8 sps:$4 sm:$0xff]   ;;  %v10574_v59 = vld [vmem:[%s13851_s6 + $0xf4] ss:$8 sps:$4 sm:$0xff]  }
 0x33b   :  { %4065 = vmatprep.mubr.bf16.mxu1 %v10984_v0  ;;  %4035 = vmatprep.subr.bf16.mxu1 %v10538_v18  ;;  %v5563_v18 = vpack.c.b16 %v12303_v43, %v12303_v43  ;;  %v10575_v43 = vld [vmem:[%s13851_s6 + $0x610] ss:$8 sps:$4 sm:$0xff]  }
 0x33d   :  { %5412 = vmatpush1.bf16.msra.mxu0 %v10533_v44  ;;  %v10577_v44 = vld [vmem:[%s13851_s6 + $0x614] ss:$8 sps:$4 sm:$0xff]  }
 0x33e   :  { %5413 = vmatprep.subr.bf16.mxu0 %v10541_v56  ;;  %4036 = vmatpush1.bf16.msra.mxu1 %v10536_v28  ;;  %v10572_v56 = vld [vmem:[%s13851_s6 + $0xf0] ss:$8 sps:$4 sm:$0xff]   ;;  %v10580_v28 = vld [vmem:[%s13851_s6 + $0x244] ss:$8 sps:$4 sm:$0xff]  }
 0x33f   :  { %4037 = vmatprep.subr.bf16.mxu1 %v10544_v63  ;;  %v10583_v63 = vld [vmem:[%s13851_s6 + $0x624] ss:$8 sps:$4 sm:$0xff]  }
 0x341   :  { %5414 = vmatpush1.bf16.msra.mxu0 %v10539_v37  ;;  %v10578_v37 = vld [vmem:[%s13851_s6 + $0x240] ss:$8 sps:$4 sm:$0xff]  }
 0x342   :  { %5607 = vmatprep.subr.bf16.mxu0 %v10547_v58  ;;  %4038 = vmatpush1.bf16.msra.mxu1 %v10542_v21  ;;  %v4077_v58 = vpack.c.b16 %v12309_v50, %v12309_v50  ;;  %v10586_v21 = vld [vmem:[%s13851_s6 + $0x254] ss:$8 sps:$4 sm:$0xff]   ;;  %v10584_v50 = vld [vmem:[%s13851_s6 + $0x250] ss:$8 sps:$4 sm:$0xff]  }
 0x343   :  { %4039 = vmatprep.subr.bf16.mxu1 %v10550_v62  ;;  %v10581_v62 = vld [vmem:[%s13851_s6 + $0x620] ss:$8 sps:$4 sm:$0xff]  }
 0x344   :  { %9069 = vmatmul.mubr.msk.bf16.vlgmr.msra.gmra.mrb[148].mxu0 %vm3473_vm3, %v5363_v32  ;;  %v10592_v32 = vld [vmem:[%s13851_s6 + $0x264] ss:$8 sps:$4 sm:$0xff]  }
 0x345   :  { %5608 = vmatpush1.bf16.msra.mxu0 %v10545_v61  ;;  %5639 = vmatprep.mubr.bf16.mxu0 %v10984_v0  ;;  %v10589_v61 = vld [vmem:[%s13851_s6 + $0x634] ss:$8 sps:$4 sm:$0xff]  }
 0x346   :  { %5609 = vmatprep.subr.bf16.mxu0 %v10553_v6  ;;  %4040 = vmatpush1.bf16.msra.mxu1 %v10548_v20  ;;  %v10587_v6 = vld [vmem:[%s13851_s6 + $0x630] ss:$8 sps:$4 sm:$0xff]   ;;  %v10595_v20 = vld [vmem:[%s13851_s6 + $0x684] ss:$8 sps:$4 sm:$0xff]  }
 0x347   :  { %4121 = vmatprep.subr.bf16.mxu1 %v10556_v57  ;;  %v10590_v57 = vld [vmem:[%s13851_s6 + $0x260] ss:$8 sps:$4 sm:$0xff]  }
 0x349   :  { %5610 = vmatpush1.bf16.msra.mxu0 %v10551_v46  ;;  %8839 = vmatmul.mubr.msk.bf16.vlgmr.msra.gmra.mrb[80].mxu1 %vm3473_vm3, %v3989_v19  ;;  %v10598_v46 = vld [vmem:[%s13851_s6 + $0x274] ss:$8 sps:$4 sm:$0xff]  }
 0x34a   :  { %5611 = vmatprep.subr.bf16.mxu0 %v10559_v53  ;;  %4122 = vmatpush1.bf16.msra.mxu1 %v10554_v30  ;;  %v10593_v53 = vld [vmem:[%s13851_s6 + $0x680] ss:$8 sps:$4 sm:$0xff]   ;;  %v5761_v30 = vpack.c.b16 %v12312_v27, %v12312_v27  ;;  %v10601_v19 = vld [vmem:[%s13851_s6 + $0x694] ss:$8 sps:$4 sm:$0xff]   ;;  %v10599_v27 = vld [vmem:[%s13851_s6 + $0x690] ss:$8 sps:$4 sm:$0xff]  }
 0x34b   :  { %4153 = vmatprep.mubr.bf16.mxu1 %v10984_v0  ;;  %4123 = vmatprep.subr.bf16.mxu1 %v10562_v52  ;;  %v10596_v52 = vld [vmem:[%s13851_s6 + $0x270] ss:$8 sps:$4 sm:$0xff]  }
 0x34d   :  { %5612 = vmatpush1.bf16.msra.mxu0 %v10557_v33  ;;  %v10604_v33 = vld [vmem:[%s13851_s6 + $0x2c4] ss:$8 sps:$4 sm:$0xff]  }
 0x34e   :  { %5613 = vmatprep.subr.bf16.mxu0 %v10565_v49  ;;  %4124 = vmatpush1.bf16.msra.mxu1 %v10560_v29  ;;  %v10607_v49 = vld [vmem:[%s13851_s6 + $0x6a4] ss:$8 sps:$4 sm:$0xff]   ;;  %v10602_v29 = vld [vmem:[%s13851_s6 + $0x2c0] ss:$8 sps:$4 sm:$0xff]  }
 0x34f   :  { %4125 = vmatprep.subr.bf16.mxu1 %v10568_v48  ;;  %v4272_v48 = vpack.c.b16 %v12335_v36, %v12335_v36  ;;  %v10608_v36 = vld [vmem:[%s13851_s6 + $0x2d0] ss:$8 sps:$4 sm:$0xff]  }
 0x351   :  { %5614 = vmatpush1.bf16.msra.mxu0 %v10563_v1  ;;  %v10610_v1 = vld [vmem:[%s13851_s6 + $0x2d4] ss:$8 sps:$4 sm:$0xff]  }
 0x352   :  { %5805 = vmatprep.subr.bf16.mxu0 %v10571_v45  ;;  %4126 = vmatpush1.bf16.msra.mxu1 %v10566_v51  ;;  %v10605_v45 = vld [vmem:[%s13851_s6 + $0x6a0] ss:$8 sps:$4 sm:$0xff]   ;;  %v10613_v51 = vld [vmem:[%s13851_s6 + $0x6b4] ss:$8 sps:$4 sm:$0xff]  }
 0x353   :  { %4127 = vmatprep.subr.bf16.mxu1 %v10574_v59  ;;  %v10616_v59 = vld [vmem:[%s13851_s6 + $0x2e4] ss:$8 sps:$4 sm:$0xff]  }
 0x354   :  { %9103 = vmatmul.mubr.msk.bf16.vlgmr.msra.gmra.mrb[152].mxu0 %vm3473_vm3, %v5563_v18  ;;  %v10619_v18 = vld [vmem:[%s13851_s6 + $0x704] ss:$8 sps:$4 sm:$0xff]  }
 0x355   :  { %5806 = vmatpush1.bf16.msra.mxu0 %v10569_v16  ;;  %5837 = vmatprep.mubr.bf16.mxu0 %v10984_v0  ;;  %v10611_v16 = vld [vmem:[%s13851_s6 + $0x6b0] ss:$8 sps:$4 sm:$0xff]  }
 0x356   :  { %5807 = vmatprep.subr.bf16.mxu0 %v10577_v44  ;;  %4128 = vmatpush1.bf16.msra.mxu1 %v10572_v56  ;;  %v10614_v44 = vld [vmem:[%s13851_s6 + $0x2e0] ss:$8 sps:$4 sm:$0xff]   ;;  %v10622_v56 = vld [vmem:[%s13851_s6 + $0x2f4] ss:$8 sps:$4 sm:$0xff]  }
 0x357   :  { %4316 = vmatprep.subr.bf16.mxu1 %v10580_v28  ;;  %v10617_v28 = vld [vmem:[%s13851_s6 + $0x700] ss:$8 sps:$4 sm:$0xff]  }
 0x359   :  { %5808 = vmatpush1.bf16.msra.mxu0 %v10575_v43  ;;  %8848 = vmatmul.mubr.msk.bf16.vlgmr.msra.gmra.mrb[84].mxu1 %vm3473_vm3, %v4077_v58  ;;  %v5959_v43 = vpack.c.b16 %v12341_v11, %v12341_v11  ;;  %v10628_v58 = vld [vmem:[%s13851_s6 + $0x344] ss:$8 sps:$4 sm:$0xff]   ;;  %v10623_v11 = vld [vmem:[%s13851_s6 + $0x710] ss:$8 sps:$4 sm:$0xff]  }
 0x35a   :  { %5809 = vmatprep.subr.bf16.mxu0 %v10583_v63  ;;  %4317 = vmatpush1.bf16.msra.mxu1 %v10578_v37  ;;  %v10625_v63 = vld [vmem:[%s13851_s6 + $0x714] ss:$8 sps:$4 sm:$0xff]   ;;  %v10620_v37 = vld [vmem:[%s13851_s6 + $0x2f0] ss:$8 sps:$4 sm:$0xff]  }
 0x35b   :  { %4348 = vmatprep.mubr.bf16.mxu1 %v10984_v0  ;;  %4318 = vmatprep.subr.bf16.mxu1 %v10586_v21  ;;  %v10631_v21 = vld [vmem:[%s13851_s6 + $0x724] ss:$8 sps:$4 sm:$0xff]  }
 0x35d   :  { %5810 = vmatpush1.bf16.msra.mxu0 %v10581_v62  ;;  %v10626_v62 = vld [vmem:[%s13851_s6 + $0x340] ss:$8 sps:$4 sm:$0xff]  }
 0x35e   :  { %5811 = vmatprep.subr.bf16.mxu0 %v10589_v61  ;;  %4319 = vmatpush1.bf16.msra.mxu1 %v10584_v50  ;;  %v4470_v61 = vpack.c.b16 %v12354_v2, %v12354_v2  ;;  %v10634_v50 = vld [vmem:[%s13851_s6 + $0x354] ss:$8 sps:$4 sm:$0xff]   ;;  %v10632_v2 = vld [vmem:[%s13851_s6 + $0x350] ss:$8 sps:$4 sm:$0xff]  }
 0x35f   :  { %4320 = vmatprep.subr.bf16.mxu1 %v10592_v32  ;;  %v10629_v32 = vld [vmem:[%s13851_s6 + $0x720] ss:$8 sps:$4 sm:$0xff]  }
 0x361   :  { %5812 = vmatpush1.bf16.msra.mxu0 %v10587_v6  ;;  %v10637_v6 = vld [vmem:[%s13851_s6 + $0x734] ss:$8 sps:$4 sm:$0xff]  }
 0x362   :  { %6003 = vmatprep.subr.bf16.mxu0 %v10595_v20  ;;  %4321 = vmatpush1.bf16.msra.mxu1 %v10590_v57  ;;  %v10640_v20 = vld [vmem:[%s13851_s6 + $0x364] ss:$8 sps:$4 sm:$0xff]   ;;  %v10635_v57 = vld [vmem:[%s13851_s6 + $0x730] ss:$8 sps:$4 sm:$0xff]  }
 0x363   :  { %4322 = vmatprep.subr.bf16.mxu1 %v10598_v46  ;;  %v10643_v46 = vld [vmem:[%s13851_s6 + $0x784] ss:$8 sps:$4 sm:$0xff]  }
 0x364   :  { %9137 = vmatmul.mubr.msk.bf16.vlgmr.msra.gmra.mrb[156].mxu0 %vm3473_vm3, %v5761_v30  ;;  %v10646_v30 = vld [vmem:[%s13851_s6 + $0x374] ss:$8 sps:$4 sm:$0xff]  }
 0x365   :  { %6004 = vmatpush1.bf16.msra.mxu0 %v10593_v53  ;;  %6035 = vmatprep.mubr.bf16.mxu0 %v10984_v0  ;;  %v10638_v53 = vld [vmem:[%s13851_s6 + $0x360] ss:$8 sps:$4 sm:$0xff]  }
 0x366   :  { %6005 = vmatprep.subr.bf16.mxu0 %v10601_v19  ;;  %4323 = vmatpush1.bf16.msra.mxu1 %v10596_v52  ;;  %v10641_v19 = vld [vmem:[%s13851_s6 + $0x780] ss:$8 sps:$4 sm:$0xff]   ;;  %v6160_v52 = vpack.c.b16 %v12358_v3, %v12358_v3  ;;  %v10647_v3 = vld [vmem:[%s13851_s6 + $0x790] ss:$8 sps:$4 sm:$0xff]  }
 0x367   :  { %4514 = vmatprep.subr.bf16.mxu1 %v10604_v33  ;;  %v10649_v33 = vld [vmem:[%s13851_s6 + $0x794] ss:$8 sps:$4 sm:$0xff]  }
 0x369   :  { %6006 = vmatpush1.bf16.msra.mxu0 %v10599_v27  ;;  %8882 = vmatmul.mubr.msk.bf16.vlgmr.msra.gmra.mrb[88].mxu1 %vm3473_vm3, %v4272_v48  ;;  %v10644_v27 = vld [vmem:[%s13851_s6 + $0x370] ss:$8 sps:$4 sm:$0xff]   ;;  %v10650_v48 = vld [vmem:[%s13851_s6 + $0x3c0] ss:$8 sps:$4 sm:$0xff]  }
 0x36a   :  { %6007 = vmatprep.subr.bf16.mxu0 %v10607_v49  ;;  %4515 = vmatpush1.bf16.msra.mxu1 %v10602_v29  ;;  %v10652_v49 = vld [vmem:[%s13851_s6 + $0x3c4] ss:$8 sps:$4 sm:$0xff]  }
 0x36b   :  { %4546 = vmatprep.mubr.bf16.mxu1 %v10984_v0  ;;  %4516 = vmatprep.subr.bf16.mxu1 %v10610_v1  ;;  %v10655_v29 = vld [vmem:[%s13851_s6 + $0x7a4] ss:$8 sps:$4 sm:$0xff]   ;;  %v4668_v1 = vpack.c.b16 %v12363_v42, %v12363_v42  ;;  %v10656_v42 = vld [vmem:[%s13851_s6 + $0x3d0] ss:$8 sps:$4 sm:$0xff]  }
 0x36d   :  { %6008 = vmatpush1.bf16.msra.mxu0 %v10605_v45  ;;  %v10658_v45 = vld [vmem:[%s13851_s6 + $0x3d4] ss:$8 sps:$4 sm:$0xff]  }
 0x36e   :  { %6009 = vmatprep.subr.bf16.mxu0 %v10613_v51  ;;  %4517 = vmatpush1.bf16.msra.mxu1 %v10608_v36  ;;  %v10653_v51 = vld [vmem:[%s13851_s6 + $0x7a0] ss:$8 sps:$4 sm:$0xff]   ;;  %v10661_v36 = vld [vmem:[%s13851_s6 + $0x7b4] ss:$8 sps:$4 sm:$0xff]  }
 0x36f   :  { %4518 = vmatprep.subr.bf16.mxu1 %v10616_v59  ;;  %v10664_v59 = vld [vmem:[%s13851_s6 + $0x3e4] ss:$8 sps:$4 sm:$0xff]  }
 0x371   :  { %6010 = vmatpush1.bf16.msra.mxu0 %v10611_v16  ;;  %v10659_v16 = vld [vmem:[%s13851_s6 + $0x7b0] ss:$8 sps:$4 sm:$0xff]  }
 0x372   :  { %6204 = vmatprep.subr.bf16.mxu0 %v10619_v18  ;;  %4519 = vmatpush1.bf16.msra.mxu1 %v10614_v44  ;;  %v10667_v18 = vld [vmem:[%s13851_s6 + $0x804] ss:$8 sps:$4 sm:$0xff]   ;;  %v10662_v44 = vld [vmem:[%s13851_s6 + $0x3e0] ss:$8 sps:$4 sm:$0xff]  }
 0x373   :  { %4520 = vmatprep.subr.bf16.mxu1 %v10622_v56  ;;  %v10670_v56 = vld [vmem:[%s13851_s6 + $0x3f4] ss:$8 sps:$4 sm:$0xff]  }
 0x374   :  { %9171 = vmatmul.mubr.msk.bf16.vlgmr.msra.gmra.mrb[160].mxu0 %vm3473_vm3, %v5959_v43  ;;  %v6357_v43 = vpack.c.b16 %v12379_v35, %v12379_v35  ;;  %v10671_v35 = vld [vmem:[%s13851_s6 + $0x810] ss:$8 sps:$4 sm:$0xff]  }
 0x375   :  { %6205 = vmatpush1.bf16.msra.mxu0 %v10617_v28  ;;  %6236 = vmatprep.mubr.bf16.mxu0 %v10984_v0  ;;  %v10665_v28 = vld [vmem:[%s13851_s6 + $0x800] ss:$8 sps:$4 sm:$0xff]  }
 0x376   :  { %6206 = vmatprep.subr.bf16.mxu0 %v10625_v63  ;;  %4521 = vmatpush1.bf16.msra.mxu1 %v10620_v37  ;;  %v10673_v63 = vld [vmem:[%s13851_s6 + $0x814] ss:$8 sps:$4 sm:$0xff]   ;;  %v10668_v37 = vld [vmem:[%s13851_s6 + $0x3f0] ss:$8 sps:$4 sm:$0xff]  }
 0x377   :  { %4712 = vmatprep.subr.bf16.mxu1 %v10628_v58  ;;  %v10676_v58 = vld [vmem:[%s13851_s6 + $0x444] ss:$8 sps:$4 sm:$0xff]  }
 0x379   :  { %6207 = vmatpush1.bf16.msra.mxu0 %v10623_v11  ;;  %8916 = vmatmul.mubr.msk.bf16.vlgmr.msra.gmra.mrb[92].mxu1 %vm3473_vm3, %v4470_v61  ;;  %v10679_v11 = vld [vmem:[%s13851_s6 + $0x824] ss:$8 sps:$4 sm:$0xff]   ;;  %v10682_v61 = vld [vmem:[%s13851_s6 + $0x454] ss:$8 sps:$4 sm:$0xff]  }
 0x37a   :  { %6208 = vmatprep.subr.bf16.mxu0 %v10631_v21  ;;  %4713 = vmatpush1.bf16.msra.mxu1 %v10626_v62  ;;  %v10674_v21 = vld [vmem:[%s13851_s6 + $0x440] ss:$8 sps:$4 sm:$0xff]   ;;  %v4868_v62 = vpack.c.b16 %v12395_v15, %v12395_v15  ;;  %v10680_v15 = vld [vmem:[%s13851_s6 + $0x450] ss:$8 sps:$4 sm:$0xff]  }
 0x37b   :  { %4744 = vmatprep.mubr.bf16.mxu1 %v10984_v0  ;;  %4714 = vmatprep.subr.bf16.mxu1 %v10634_v50  ;;  %v10677_v50 = vld [vmem:[%s13851_s6 + $0x820] ss:$8 sps:$4 sm:$0xff]  }
 0x37d   :  { %6209 = vmatpush1.bf16.msra.mxu0 %v10629_v32  ;;  %v10685_v32 = vld [vmem:[%s13851_s6 + $0x834] ss:$8 sps:$4 sm:$0xff]  }
 0x37e   :  { %6210 = vmatprep.subr.bf16.mxu0 %v10637_v6  ;;  %4715 = vmatpush1.bf16.msra.mxu1 %v10632_v2  ;;  %v10688_v6 = vld [vmem:[%s13851_s6 + $0x464] ss:$8 sps:$4 sm:$0xff]   ;;  %v10683_v2 = vld [vmem:[%s13851_s6 + $0x830] ss:$8 sps:$4 sm:$0xff]  }
 0x37f   :  { %4716 = vmatprep.subr.bf16.mxu1 %v10640_v20  ;;  %v10691_v20 = vld [vmem:[%s13851_s6 + $0x884] ss:$8 sps:$4 sm:$0xff]  }
 0x381   :  { %6211 = vmatpush1.bf16.msra.mxu0 %v10635_v57  ;;  %v10686_v57 = vld [vmem:[%s13851_s6 + $0x460] ss:$8 sps:$4 sm:$0xff]  }
 0x382   :  { %6401 = vmatprep.subr.bf16.mxu0 %v10643_v46  ;;  %4717 = vmatpush1.bf16.msra.mxu1 %v10638_v53  ;;  %v10694_v46 = vld [vmem:[%s13851_s6 + $0x474] ss:$8 sps:$4 sm:$0xff]   ;;  %v10689_v53 = vld [vmem:[%s13851_s6 + $0x880] ss:$8 sps:$4 sm:$0xff]  }
 0x383   :  { %4718 = vmatprep.subr.bf16.mxu1 %v10646_v30  ;;  %v6555_v30 = vpack.c.b16 %v12398_v55, %v12398_v55  ;;  %v10695_v55 = vld [vmem:[%s13851_s6 + $0x890] ss:$8 sps:$4 sm:$0xff]  }
 0x384   :  { %9205 = vmatmul.mubr.msk.bf16.vlgmr.msra.gmra.mrb[164].mxu0 %vm3473_vm3, %v6160_v52  ;;  %v10692_v52 = vld [vmem:[%s13851_s6 + $0x470] ss:$8 sps:$4 sm:$0xff]  }
 0x385   :  { %6402 = vmatpush1.bf16.msra.mxu0 %v10641_v19  ;;  %6433 = vmatprep.mubr.bf16.mxu0 %v10984_v0  ;;  %v10697_v19 = vld [vmem:[%s13851_s6 + $0x894] ss:$8 sps:$4 sm:$0xff]  }
 0x386   :  { %6403 = vmatprep.subr.bf16.mxu0 %v10649_v33  ;;  %4719 = vmatpush1.bf16.msra.mxu1 %v10644_v27  ;;  %v10700_v33 = vld [vmem:[%s13851_s6 + $0x4c4] ss:$8 sps:$4 sm:$0xff]  }
 0x387   :  { %4912 = vmatprep.subr.bf16.mxu1 %v10652_v49  ;;  %v10703_v27 = vld [vmem:[%s13851_s6 + $0x8a4] ss:$8 sps:$4 sm:$0xff]   ;;  %v10698_v49 = vld [vmem:[%s13851_s6 + $0x4c0] ss:$8 sps:$4 sm:$0xff]  }
 0x389   :  { %6404 = vmatpush1.bf16.msra.mxu0 %v10647_v3  ;;  %8950 = vmatmul.mubr.msk.bf16.vlgmr.msra.gmra.mrb[96].mxu1 %vm3473_vm3, %v4668_v1  ;;  %v5066_v3 = vpack.c.b16 %v12404_v54, %v12404_v54  ;;  %v10709_v1 = vld [vmem:[%s13851_s6 + $0x8b4] ss:$8 sps:$4 sm:$0xff]   ;;  %v10704_v54 = vld [vmem:[%s13851_s6 + $0x4d0] ss:$8 sps:$4 sm:$0xff]  }
 0x38a   :  { %6405 = vmatprep.subr.bf16.mxu0 %v10655_v29  ;;  %4913 = vmatpush1.bf16.msra.mxu1 %v10650_v48  ;;  %v10706_v29 = vld [vmem:[%s13851_s6 + $0x4d4] ss:$8 sps:$4 sm:$0xff]   ;;  %v10701_v48 = vld [vmem:[%s13851_s6 + $0x8a0] ss:$8 sps:$4 sm:$0xff]  }
 0x38b   :  { %4944 = vmatprep.mubr.bf16.mxu1 %v10984_v0  ;;  %4914 = vmatprep.subr.bf16.mxu1 %v10658_v45  ;;  %v10712_v45 = vld [vmem:[%s13851_s6 + $0x4e4] ss:$8 sps:$4 sm:$0xff]  }
 0x38d   :  { %6406 = vmatpush1.bf16.msra.mxu0 %v10653_v51  ;;  %v10707_v51 = vld [vmem:[%s13851_s6 + $0x8b0] ss:$8 sps:$4 sm:$0xff]  }
 0x38e   :  { %6407 = vmatprep.subr.bf16.mxu0 %v10661_v36  ;;  %4915 = vmatpush1.bf16.msra.mxu1 %v10656_v42  ;;  %v10715_v36 = vld [vmem:[%s13851_s6 + $0x904] ss:$8 sps:$4 sm:$0xff]   ;;  %v10710_v42 = vld [vmem:[%s13851_s6 + $0x4e0] ss:$8 sps:$4 sm:$0xff]  }
 0x38f   :  { %4916 = vmatprep.subr.bf16.mxu1 %v10664_v59  ;;  %v10718_v59 = vld [vmem:[%s13851_s6 + $0x4f4] ss:$8 sps:$4 sm:$0xff]  }
 0x391   :  { %6408 = vmatpush1.bf16.msra.mxu0 %v10659_v16  ;;  %v10713_v16 = vld [vmem:[%s13851_s6 + $0x900] ss:$8 sps:$4 sm:$0xff]  }
 0x392   :  { %6599 = vmatprep.subr.bf16.mxu0 %v10667_v18  ;;  %4917 = vmatpush1.bf16.msra.mxu1 %v10662_v44  ;;  %v6753_v18 = vpack.c.b16 %v12425_v39, %v12425_v39  ;;  %v10721_v44 = vld [vmem:[%s13851_s6 + $0x914] ss:$8 sps:$4 sm:$0xff]   ;;  %v10719_v39 = vld [vmem:[%s13851_s6 + $0x910] ss:$8 sps:$4 sm:$0xff]  }
 0x393   :  { %4918 = vmatprep.subr.bf16.mxu1 %v10670_v56  ;;  %v10716_v56 = vld [vmem:[%s13851_s6 + $0x4f0] ss:$8 sps:$4 sm:$0xff]  }
 0x394   :  { %9239 = vmatmul.mubr.msk.bf16.vlgmr.msra.gmra.mrb[168].mxu0 %vm3473_vm3, %v6357_v43  ;;  %v10727_v43 = vld [vmem:[%s13851_s6 + $0x924] ss:$8 sps:$4 sm:$0xff]  }
 0x395   :  { %6600 = vmatpush1.bf16.msra.mxu0 %v10665_v28  ;;  %6631 = vmatprep.mubr.bf16.mxu0 %v10984_v0  ;;  %v10724_v28 = vld [vmem:[%s13851_s6 + $0x544] ss:$8 sps:$4 sm:$0xff]  }
 0x396   :  { %6601 = vmatprep.subr.bf16.mxu0 %v10673_v63  ;;  %4919 = vmatpush1.bf16.msra.mxu1 %v10668_v37  ;;  %v10722_v37 = vld [vmem:[%s13851_s6 + $0x540] ss:$8 sps:$4 sm:$0xff]  }
 0x397   :  { %5110 = vmatprep.subr.bf16.mxu1 %v10676_v58 }
 0x399   :  { %6602 = vmatpush1.bf16.msra.mxu0 %v10671_v35  ;;  %8984 = vmatmul.mubr.msk.bf16.vlgmr.msra.gmra.mrb[100].mxu1 %vm3473_vm3, %v4868_v62  ;;  %v5264_v35 = vpack.c.b16 %v12428_v9, %v12428_v9  ;;  %v10725_v62 = vld [vmem:[%s13851_s6 + $0x920] ss:$8 sps:$4 sm:$0xff]   ;;  %v10728_v9 = vld [vmem:[%s13851_s6 + $0x550] ss:$8 sps:$4 sm:$0xff]  }
 0x39a   :  { %6603 = vmatprep.subr.bf16.mxu0 %v10679_v11  ;;  %5111 = vmatpush1.bf16.msra.mxu1 %v10674_v21  ;;  %v10730_v11 = vld [vmem:[%s13851_s6 + $0x554] ss:$8 sps:$4 sm:$0xff]  }
 0x39b   :  { %5142 = vmatprep.mubr.bf16.mxu1 %v10984_v0  ;;  %5112 = vmatprep.subr.bf16.mxu1 %v10682_v61 }
 0x39d   :  { %6604 = vmatpush1.bf16.msra.mxu0 %v10677_v50  ;;  %v10733_v50 = vld [vmem:[%s13851_s6 + $0x934] ss:$8 sps:$4 sm:$0xff]  }
 0x39e   :  { %6605 = vmatprep.subr.bf16.mxu0 %v10685_v32  ;;  %5113 = vmatpush1.bf16.msra.mxu1 %v10680_v15  ;;  %v10736_v32 = vld [vmem:[%s13851_s6 + $0x564] ss:$8 sps:$4 sm:$0xff]  }
 0x39f   :  { %5114 = vmatprep.subr.bf16.mxu1 %v10688_v6  ;;  %v10731_v6 = vld [vmem:[%s13851_s6 + $0x930] ss:$8 sps:$4 sm:$0xff]  }
 0x3a1   :  { %6606 = vmatpush1.bf16.msra.mxu0 %v10683_v2 }
 0x3a2   :  { %6797 = vmatprep.subr.bf16.mxu0 %v10691_v20  ;;  %5115 = vmatpush1.bf16.msra.mxu1 %v10686_v57  ;;  %v10739_v20 = vld [vmem:[%s13851_s6 + $0x984] ss:$8 sps:$4 sm:$0xff]  }
 0x3a3   :  { %5116 = vmatprep.subr.bf16.mxu1 %v10694_v46  ;;  %v10734_v46 = vld [vmem:[%s13851_s6 + $0x560] ss:$8 sps:$4 sm:$0xff]  }
 0x3a4   :  { %9273 = vmatmul.mubr.msk.bf16.vlgmr.msra.gmra.mrb[172].mxu0 %vm3473_vm3, %v6555_v30  ;;  %v10742_v30 = vld [vmem:[%s13851_s6 + $0x574] ss:$8 sps:$4 sm:$0xff]  }
 0x3a5   :  { %6798 = vmatpush1.bf16.msra.mxu0 %v10689_v53  ;;  %6829 = vmatprep.mubr.bf16.mxu0 %v10984_v0 }
 0x3a6   :  { %6799 = vmatprep.subr.bf16.mxu0 %v10697_v19  ;;  %5117 = vmatpush1.bf16.msra.mxu1 %v10692_v52  ;;  %v10737_v19 = vld [vmem:[%s13851_s6 + $0x980] ss:$8 sps:$4 sm:$0xff]   ;;  %v6953_v52 = vpack.c.b16 %v12436_v12, %v12436_v12  ;;  %v10743_v12 = vld [vmem:[%s13851_s6 + $0x990] ss:$8 sps:$4 sm:$0xff]  }
 0x3a7   :  { %5308 = vmatprep.subr.bf16.mxu1 %v10700_v33  ;;  %v10745_v33 = vld [vmem:[%s13851_s6 + $0x994] ss:$8 sps:$4 sm:$0xff]  }
 0x3a9   :  { %6800 = vmatpush1.bf16.msra.mxu0 %v10695_v55  ;;  %9018 = vmatmul.mubr.msk.bf16.vlgmr.msra.gmra.mrb[104].mxu1 %vm3473_vm3, %v5066_v3  ;;  %v10740_v55 = vld [vmem:[%s13851_s6 + $0x570] ss:$8 sps:$4 sm:$0xff]  }
 0x3aa   :  { %6801 = vmatprep.subr.bf16.mxu0 %v10703_v27  ;;  %5309 = vmatpush1.bf16.msra.mxu1 %v10698_v49  ;;  %v10748_v27 = vld [vmem:[%s13851_s6 + $0x5c4] ss:$8 sps:$4 sm:$0xff]  }
 0x3ab   :  { %5340 = vmatprep.mubr.bf16.mxu1 %v10984_v0  ;;  %5310 = vmatprep.subr.bf16.mxu1 %v10706_v29  ;;  %v10751_v49 = vld [vmem:[%s13851_s6 + $0x9a4] ss:$8 sps:$4 sm:$0xff]   ;;  %v10746_v29 = vld [vmem:[%s13851_s6 + $0x5c0] ss:$8 sps:$4 sm:$0xff]  }
 0x3ad   :  { %6802 = vmatpush1.bf16.msra.mxu0 %v10701_v48 }
 0x3ae   :  { %6803 = vmatprep.subr.bf16.mxu0 %v10709_v1  ;;  %5311 = vmatpush1.bf16.msra.mxu1 %v10704_v54  ;;  %v5465_v1 = vpack.c.b16 %v12440_v40, %v12440_v40  ;;  %v10754_v54 = vld [vmem:[%s13851_s6 + $0x5d4] ss:$8 sps:$4 sm:$0xff]   ;;  %v10752_v40 = vld [vmem:[%s13851_s6 + $0x5d0] ss:$8 sps:$4 sm:$0xff]  }
 0x3af   :  { %5312 = vmatprep.subr.bf16.mxu1 %v10712_v45 }
 0x3b1   :  { %6804 = vmatpush1.bf16.msra.mxu0 %v10707_v51  ;;  %v10749_v51 = vld [vmem:[%s13851_s6 + $0x9a0] ss:$8 sps:$4 sm:$0xff]  }
 0x3b2   :  { %6997 = vmatprep.subr.bf16.mxu0 %v10715_v36  ;;  %5313 = vmatpush1.bf16.msra.mxu1 %v10710_v42  ;;  %v10757_v42 = vld [vmem:[%s13851_s6 + $0x9b4] ss:$8 sps:$4 sm:$0xff]  }
 0x3b3   :  { %5314 = vmatprep.subr.bf16.mxu1 %v10718_v59  ;;  %v10760_v59 = vld [vmem:[%s13851_s6 + $0x5e4] ss:$8 sps:$4 sm:$0xff]  }
 0x3b4   :  { %9307 = vmatmul.mubr.msk.bf16.vlgmr.msra.gmra.mrb[176].mxu0 %vm3473_vm3, %v6753_v18  ;;  %v10755_v18 = vld [vmem:[%s13851_s6 + $0x9b0] ss:$8 sps:$4 sm:$0xff]  }
 0x3b5   :  { %6998 = vmatpush1.bf16.msra.mxu0 %v10713_v16  ;;  %7029 = vmatprep.mubr.bf16.mxu0 %v10984_v0 }
 0x3b6   :  { %6999 = vmatprep.subr.bf16.mxu0 %v10721_v44  ;;  %5315 = vmatpush1.bf16.msra.mxu1 %v10716_v56 }
 0x3b7   :  { %v13169_v63 = vpop.f32.mrb[124].mxu0  ;;  %5509 = vmatprep.subr.bf16.mxu1 %v10724_v28  ;;  %v10763_v28 = vld [vmem:[%s13851_s6 + $0xa04] ss:$8 sps:$4 sm:$0xff]  }
 0x3b8   :  { %v13174_v58 = vpop.f32.mrb[125].mxu0 }
 0x3b9   :  { %7000 = vmatpush1.bf16.msra.mxu0 %v10719_v39  ;;  %v4255_v21 = vpop.f32.mrb[126].mxu0  ;;  %9052 = vmatmul.mubr.msk.bf16.vlgmr.msra.gmra.mrb[108].mxu1 %vm3473_vm3, %v5264_v35 }
 0x3ba   :  { %v4256_v61 = vpop.f32.mrb[127].mxu0  ;;  %7001 = vmatprep.subr.bf16.mxu0 %v10727_v43  ;;  %5510 = vmatpush1.bf16.msra.mxu1 %v10722_v37  ;;  %v10758_v37 = vld [vmem:[%s13851_s6 + $0x5e0] ss:$8 sps:$4 sm:$0xff]  }
 0x3bb   :  { %5541 = vmatprep.mubr.bf16.mxu1 %v10984_v0  ;;  %5511 = vmatprep.subr.bf16.mxu1 %v10730_v11  ;;  %v10766_v11 = vld [vmem:[%s13851_s6 + $0x5f4] ss:$8 sps:$4 sm:$0xff]  }
 0x3bc   :  { %v3511_v15 = vpop.f32.mrb[56].mxu1 }
 0x3bd   :  { %7002 = vmatpush1.bf16.msra.mxu0 %v10725_v62  ;;  %v3513_v2 = vpop.f32.mrb[57].mxu1  ;;  %v10761_v62 = vld [vmem:[%s13851_s6 + $0xa00] ss:$8 sps:$4 sm:$0xff]  }
 0x3be   :  { %7003 = vmatprep.subr.bf16.mxu0 %v10733_v50  ;;  %5512 = vmatpush1.bf16.msra.mxu1 %v10728_v9  ;;  %v3515_v57 = vpop.f32.mrb[58].mxu1  ;;  %v7151_v50 = vpack.c.b16 %v12448_v47, %v12448_v47  ;;  %v10769_v9 = vld [vmem:[%s13851_s6 + $0xa14] ss:$8 sps:$4 sm:$0xff]   ;;  %v10767_v47 = vld [vmem:[%s13851_s6 + $0xa10] ss:$8 sps:$4 sm:$0xff]  }
 0x3bf   :  { %v3516_v53 = vpop.f32.mrb[59].mxu1  ;;  %5513 = vmatprep.subr.bf16.mxu1 %v10736_v32  ;;  %v10775_v32 = vld [vmem:[%s13851_s6 + $0xa24] ss:$8 sps:$4 sm:$0xff]   ;;  %v5662_v57 = vpack.c.b16 %v12467_v5, %v12467_v5  ;;  %v10781_v5 = vld [vmem:[%s13851_s6 + $0xa34] ss:$8 sps:$4 sm:$0xff]  }
 0x3c1   :  { %7004 = vmatpush1.bf16.msra.mxu0 %v10731_v6  ;;  %v10770_v6 = vld [vmem:[%s13851_s6 + $0x640] ss:$8 sps:$4 sm:$0xff]  }
 0x3c2   :  { %7195 = vmatprep.subr.bf16.mxu0 %v10739_v20  ;;  %5514 = vmatpush1.bf16.msra.mxu1 %v10734_v46  ;;  %v10778_v46 = vld [vmem:[%s13851_s6 + $0x654] ss:$8 sps:$4 sm:$0xff]  }
 0x3c3   :  { %5515 = vmatprep.subr.bf16.mxu1 %v10742_v30 }
 0x3c4   :  { %9341 = vmatmul.mubr.msk.bf16.vlgmr.msra.gmra.mrb[180].mxu0 %vm3473_vm3, %v6953_v52 }
 0x3c5   :  { %7196 = vmatpush1.bf16.msra.mxu0 %v10737_v19  ;;  %7227 = vmatprep.mubr.bf16.mxu0 %v10984_v0  ;;  %v10773_v19 = vld [vmem:[%s13851_s6 + $0xa20] ss:$8 sps:$4 sm:$0xff]  }
 0x3c6   :  { %7197 = vmatprep.subr.bf16.mxu0 %v10745_v33  ;;  %5516 = vmatpush1.bf16.msra.mxu1 %v10740_v55  ;;  %v10776_v33 = vld [vmem:[%s13851_s6 + $0x650] ss:$8 sps:$4 sm:$0xff]   ;;  %v10784_v55 = vld [vmem:[%s13851_s6 + $0x664] ss:$8 sps:$4 sm:$0xff]  }
 0x3c7   :  { %v13229_v3 = vpop.f32.mrb[128].mxu0  ;;  %5706 = vmatprep.subr.bf16.mxu1 %v10748_v27 }
 0x3c8   :  { %v13234_v48 = vpop.f32.mrb[129].mxu0 }
 0x3c9   :  { %v4453_v45 = vpop.f32.mrb[130].mxu0  ;;  %7198 = vmatpush1.bf16.msra.mxu0 %v10743_v12  ;;  %9086 = vmatmul.mubr.msk.bf16.vlgmr.msra.gmra.mrb[112].mxu1 %vm3473_vm3, %v5465_v1  ;;  %v10779_v12 = vld [vmem:[%s13851_s6 + $0xa30] ss:$8 sps:$4 sm:$0xff]  }
 0x3ca   :  { %v4454_v36 = vpop.f32.mrb[131].mxu0  ;;  %7199 = vmatprep.subr.bf16.mxu0 %v10751_v49  ;;  %5707 = vmatpush1.bf16.msra.mxu1 %v10746_v29  ;;  %v10787_v29 = vld [vmem:[%s13851_s6 + $0xa84] ss:$8 sps:$4 sm:$0xff]  }
 0x3cb   :  { %5738 = vmatprep.mubr.bf16.mxu1 %v10984_v0  ;;  %5708 = vmatprep.subr.bf16.mxu1 %v10754_v54  ;;  %v10782_v54 = vld [vmem:[%s13851_s6 + $0x660] ss:$8 sps:$4 sm:$0xff]  }
 0x3cc   :  { %v3598_v16 = vpop.f32.mrb[60].mxu1  ;;  %v10785_v36 = vld [vmem:[%s13851_s6 + $0xa80] ss:$8 sps:$4 sm:$0xff]  }
 0x3cd   :  { %7200 = vmatpush1.bf16.msra.mxu0 %v10749_v51  ;;  %v3599_v44 = vadd.f32 %v3598_v16, %v3511_v15  ;;  %v3600_v56 = vpop.f32.mrb[61].mxu1  ;;  %v10790_v51 = vld [vmem:[%s13851_s6 + $0x674] ss:$8 sps:$4 sm:$0xff]   ;;  %v10796_v16 = vld [vmem:[%s13851_s6 + $0x6c4] ss:$8 sps:$4 sm:$0xff]  }
 0x3ce   :  { %7201 = vmatprep.subr.bf16.mxu0 %v10757_v42  ;;  %v3601_v39 = vadd.f32 %v3600_v56, %v3513_v2  ;;  %v3602_v43 = vpop.f32.mrb[62].mxu1  ;;  %5709 = vmatpush1.bf16.msra.mxu1 %v10752_v40  ;;  %v7349_v42 = vpack.c.b16 %v12470_v22, %v12470_v22  ;;  %v10793_v40 = vld [vmem:[%s13851_s6 + $0xa94] ss:$8 sps:$4 sm:$0xff]   ;;  %v10791_v22 = vld [vmem:[%s13851_s6 + $0xa90] ss:$8 sps:$4 sm:$0xff]  }
 0x3cf   :  { %v3603_v35 = vpop.f32.mrb[63].mxu1  ;;  %5710 = vmatprep.subr.bf16.mxu1 %v10760_v59  ;;  %v4258_v21 = vadd.f32 %v13169_v63, %v3599_v44  ;;  %v10764_v63 = vld [vmem:[%s13851_s6 + $0x5f0] ss:$8 sps:$4 sm:$0xff]   ;;  %v10794_v56 = vld [vmem:[%s13851_s6 + $0x6c0] ss:$8 sps:$4 sm:$0xff]  }
 0x3d0   :  { %v4259_v61 = vadd.f32 %v13174_v58, %v3601_v39  ;;  %v10772_v58 = vld [vmem:[%s13851_s6 + $0x644] ss:$8 sps:$4 sm:$0xff]   ;;  %v10788_v59 = vld [vmem:[%s13851_s6 + $0x670] ss:$8 sps:$4 sm:$0xff]   ;;  %v5860_v39 = vpack.c.b16 %v12480_v7, %v12480_v7  ;;  %v10802_v43 = vld [vmem:[%s13851_s6 + $0x6d4] ss:$8 sps:$4 sm:$0xff]  }
 0x3d1   :  { %7202 = vmatpush1.bf16.msra.mxu0 %v10755_v18  ;;  %v10799_v18 = vld [vmem:[%s13851_s6 + $0xaa4] ss:$8 sps:$4 sm:$0xff]   ;;  %v10797_v35 = vld [vmem:[%s13851_s6 + $0xaa0] ss:$8 sps:$4 sm:$0xff]   ;;  %v10800_v7 = vld [vmem:[%s13851_s6 + $0x6d0] ss:$8 sps:$4 sm:$0xff]  }
 0x3d2   :  { %7393 = vmatprep.subr.bf16.mxu0 %v10763_v28  ;;  %5711 = vmatpush1.bf16.msra.mxu1 %v10758_v37 }
 0x3d3   :  { %5712 = vmatprep.subr.bf16.mxu1 %v10766_v11 }
 0x3d4   :  { %9375 = vmatmul.mubr.msk.bf16.vlgmr.msra.gmra.mrb[184].mxu0 %vm3473_vm3, %v7151_v50  ;;  %v10803_v50 = vld [vmem:[%s13851_s6 + $0xab0] ss:$8 sps:$4 sm:$0xff]  }
 0x3d5   :  { %7394 = vmatpush1.bf16.msra.mxu0 %v10761_v62  ;;  %7425 = vmatprep.mubr.bf16.mxu0 %v10984_v0  ;;  %v10808_v62 = vld [vmem:[%s13851_s6 + $0x6e4] ss:$8 sps:$4 sm:$0xff]  }
 0x3d6   :  { %7395 = vmatprep.subr.bf16.mxu0 %v10769_v9  ;;  %5713 = vmatpush1.bf16.msra.mxu1 %v10764_v63 }
 0x3d7   :  { %v4647_v15 = vpop.f32.mrb[132].mxu0  ;;  %5904 = vmatprep.subr.bf16.mxu1 %v10772_v58  ;;  %v10811_v58 = vld [vmem:[%s13851_s6 + $0xb04] ss:$8 sps:$4 sm:$0xff]  }
 0x3d8   :  { %v13294_v2 = vadd.f32 %v4647_v15, %v4258_v21  ;;  %v4649_v20 = vpop.f32.mrb[133].mxu0  ;;  %v10805_v21 = vld [vmem:[%s13851_s6 + $0xab4] ss:$8 sps:$4 sm:$0xff]   ;;  %v10806_v15 = vld [vmem:[%s13851_s6 + $0x6e0] ss:$8 sps:$4 sm:$0xff]  }
 0x3d9   :  { %v13301_v53 = vadd.f32 %v4649_v20, %v4259_v61  ;;  %v4651_v30 = vpop.f32.mrb[134].mxu0  ;;  %7396 = vmatpush1.bf16.msra.mxu0 %v10767_v47  ;;  %9120 = vmatmul.mubr.msk.bf16.vlgmr.msra.gmra.mrb[116].mxu1 %vm3473_vm3, %v5662_v57  ;;  %v10814_v20 = vld [vmem:[%s13851_s6 + $0x6f4] ss:$8 sps:$4 sm:$0xff]   ;;  %v10809_v57 = vld [vmem:[%s13851_s6 + $0xb00] ss:$8 sps:$4 sm:$0xff]  }
 0x3da   :  { %v4652_v52 = vpop.f32.mrb[135].mxu0  ;;  %7397 = vmatprep.subr.bf16.mxu0 %v10775_v32  ;;  %5905 = vmatpush1.bf16.msra.mxu1 %v10770_v6  ;;  %v10817_v30 = vld [vmem:[%s13851_s6 + $0xb14] ss:$8 sps:$4 sm:$0xff]  }
 0x3db   :  { %5936 = vmatprep.mubr.bf16.mxu1 %v10984_v0  ;;  %5906 = vmatprep.subr.bf16.mxu1 %v10778_v46  ;;  %v7550_v46 = vpack.c.b16 %v12486_v4, %v12486_v4  ;;  %v10820_v52 = vld [vmem:[%s13851_s6 + $0x744] ss:$8 sps:$4 sm:$0xff]   ;;  %v10815_v4 = vld [vmem:[%s13851_s6 + $0xb10] ss:$8 sps:$4 sm:$0xff]  }
 0x3dc   :  { %v3695_v27 = vpop.f32.mrb[64].mxu1 }
 0x3dd   :  { %7398 = vmatpush1.bf16.msra.mxu0 %v10773_v19  ;;  %v3697_v49 = vpop.f32.mrb[65].mxu1  ;;  %v10812_v19 = vld [vmem:[%s13851_s6 + $0x6f0] ss:$8 sps:$4 sm:$0xff]  }
 0x3de   :  { %7399 = vmatprep.subr.bf16.mxu0 %v10781_v5  ;;  %v3699_v1 = vpop.f32.mrb[66].mxu1  ;;  %5907 = vmatpush1.bf16.msra.mxu1 %v10776_v33  ;;  %v10823_v5 = vld [vmem:[%s13851_s6 + $0xb24] ss:$8 sps:$4 sm:$0xff]  }
 0x3df   :  { %v3700_v45 = vpop.f32.mrb[67].mxu1  ;;  %5908 = vmatprep.subr.bf16.mxu1 %v10784_v55  ;;  %v10818_v55 = vld [vmem:[%s13851_s6 + $0x740] ss:$8 sps:$4 sm:$0xff]  }
 0x3e0   :  { %v10821_v45 = vld [vmem:[%s13851_s6 + $0xb20] ss:$8 sps:$4 sm:$0xff]  }
 0x3e1   :  { %7400 = vmatpush1.bf16.msra.mxu0 %v10779_v12 }
 0x3e2   :  { %7594 = vmatprep.subr.bf16.mxu0 %v10787_v29  ;;  %5909 = vmatpush1.bf16.msra.mxu1 %v10782_v54  ;;  %v10826_v29 = vld [vmem:[%s13851_s6 + $0x754] ss:$8 sps:$4 sm:$0xff]  }
 0x3e3   :  { %5910 = vmatprep.subr.bf16.mxu1 %v10790_v51  ;;  %v10832_v51 = vld [vmem:[%s13851_s6 + $0x764] ss:$8 sps:$4 sm:$0xff]  }
 0x3e4   :  { %9409 = vmatmul.mubr.msk.bf16.vlgmr.msra.gmra.mrb[188].mxu0 %vm3473_vm3, %v7349_v42  ;;  %v10827_v42 = vld [vmem:[%s13851_s6 + $0xb30] ss:$8 sps:$4 sm:$0xff]  }
 0x3e5   :  { %7595 = vmatpush1.bf16.msra.mxu0 %v10785_v36  ;;  %7626 = vmatprep.mubr.bf16.mxu0 %v10984_v0 }
 0x3e6   :  { %7596 = vmatprep.subr.bf16.mxu0 %v10793_v40  ;;  %5911 = vmatpush1.bf16.msra.mxu1 %v10788_v59  ;;  %v10835_v59 = vld [vmem:[%s13851_s6 + $0xb84] ss:$8 sps:$4 sm:$0xff]  }
 0x3e7   :  { %v13351_v44 = vpop.f32.mrb[136].mxu0  ;;  %6102 = vmatprep.subr.bf16.mxu1 %v10796_v16 }
 0x3e8   :  { %v13356_v28 = vpop.f32.mrb[137].mxu0 }
 0x3e9   :  { %v4852_v37 = vpop.f32.mrb[138].mxu0  ;;  %7597 = vmatpush1.bf16.msra.mxu0 %v10791_v22  ;;  %9154 = vmatmul.mubr.msk.bf16.vlgmr.msra.gmra.mrb[120].mxu1 %vm3473_vm3, %v5860_v39  ;;  %v10830_v22 = vld [vmem:[%s13851_s6 + $0x760] ss:$8 sps:$4 sm:$0xff]  }
 0x3ea   :  { %v4853_v11 = vpop.f32.mrb[139].mxu0  ;;  %7598 = vmatprep.subr.bf16.mxu0 %v10799_v18  ;;  %6103 = vmatpush1.bf16.msra.mxu1 %v10794_v56  ;;  %v10838_v56 = vld [vmem:[%s13851_s6 + $0x774] ss:$8 sps:$4 sm:$0xff]   ;;  %v10833_v39 = vld [vmem:[%s13851_s6 + $0xb80] ss:$8 sps:$4 sm:$0xff]  }
 0x3eb   :  { %6134 = vmatprep.mubr.bf16.mxu1 %v10984_v0  ;;  %6104 = vmatprep.subr.bf16.mxu1 %v10802_v43  ;;  %v7747_v43 = vpack.c.b16 %v12503_v60, %v12503_v60  ;;  %v10841_v37 = vld [vmem:[%s13851_s6 + $0xb94] ss:$8 sps:$4 sm:$0xff]   ;;  %v10844_v11 = vld [vmem:[%s13851_s6 + $0x7c4] ss:$8 sps:$4 sm:$0xff]   ;;  %v10839_v60 = vld [vmem:[%s13851_s6 + $0xb90] ss:$8 sps:$4 sm:$0xff]  }
 0x3ec   :  { %v3782_v61 = vpop.f32.mrb[68].mxu1 }
 0x3ed   :  { %7599 = vmatpush1.bf16.msra.mxu0 %v10797_v35  ;;  %v13380_v9 = vadd.f32 %v3782_v61, %v3695_v27  ;;  %v3784_v63 = vpop.f32.mrb[69].mxu1  ;;  %v10836_v35 = vld [vmem:[%s13851_s6 + $0x770] ss:$8 sps:$4 sm:$0xff]  }
 0x3ee   :  { %7600 = vmatprep.subr.bf16.mxu0 %v10805_v21  ;;  %v13385_v47 = vadd.f32 %v3784_v63, %v3697_v49  ;;  %v3786_v32 = vpop.f32.mrb[70].mxu1  ;;  %6105 = vmatpush1.bf16.msra.mxu1 %v10800_v7  ;;  %v6058_v49 = vpack.c.b16 %v12497_v17, %v12497_v17  ;;  %v10829_v17 = vld [vmem:[%s13851_s6 + $0xb34] ss:$8 sps:$4 sm:$0xff]   ;;  %v10847_v21 = vld [vmem:[%s13851_s6 + $0xba4] ss:$8 sps:$4 sm:$0xff]  }
 0x3ef   :  { %v3787_v6 = vpop.f32.mrb[71].mxu1  ;;  %6106 = vmatprep.subr.bf16.mxu1 %v10808_v62  ;;  %v10842_v62 = vld [vmem:[%s13851_s6 + $0x7c0] ss:$8 sps:$4 sm:$0xff]   ;;  %v10850_v63 = vld [vmem:[%s13851_s6 + $0x7d4] ss:$8 sps:$4 sm:$0xff]  }
 0x3f0   :  { %v10845_v32 = vld [vmem:[%s13851_s6 + $0xba0] ss:$8 sps:$4 sm:$0xff]   ;;  %v10853_v6 = vld [vmem:[%s13851_s6 + $0xbb4] ss:$8 sps:$4 sm:$0xff]  }
 0x3f1   :  { %7601 = vmatpush1.bf16.msra.mxu0 %v10803_v50  ;;  %v6258_v50 = vpack.c.b16 %v12509_v24, %v12509_v24  ;;  %v10848_v24 = vld [vmem:[%s13851_s6 + $0x7d0] ss:$8 sps:$4 sm:$0xff]  }
 0x3f2   :  { %7791 = vmatprep.subr.bf16.mxu0 %v10811_v58  ;;  %6107 = vmatpush1.bf16.msra.mxu1 %v10806_v15 }
 0x3f3   :  { %6108 = vmatprep.subr.bf16.mxu1 %v10814_v20  ;;  %v10856_v20 = vld [vmem:[%s13851_s6 + $0x7e4] ss:$8 sps:$4 sm:$0xff]  }
 0x3f4   :  { %9443 = vmatmul.mubr.msk.bf16.vlgmr.msra.gmra.mrb[192].mxu0 %vm3473_vm3, %v7550_v46  ;;  %v10851_v46 = vld [vmem:[%s13851_s6 + $0xbb0] ss:$8 sps:$4 sm:$0xff]  }
 0x3f5   :  { %7792 = vmatpush1.bf16.msra.mxu0 %v10809_v57  ;;  %7823 = vmatprep.mubr.bf16.mxu0 %v10984_v0 }
 0x3f6   :  { %7793 = vmatprep.subr.bf16.mxu0 %v10817_v30  ;;  %6109 = vmatpush1.bf16.msra.mxu1 %v10812_v19 }
 0x3f7   :  { %v5045_v33 = vpop.f32.mrb[140].mxu0  ;;  %6302 = vmatprep.subr.bf16.mxu1 %v10820_v52  ;;  %v10859_v52 = vld [vmem:[%s13851_s6 + $0xc04] ss:$8 sps:$4 sm:$0xff]  }
 0x3f8   :  { %v13419_v27 = vadd.f32 %v5045_v33, %v13294_v2  ;;  %v5047_v12 = vpop.f32.mrb[141].mxu0  ;;  %v10854_v33 = vld [vmem:[%s13851_s6 + $0x7e0] ss:$8 sps:$4 sm:$0xff]  }
 0x3f9   :  { %v13427_v1 = vadd.f32 %v5047_v12, %v13301_v53  ;;  %v5049_v54 = vpop.f32.mrb[142].mxu0  ;;  %7794 = vmatpush1.bf16.msra.mxu0 %v10815_v4  ;;  %9188 = vmatmul.mubr.msk.bf16.vlgmr.msra.gmra.mrb[124].mxu1 %vm3473_vm3, %v6058_v49  ;;  %v10824_v53 = vld [vmem:[%s13851_s6 + $0x750] ss:$8 sps:$4 sm:$0xff]   ;;  %v10862_v49 = vld [vmem:[%s13851_s6 + $0x7f4] ss:$8 sps:$4 sm:$0xff]  }
 0x3fa   :  { %v5050_v2 = vpop.f32.mrb[143].mxu0  ;;  %7795 = vmatprep.subr.bf16.mxu0 %v10823_v5  ;;  %6303 = vmatpush1.bf16.msra.mxu1 %v10818_v55  ;;  %v10857_v54 = vld [vmem:[%s13851_s6 + $0xc00] ss:$8 sps:$4 sm:$0xff]  }
 0x3fb   :  { %6334 = vmatprep.mubr.bf16.mxu1 %v10984_v0  ;;  %6304 = vmatprep.subr.bf16.mxu1 %v10826_v29 }
 0x3fc   :  { %v3879_v36 = vpop.f32.mrb[72].mxu1 }
 0x3fd   :  { %7796 = vmatpush1.bf16.msra.mxu0 %v10821_v45  ;;  %v3881_v40 = vpop.f32.mrb[73].mxu1  ;;  %v7945_v45 = vpack.c.b16 %v12518_v38, %v12518_v38  ;;  %v10868_v38 = vld [vmem:[%s13851_s6 + $0x844] ss:$8 sps:$4 sm:$0xff]  }
 0x3fe   :  { %7797 = vmatprep.subr.bf16.mxu0 %v10829_v17  ;;  %v3883_v16 = vpop.f32.mrb[74].mxu1  ;;  %6305 = vmatpush1.bf16.msra.mxu1 %v10824_v53 }
 0x3ff   :  { %v3884_v18 = vpop.f32.mrb[75].mxu1  ;;  %6306 = vmatprep.subr.bf16.mxu1 %v10832_v51  ;;  %v6456_v16 = vpack.c.b16 %v12533_v34, %v12533_v34  ;;  %v10877_v34 = vld [vmem:[%s13851_s6 + $0xc34] ss:$8 sps:$4 sm:$0xff]  }
 0x401   :  { %7798 = vmatpush1.bf16.msra.mxu0 %v10827_v42  ;;  %v10866_v42 = vld [vmem:[%s13851_s6 + $0x840] ss:$8 sps:$4 sm:$0xff]  }
 0x402   :  { %7989 = vmatprep.subr.bf16.mxu0 %v10835_v59  ;;  %6307 = vmatpush1.bf16.msra.mxu1 %v10830_v22  ;;  %v10874_v22 = vld [vmem:[%s13851_s6 + $0x854] ss:$8 sps:$4 sm:$0xff]  }
 0x403   :  { %6308 = vmatprep.subr.bf16.mxu1 %v10838_v56 }
 0x404   :  { %9477 = vmatmul.mubr.msk.bf16.vlgmr.msra.gmra.mrb[196].mxu0 %vm3473_vm3, %v7747_v43  ;;  %v10880_v43 = vld [vmem:[%s13851_s6 + $0x864] ss:$8 sps:$4 sm:$0xff]  }
 0x405   :  { %7990 = vmatpush1.bf16.msra.mxu0 %v10833_v39  ;;  %8021 = vmatprep.mubr.bf16.mxu0 %v10984_v0  ;;  %v10869_v39 = vld [vmem:[%s13851_s6 + $0xc20] ss:$8 sps:$4 sm:$0xff]  }
 0x406   :  { %7991 = vmatprep.subr.bf16.mxu0 %v10841_v37  ;;  %6309 = vmatpush1.bf16.msra.mxu1 %v10836_v35  ;;  %v10875_v35 = vld [vmem:[%s13851_s6 + $0xc30] ss:$8 sps:$4 sm:$0xff]  }
 0x407   :  { %v5243_v7 = vpop.f32.mrb[144].mxu0  ;;  %6500 = vmatprep.subr.bf16.mxu1 %v10844_v11 }
 0x408   :  { %v5245_v61 = vpop.f32.mrb[145].mxu0 }
 0x409   :  { %v5247_v58 = vpop.f32.mrb[146].mxu0  ;;  %7992 = vmatpush1.bf16.msra.mxu0 %v10839_v60  ;;  %9222 = vmatmul.mubr.msk.bf16.vlgmr.msra.gmra.mrb[128].mxu1 %vm3473_vm3, %v6258_v50  ;;  %v10881_v50 = vld [vmem:[%s13851_s6 + $0x870] ss:$8 sps:$4 sm:$0xff]  }
 0x40a   :  { %v5248_v15 = vpop.f32.mrb[147].mxu0  ;;  %7993 = vmatprep.subr.bf16.mxu0 %v10847_v21  ;;  %6501 = vmatpush1.bf16.msra.mxu1 %v10842_v62  ;;  %v10878_v21 = vld [vmem:[%s13851_s6 + $0x860] ss:$8 sps:$4 sm:$0xff]   ;;  %v10883_v62 = vld [vmem:[%s13851_s6 + $0x874] ss:$8 sps:$4 sm:$0xff]  }
 0x40b   :  { %6532 = vmatprep.mubr.bf16.mxu1 %v10984_v0  ;;  %6502 = vmatprep.subr.bf16.mxu1 %v10850_v63  ;;  %v10886_v63 = vld [vmem:[%s13851_s6 + $0x8c4] ss:$8 sps:$4 sm:$0xff]  }
 0x40c   :  { %v3967_v57 = vpop.f32.mrb[76].mxu1 }
 0x40d   :  { %7994 = vmatpush1.bf16.msra.mxu0 %v10845_v32  ;;  %v3968_v30 = vadd.f32 %v3967_v57, %v3879_v36  ;;  %v3969_v19 = vpop.f32.mrb[77].mxu1  ;;  %v10884_v32 = vld [vmem:[%s13851_s6 + $0x8c0] ss:$8 sps:$4 sm:$0xff]  }
 0x40e   :  { %7995 = vmatprep.subr.bf16.mxu0 %v10853_v6  ;;  %v3970_v4 = vadd.f32 %v3969_v19, %v3881_v40  ;;  %v3971_v5 = vpop.f32.mrb[78].mxu1  ;;  %6503 = vmatpush1.bf16.msra.mxu1 %v10848_v24  ;;  %v6654_v6 = vpack.c.b16 %v12547_v14, %v12547_v14  ;;  %v10889_v24 = vld [vmem:[%s13851_s6 + $0x8d4] ss:$8 sps:$4 sm:$0xff]   ;;  %v10892_v14 = vld [vmem:[%s13851_s6 + $0x8e4] ss:$8 sps:$4 sm:$0xff]  }
 0x40f   :  { %v4456_v55 = vadd.f32 %v13229_v3, %v3968_v30  ;;  %v3972_v12 = vpop.f32.mrb[79].mxu1  ;;  %6504 = vmatprep.subr.bf16.mxu1 %v10856_v20  ;;  %v10865_v3 = vld [vmem:[%s13851_s6 + $0xc14] ss:$8 sps:$4 sm:$0xff]   ;;  %v10887_v30 = vld [vmem:[%s13851_s6 + $0x8d0] ss:$8 sps:$4 sm:$0xff]  }
 0x410   :  { %v4457_v29 = vadd.f32 %v13234_v48, %v3970_v4  ;;  %v10860_v48 = vld [vmem:[%s13851_s6 + $0x7f0] ss:$8 sps:$4 sm:$0xff]  }
 0x411   :  { %7996 = vmatpush1.bf16.msra.mxu0 %v10851_v46  ;;  %v4855_v2 = vadd.f32 %v13351_v44, %v4456_v55  ;;  %v10863_v44 = vld [vmem:[%s13851_s6 + $0xc10] ss:$8 sps:$4 sm:$0xff]   ;;  %v10890_v55 = vld [vmem:[%s13851_s6 + $0x8e0] ss:$8 sps:$4 sm:$0xff]  }
 0x412   :  { %8187 = vmatprep.subr.bf16.mxu0 %v10859_v52  ;;  %6505 = vmatpush1.bf16.msra.mxu1 %v10854_v33  ;;  %v4856_v17 = vadd.f32 %v13356_v28, %v4457_v29  ;;  %v10871_v28 = vld [vmem:[%s13851_s6 + $0xc24] ss:$8 sps:$4 sm:$0xff]   ;;  %v10893_v29 = vld [vmem:[%s13851_s6 + $0x8f0] ss:$8 sps:$4 sm:$0xff]  }
 0x413   :  { %6506 = vmatprep.subr.bf16.mxu1 %v10862_v49  ;;  %v5250_v53 = vadd.f32 %v5243_v7, %v4855_v2  ;;  %v10895_v49 = vld [vmem:[%s13851_s6 + $0x8f4] ss:$8 sps:$4 sm:$0xff]  }
 0x414   :  { %9511 = vmatmul.mubr.msk.bf16.vlgmr.msra.gmra.mrb[200].mxu0 %vm3473_vm3, %v7945_v45  ;;  %v5251_v51 = vadd.f32 %v5245_v61, %v4856_v17  ;;  %v8143_v61 = vpack.c.b16 %v12539_v31, %v12539_v31  ;;  %v6855_v17 = vpack.c.b16 %v12551_v26, %v12551_v26  ;;  %v10904_v26 = vld [vmem:[%s13851_s6 + $0x964] ss:$8 sps:$4 sm:$0xff]  }
 0x415   :  { %8188 = vmatpush1.bf16.msra.mxu0 %v10857_v54  ;;  %8219 = vmatprep.mubr.bf16.mxu0 %v10984_v0  ;;  %v10898_v54 = vld [vmem:[%s13851_s6 + $0x944] ss:$8 sps:$4 sm:$0xff]  }
 0x416   :  { %8189 = vmatprep.subr.bf16.mxu0 %v10865_v3  ;;  %6507 = vmatpush1.bf16.msra.mxu1 %v10860_v48  ;;  %v10896_v3 = vld [vmem:[%s13851_s6 + $0x940] ss:$8 sps:$4 sm:$0xff]  }
 0x417   :  { %v5441_v36 = vpop.f32.mrb[148].mxu0  ;;  %6698 = vmatprep.subr.bf16.mxu1 %v10868_v38  ;;  %v10901_v38 = vld [vmem:[%s13851_s6 + $0x954] ss:$8 sps:$4 sm:$0xff]  }
 0x418   :  { %v13541_v40 = vadd.f32 %v5441_v36, %v13419_v27  ;;  %v5443_v59 = vpop.f32.mrb[149].mxu0 }
 0x419   :  { %v13549_v18 = vadd.f32 %v5443_v59, %v13427_v1  ;;  %v5445_v56 = vpop.f32.mrb[150].mxu0  ;;  %8190 = vmatpush1.bf16.msra.mxu0 %v10863_v44  ;;  %9256 = vmatmul.mubr.msk.bf16.vlgmr.msra.gmra.mrb[132].mxu1 %vm3473_vm3, %v6456_v16  ;;  %v10872_v1 = vld [vmem:[%s13851_s6 + $0x850] ss:$8 sps:$4 sm:$0xff]  }
 0x41a   :  { %v5446_v27 = vpop.f32.mrb[151].mxu0  ;;  %8191 = vmatprep.subr.bf16.mxu0 %v10871_v28  ;;  %6699 = vmatpush1.bf16.msra.mxu1 %v10866_v42  ;;  %v10899_v28 = vld [vmem:[%s13851_s6 + $0x950] ss:$8 sps:$4 sm:$0xff]   ;;  %v10907_v56 = vld [vmem:[%s13851_s6 + $0x974] ss:$8 sps:$4 sm:$0xff]  }
 0x41b   :  { %6730 = vmatprep.mubr.bf16.mxu1 %v10984_v0  ;;  %6700 = vmatprep.subr.bf16.mxu1 %v10874_v22  ;;  %v10902_v22 = vld [vmem:[%s13851_s6 + $0x960] ss:$8 sps:$4 sm:$0xff]  }
 0x41c   :  { %v4067_v37 = vpop.f32.mrb[80].mxu1  ;;  %v10908_v27 = vld [vmem:[%s13851_s6 + $0x9c0] ss:$8 sps:$4 sm:$0xff]  }
 0x41d   :  { %8192 = vmatpush1.bf16.msra.mxu0 %v10869_v39  ;;  %v4069_v11 = vpop.f32.mrb[81].mxu1 }
 0x41e   :  { %8193 = vmatprep.subr.bf16.mxu0 %v10877_v34  ;;  %v4071_v60 = vpop.f32.mrb[82].mxu1  ;;  %6701 = vmatpush1.bf16.msra.mxu1 %v10872_v1 }
 0x41f   :  { %v4072_v7 = vpop.f32.mrb[83].mxu1  ;;  %6702 = vmatprep.subr.bf16.mxu1 %v10880_v43  ;;  %v7052_v43 = vpack.c.b16 %v12565_v13, %v12565_v13  ;;  %v10916_v13 = vld [vmem:[%s13851_s6 + $0x9e4] ss:$8 sps:$4 sm:$0xff]  }
 0x421   :  { %8194 = vmatpush1.bf16.msra.mxu0 %v10875_v35 }
 0x422   :  { %6703 = vmatpush1.bf16.msra.mxu1 %v10878_v21  ;;  %v10911_v21 = vld [vmem:[%s13851_s6 + $0x9d0] ss:$8 sps:$4 sm:$0xff]  }
 0x423   :  { %6704 = vmatprep.subr.bf16.mxu1 %v10883_v62 }
 0x424   :  { %9545 = vmatmul.mubr.msk.bf16.vlgmr.msra.gmra.mrb[204].mxu0 %vm3473_vm3, %v8143_v61 }
 0x426   :  { %6705 = vmatpush1.bf16.msra.mxu1 %v10881_v50 }
 0x427   :  { %v5641_v58 = vpop.f32.mrb[152].mxu0  ;;  %6899 = vmatprep.subr.bf16.mxu1 %v10886_v63 }
 0x428   :  { %v5648_v15 = vadd.f32 %v5641_v58, %v5250_v53  ;;  %v5643_v31 = vpop.f32.mrb[153].mxu0  ;;  %v10914_v58 = vld [vmem:[%s13851_s6 + $0x9e0] ss:$8 sps:$4 sm:$0xff]  }
 0x429   :  { %v5649_v20 = vadd.f32 %v5643_v31, %v5251_v51  ;;  %v5645_v57 = vpop.f32.mrb[154].mxu0  ;;  %9290 = vmatmul.mubr.msk.bf16.vlgmr.msra.gmra.mrb[136].mxu1 %vm3473_vm3, %v6654_v6  ;;  %v10917_v31 = vld [vmem:[%s13851_s6 + $0x9f0] ss:$8 sps:$4 sm:$0xff]   ;;  %v10922_v6 = vld [vmem:[%s13851_s6 + $0xa44] ss:$8 sps:$4 sm:$0xff]  }
 0x42a   :  { %v5646_v46 = vpop.f32.mrb[155].mxu0  ;;  %6900 = vmatpush1.bf16.msra.mxu1 %v10884_v32  ;;  %6931 = vmatprep.mubr.bf16.mxu1 %v10984_v0 }
 0x42b   :  { %6901 = vmatprep.subr.bf16.mxu1 %v10889_v24 }
 0x42c   :  { %v4155_v19 = vpop.f32.mrb[84].mxu1 }
 0x42d   :  { %v4156_v52 = vadd.f32 %v4155_v19, %v4067_v37  ;;  %v4157_v4 = vpop.f32.mrb[85].mxu1  ;;  %v10913_v37 = vld [vmem:[%s13851_s6 + $0x9d4] ss:$8 sps:$4 sm:$0xff]  }
 0x42e   :  { %v4158_v5 = vadd.f32 %v4157_v4, %v4069_v11  ;;  %v4159_v33 = vpop.f32.mrb[86].mxu1  ;;  %6902 = vmatpush1.bf16.msra.mxu1 %v10887_v30  ;;  %v7250_v30 = vpack.c.b16 %v12571_v41, %v12571_v41  ;;  %v10928_v41 = vld [vmem:[%s13851_s6 + $0xa64] ss:$8 sps:$4 sm:$0xff]  }
 0x42f   :  { %v4160_v12 = vpop.f32.mrb[87].mxu1  ;;  %6903 = vmatprep.subr.bf16.mxu1 %v10892_v14  ;;  %v10925_v14 = vld [vmem:[%s13851_s6 + $0xa54] ss:$8 sps:$4 sm:$0xff]  }
 0x432   :  { %6904 = vmatpush1.bf16.msra.mxu1 %v10890_v55 }
 0x433   :  { %6905 = vmatprep.subr.bf16.mxu1 %v10895_v49 }
 0x436   :  { %6906 = vmatpush1.bf16.msra.mxu1 %v10893_v29 }
 0x437   :  { %v5839_v45 = vpop.f32.mrb[156].mxu0  ;;  %7096 = vmatprep.subr.bf16.mxu1 %v10898_v54  ;;  %v10926_v54 = vld [vmem:[%s13851_s6 + $0xa60] ss:$8 sps:$4 sm:$0xff]  }
 0x438   :  { %v5846_v2 = vadd.f32 %v5839_v45, %v13541_v40  ;;  %v5841_v48 = vpop.f32.mrb[157].mxu0 }
 0x439   :  { %v5847_v53 = vadd.f32 %v5841_v48, %v13549_v18  ;;  %v5843_v44 = vpop.f32.mrb[158].mxu0  ;;  %9324 = vmatmul.mubr.msk.bf16.vlgmr.msra.gmra.mrb[140].mxu1 %vm3473_vm3, %v6855_v17  ;;  %v10934_v48 = vld [vmem:[%s13851_s6 + $0xac4] ss:$8 sps:$4 sm:$0xff]  }
 0x43a   :  { %v5844_v51 = vpop.f32.mrb[159].mxu0  ;;  %7097 = vmatpush1.bf16.msra.mxu1 %v10896_v3  ;;  %7128 = vmatprep.mubr.bf16.mxu1 %v10984_v0  ;;  %v10931_v3 = vld [vmem:[%s13851_s6 + $0xa74] ss:$8 sps:$4 sm:$0xff]  }
 0x43b   :  { %7098 = vmatprep.subr.bf16.mxu1 %v10901_v38  ;;  %v10932_v38 = vld [vmem:[%s13851_s6 + $0xac0] ss:$8 sps:$4 sm:$0xff]   ;;  %v7448_v51 = vpack.c.b16 %v12584_v10, %v12584_v10  ;;  %v10940_v10 = vld [vmem:[%s13851_s6 + $0xae4] ss:$8 sps:$4 sm:$0xff]  }
 0x43c   :  { %v4350_v36 = vpop.f32.mrb[88].mxu1 }
 0x43d   :  { %v4357_v42 = vadd.f32 %v4350_v36, %v13380_v9  ;;  %v4352_v40 = vpop.f32.mrb[89].mxu1  ;;  %v10905_v9 = vld [vmem:[%s13851_s6 + $0x970] ss:$8 sps:$4 sm:$0xff]  }
 0x43e   :  { %v4358_v59 = vadd.f32 %v4352_v40, %v13385_v47  ;;  %v4354_v16 = vpop.f32.mrb[90].mxu1  ;;  %7099 = vmatpush1.bf16.msra.mxu1 %v10899_v28  ;;  %v10910_v47 = vld [vmem:[%s13851_s6 + $0x9c4] ss:$8 sps:$4 sm:$0xff]   ;;  %v10937_v28 = vld [vmem:[%s13851_s6 + $0xad4] ss:$8 sps:$4 sm:$0xff]  }
 0x43f   :  { %v4355_v18 = vpop.f32.mrb[91].mxu1  ;;  %7100 = vmatprep.subr.bf16.mxu1 %v10904_v26  ;;  %v10935_v40 = vld [vmem:[%s13851_s6 + $0xad0] ss:$8 sps:$4 sm:$0xff]  }
 0x442   :  { %7101 = vmatpush1.bf16.msra.mxu1 %v10902_v22 }
 0x443   :  { %7102 = vmatprep.subr.bf16.mxu1 %v10907_v56 }
 0x446   :  { %7103 = vmatpush1.bf16.msra.mxu1 %v10905_v9  ;;  %v10938_v9 = vld [vmem:[%s13851_s6 + $0xae0] ss:$8 sps:$4 sm:$0xff]  }
 0x447   :  { %v6037_v39 = vpop.f32.mrb[160].mxu0  ;;  %7294 = vmatprep.subr.bf16.mxu1 %v10910_v47 }
 0x448   :  { %v6044_v34 = vadd.f32 %v6037_v39, %v5648_v15  ;;  %v6039_v1 = vpop.f32.mrb[161].mxu0  ;;  %v10919_v15 = vld [vmem:[%s13851_s6 + $0x9f4] ss:$8 sps:$4 sm:$0xff]  }
 0x449   :  { %v6045_v35 = vadd.f32 %v6039_v1, %v5649_v20  ;;  %v6041_v11 = vpop.f32.mrb[162].mxu0  ;;  %9358 = vmatmul.mubr.msk.bf16.vlgmr.msra.gmra.mrb[144].mxu1 %vm3473_vm3, %v7052_v43  ;;  %v10920_v20 = vld [vmem:[%s13851_s6 + $0xa40] ss:$8 sps:$4 sm:$0xff]   ;;  %v10943_v39 = vld [vmem:[%s13851_s6 + $0xaf4] ss:$8 sps:$4 sm:$0xff]  }
 0x44a   :  { %v6042_v60 = vpop.f32.mrb[163].mxu0  ;;  %7295 = vmatpush1.bf16.msra.mxu1 %v10908_v27  ;;  %7326 = vmatprep.mubr.bf16.mxu1 %v10984_v0  ;;  %v10941_v27 = vld [vmem:[%s13851_s6 + $0xaf0] ss:$8 sps:$4 sm:$0xff]   ;;  %v10944_v43 = vld [vmem:[%s13851_s6 + $0xb40] ss:$8 sps:$4 sm:$0xff]   ;;  %v7648_v11 = vpack.c.b16 %v12588_v8, %v12588_v8 }
 0x44b   :  { %7296 = vmatprep.subr.bf16.mxu1 %v10913_v37  ;;  %v10949_v60 = vld [vmem:[%s13851_s6 + $0xb54] ss:$8 sps:$4 sm:$0xff]   ;;  %v10952_v8 = vld [vmem:[%s13851_s6 + $0xb64] ss:$8 sps:$4 sm:$0xff]  }
 0x44c   :  { %v4548_v7 = vpop.f32.mrb[92].mxu1 }
 0x44d   :  { %v4555_v62 = vadd.f32 %v4548_v7, %v4156_v52  ;;  %v4550_v61 = vpop.f32.mrb[93].mxu1 }
 0x44e   :  { %v4556_v50 = vadd.f32 %v4550_v61, %v4158_v5  ;;  %v4552_v63 = vpop.f32.mrb[94].mxu1  ;;  %7297 = vmatpush1.bf16.msra.mxu1 %v10911_v21  ;;  %v10923_v5 = vld [vmem:[%s13851_s6 + $0xa50] ss:$8 sps:$4 sm:$0xff]  }
 0x44f   :  { %v4553_v32 = vpop.f32.mrb[95].mxu1  ;;  %7298 = vmatprep.subr.bf16.mxu1 %v10916_v13 }
 0x452   :  { %7299 = vmatpush1.bf16.msra.mxu1 %v10914_v58 }
 0x453   :  { %7300 = vmatprep.subr.bf16.mxu1 %v10919_v15  ;;  %v10950_v15 = vld [vmem:[%s13851_s6 + $0xb60] ss:$8 sps:$4 sm:$0xff]  }
 0x456   :  { %7301 = vmatpush1.bf16.msra.mxu1 %v10917_v31 }
 0x457   :  { %v6238_v24 = vpop.f32.mrb[164].mxu0  ;;  %7492 = vmatprep.subr.bf16.mxu1 %v10922_v6  ;;  %v10955_v6 = vld [vmem:[%s13851_s6 + $0xb74] ss:$8 sps:$4 sm:$0xff]  }
 0x458   :  { %v6245_v57 = vadd.f32 %v6238_v24, %v5846_v2  ;;  %v6240_v46 = vpop.f32.mrb[165].mxu0  ;;  %v10929_v2 = vld [vmem:[%s13851_s6 + $0xa70] ss:$8 sps:$4 sm:$0xff]  }
 0x459   :  { %v6246_v19 = vadd.f32 %v6240_v46, %v5847_v53  ;;  %v6242_v52 = vpop.f32.mrb[166].mxu0  ;;  %9392 = vmatmul.mubr.msk.bf16.vlgmr.msra.gmra.mrb[148].mxu1 %vm3473_vm3, %v7250_v30  ;;  %v10953_v24 = vld [vmem:[%s13851_s6 + $0xb70] ss:$8 sps:$4 sm:$0xff]   ;;  %v10956_v46 = vld [vmem:[%s13851_s6 + $0xbc0] ss:$8 sps:$4 sm:$0xff]  }
 0x45a   :  { %v6243_v4 = vpop.f32.mrb[167].mxu0  ;;  %7493 = vmatpush1.bf16.msra.mxu1 %v10920_v20  ;;  %7524 = vmatprep.mubr.bf16.mxu1 %v10984_v0  ;;  %v10958_v20 = vld [vmem:[%s13851_s6 + $0xbc4] ss:$8 sps:$4 sm:$0xff]   ;;  %v10961_v52 = vld [vmem:[%s13851_s6 + $0xbd4] ss:$8 sps:$4 sm:$0xff]  }
 0x45b   :  { %7494 = vmatprep.subr.bf16.mxu1 %v10925_v14 }
 0x45c   :  { %v4746_v33 = vpop.f32.mrb[96].mxu1 }
 0x45d   :  { %v4753_v55 = vadd.f32 %v4746_v33, %v4357_v42  ;;  %v4748_v12 = vpop.f32.mrb[97].mxu1  ;;  %v10959_v33 = vld [vmem:[%s13851_s6 + $0xbd0] ss:$8 sps:$4 sm:$0xff]  }
 0x45e   :  { %v4754_v49 = vadd.f32 %v4748_v12, %v4358_v59  ;;  %v4750_v29 = vpop.f32.mrb[98].mxu1  ;;  %7495 = vmatpush1.bf16.msra.mxu1 %v10923_v5 }
 0x45f   :  { %v4751_v45 = vpop.f32.mrb[99].mxu1  ;;  %7496 = vmatprep.subr.bf16.mxu1 %v10928_v41 }
 0x460   :  { %v10962_v45 = vld [vmem:[%s13851_s6 + $0xbe0] ss:$8 sps:$4 sm:$0xff]  }
 0x462   :  { %7497 = vmatpush1.bf16.msra.mxu1 %v10926_v54 }
 0x463   :  { %7498 = vmatprep.subr.bf16.mxu1 %v10931_v3 }
 0x466   :  { %7499 = vmatpush1.bf16.msra.mxu1 %v10929_v2  ;;  %v10965_v2 = vld [vmem:[%s13851_s6 + $0xbf0] ss:$8 sps:$4 sm:$0xff]  }
 0x467   :  { %v6435_v17 = vpop.f32.mrb[168].mxu0  ;;  %7692 = vmatprep.subr.bf16.mxu1 %v10934_v48 }
 0x468   :  { %v6442_v53 = vadd.f32 %v6435_v17, %v6044_v34  ;;  %v6437_v44 = vpop.f32.mrb[169].mxu0  ;;  %v10946_v34 = vld [vmem:[%s13851_s6 + $0xb44] ss:$8 sps:$4 sm:$0xff]  }
 0x469   :  { %v6443_v26 = vadd.f32 %v6437_v44, %v6045_v35  ;;  %v6439_v36 = vpop.f32.mrb[170].mxu0  ;;  %9426 = vmatmul.mubr.msk.bf16.vlgmr.msra.gmra.mrb[152].mxu1 %vm3473_vm3, %v7448_v51 }
 0x46a   :  { %v6440_v42 = vpop.f32.mrb[171].mxu0  ;;  %7693 = vmatpush1.bf16.msra.mxu1 %v10932_v38  ;;  %7724 = vmatprep.mubr.bf16.mxu1 %v10984_v0 }
 0x46b   :  { %7694 = vmatprep.subr.bf16.mxu1 %v10937_v28 }
 0x46c   :  { %v4946_v59 = vpop.f32.mrb[100].mxu1 }
 0x46d   :  { %v4953_v16 = vadd.f32 %v4946_v59, %v4555_v62  ;;  %v4948_v22 = vpop.f32.mrb[101].mxu1  ;;  %v10947_v62 = vld [vmem:[%s13851_s6 + $0xb50] ss:$8 sps:$4 sm:$0xff]  }
 0x46e   :  { %v4954_v18 = vadd.f32 %v4948_v22, %v4556_v50  ;;  %v4950_v56 = vpop.f32.mrb[102].mxu1  ;;  %7695 = vmatpush1.bf16.msra.mxu1 %v10935_v40 }
 0x46f   :  { %v4951_v47 = vpop.f32.mrb[103].mxu1  ;;  %7696 = vmatprep.subr.bf16.mxu1 %v10940_v10 }
 0x472   :  { %7697 = vmatpush1.bf16.msra.mxu1 %v10938_v9 }
 0x473   :  { %7698 = vmatprep.subr.bf16.mxu1 %v10943_v39 }
 0x476   :  { %7699 = vmatpush1.bf16.msra.mxu1 %v10941_v27 }
 0x477   :  { %v6633_v1 = vpop.f32.mrb[172].mxu0  ;;  %7890 = vmatprep.subr.bf16.mxu1 %v10946_v34 }
 0x478   :  { %v6640_v37 = vadd.f32 %v6633_v1, %v6245_v57  ;;  %v6635_v35 = vpop.f32.mrb[173].mxu0 }
 0x479   :  { %v6641_v21 = vadd.f32 %v6635_v35, %v6246_v19  ;;  %v6637_v13 = vpop.f32.mrb[174].mxu0  ;;  %9460 = vmatmul.mubr.msk.bf16.vlgmr.msra.gmra.mrb[156].mxu1 %vm3473_vm3, %v7648_v11  ;;  %v7846_v19 = vpack.c.b16 %v12593_v23, %v12593_v23  ;;  %v10964_v23 = vld [vmem:[%s13851_s6 + $0xbe4] ss:$8 sps:$4 sm:$0xff]  }
 0x47a   :  { %v6638_v7 = vpop.f32.mrb[175].mxu0  ;;  %7891 = vmatpush1.bf16.msra.mxu1 %v10944_v43  ;;  %7922 = vmatprep.mubr.bf16.mxu1 %v10984_v0 }
 0x47b   :  { %7892 = vmatprep.subr.bf16.mxu1 %v10949_v60 }
 0x47c   :  { %v5144_v61 = vpop.f32.mrb[104].mxu1 }
 0x47d   :  { %v5151_v50 = vadd.f32 %v5144_v61, %v4753_v55  ;;  %v5146_v63 = vpop.f32.mrb[105].mxu1 }
 0x47e   :  { %v5152_v58 = vadd.f32 %v5146_v63, %v4754_v49  ;;  %v5148_v32 = vpop.f32.mrb[106].mxu1  ;;  %7893 = vmatpush1.bf16.msra.mxu1 %v10947_v62 }
 0x47f   :  { %v5149_v31 = vpop.f32.mrb[107].mxu1  ;;  %7894 = vmatprep.subr.bf16.mxu1 %v10952_v8 }
 0x482   :  { %7895 = vmatpush1.bf16.msra.mxu1 %v10950_v15 }
 0x483   :  { %7896 = vmatprep.subr.bf16.mxu1 %v10955_v6 }
 0x486   :  { %7897 = vmatpush1.bf16.msra.mxu1 %v10953_v24 }
 0x487   :  { %v6831_v57 = vpop.f32.mrb[176].mxu0  ;;  %8088 = vmatprep.subr.bf16.mxu1 %v10958_v20 }
 0x488   :  { %v6838_v30 = vadd.f32 %v6831_v57, %v6442_v53  ;;  %v6833_v14 = vpop.f32.mrb[177].mxu0  ;;  %v8044_v53 = vpack.c.b16 %v12603_v25, %v12603_v25 }
 0x489   :  { %v6839_v4 = vadd.f32 %v6833_v14, %v6443_v26  ;;  %v6835_v5 = vpop.f32.mrb[178].mxu0  ;;  %9494 = vmatmul.mubr.msk.bf16.vlgmr.msra.gmra.mrb[160].mxu1 %vm3473_vm3, %v7846_v19 }
 0x48a   :  { %v6836_v41 = vpop.f32.mrb[179].mxu0  ;;  %8089 = vmatpush1.bf16.msra.mxu1 %v10956_v46  ;;  %8120 = vmatprep.mubr.bf16.mxu1 %v10984_v0  ;;  %v10967_v0 = vld [vmem:[%s13851_s6 + $0xbf4] ss:$8 sps:$4 sm:$0xff]  }
 0x48b   :  { %8090 = vmatprep.subr.bf16.mxu1 %v10961_v52  ;;  %v10968_v52 = vld [vmem:[%s13853_s8 + $0x40] sm:$0xff]  }
 0x48c   :  { %v5342_v55 = vpop.f32.mrb[108].mxu1 }
 0x48d   :  { %v5349_v12 = vadd.f32 %v5342_v55, %v4953_v16  ;;  %v5344_v49 = vpop.f32.mrb[109].mxu1 }
 0x48e   :  { %v5350_v29 = vadd.f32 %v5344_v49, %v4954_v18  ;;  %v5346_v54 = vpop.f32.mrb[110].mxu1  ;;  %8091 = vmatpush1.bf16.msra.mxu1 %v10959_v33 }
 0x48f   :  { %v5347_v3 = vpop.f32.mrb[111].mxu1  ;;  %8092 = vmatprep.subr.bf16.mxu1 %v10964_v23 }
 0x492   :  { %8093 = vmatpush1.bf16.msra.mxu1 %v10962_v45 }
 0x493   :  { %8094 = vmatprep.subr.bf16.mxu1 %v10967_v0  ;;  %v10969_v0 = vld [vmem:[%s13853_s8] sm:$0xff]  }
 0x496   :  { %8095 = vmatpush1.bf16.msra.mxu1 %v10965_v2  ;;  %v10970_v2 = vld [vmem:[%s13853_s8 + $0x48] sm:$0xff]  }
 0x497   :  { %v7031_v48 = vpop.f32.mrb[180].mxu0  ;;  %9756 = vmatprep.subr.bf16.mxu1 %v10968_v52 }
 0x498   :  { %v7038_v17 = vadd.f32 %v7031_v48, %v6640_v37  ;;  %v7033_v38 = vpop.f32.mrb[181].mxu0  ;;  %v10971_v48 = vld [vmem:[%s13853_s8 + $0x8] sm:$0xff]  }
 0x499   :  { %v7039_v44 = vadd.f32 %v7033_v38, %v6641_v21  ;;  %v7035_v51 = vpop.f32.mrb[182].mxu0  ;;  %9528 = vmatmul.mubr.msk.bf16.vlgmr.msra.gmra.mrb[164].mxu1 %vm3473_vm3, %v8044_v53  ;;  %v10973_v38 = vld [vmem:[%s13853_s8 + $0x10] sm:$0xff]  }
 0x49a   :  { %v7036_v28 = vpop.f32.mrb[183].mxu0  ;;  %9757 = vmatpush3.bf16.msra.mxu1 %v10969_v0 }
 0x49b   :  { %9758 = vmatprep.subr.bf16.mxu1 %v10970_v2 }
 0x49c   :  { %v5543_v26 = vpop.f32.mrb[112].mxu1 }
 0x49d   :  { %v5550_v36 = vadd.f32 %v5543_v26, %v5151_v50  ;;  %v5545_v42 = vpop.f32.mrb[113].mxu1 }
 0x49e   :  { %v5551_v40 = vadd.f32 %v5545_v42, %v5152_v58  ;;  %v5547_v10 = vpop.f32.mrb[114].mxu1  ;;  %9759 = vmatpush3.bf16.msra.mxu1 %v10971_v48 }
 0x49f   :  { %v5548_v59 = vpop.f32.mrb[115].mxu1  ;;  %v10976_v10 = vld [vmem:[%s13853_s8 + $0x60] sm:$0xff]  }
 0x4a7   :  { %v7229_v16 = vpop.f32.mrb[184].mxu0 }
 0x4a8   :  { %v7236_v22 = vadd.f32 %v7229_v16, %v6838_v30  ;;  %v7231_v18 = vpop.f32.mrb[185].mxu0 }
 0x4a9   :  { %v7237_v56 = vadd.f32 %v7231_v18, %v6839_v4  ;;  %v7233_v9 = vpop.f32.mrb[186].mxu0 }
 0x4aa   :  { %v7234_v47 = vpop.f32.mrb[187].mxu0 }
 0x4ab   :  { %v10977_v47 = vld [vmem:[%s13853_s8 + $0x20] sm:$0xff]  }
 0x4ac   :  { %v5740_v39 = vpop.f32.mrb[116].mxu1 }
 0x4ad   :  { %v5747_v27 = vadd.f32 %v5740_v39, %v5349_v12  ;;  %v5742_v25 = vpop.f32.mrb[117].mxu1  ;;  %v10978_v39 = vld [vmem:[%s13853_s8 + $0x68] sm:$0xff]  }
 0x4ae   :  { %v5748_v34 = vadd.f32 %v5742_v25, %v5350_v29  ;;  %v5744_v1 = vpop.f32.mrb[118].mxu1 }
 0x4af   :  { %v5745_v43 = vpop.f32.mrb[119].mxu1  ;;  %v10979_v1 = vld [vmem:[%s13853_s8 + $0x28] sm:$0xff]  }
 0x4b7   :  { %v7427_v37 = vpop.f32.mrb[188].mxu0 }
 0x4b8   :  { %v7434_v35 = vadd.f32 %v7427_v37, %v7038_v17  ;;  %v7429_v11 = vpop.f32.mrb[189].mxu0  ;;  %v10972_v17 = vld [vmem:[%s13853_s8 + $0x50] sm:$0xff]  }
 0x4b9   :  { %v7435_v60 = vadd.f32 %v7429_v11, %v7039_v44  ;;  %v7431_v21 = vpop.f32.mrb[190].mxu0  ;;  %9760 = vmatprep.subr.bf16.mxu1 %v10972_v17  ;;  %v10974_v44 = vld [vmem:[%s13853_s8 + $0x58] sm:$0xff]  }
 0x4ba   :  { %v7432_v13 = vpop.f32.mrb[191].mxu0  ;;  %9761 = vmatpush3.bf16.msra.mxu1 %v10973_v38 }
 0x4bb   :  { %9762 = vmatprep.subr.bf16.mxu1 %v10974_v44  ;;  %v10982_v13 = vld [vmem:[%s13853_s8 + $0x78] sm:$0xff]  }
 0x4bc   :  { %v5938_v7 = vpop.f32.mrb[120].mxu1 }
 0x4bd   :  { %v5945_v62 = vadd.f32 %v5938_v7, %v5550_v36  ;;  %v5940_v8 = vpop.f32.mrb[121].mxu1 }
 0x4be   :  { %v5946_v61 = vadd.f32 %v5940_v8, %v5551_v40  ;;  %v5942_v50 = vpop.f32.mrb[122].mxu1  ;;  %v10975_v40 = vld [vmem:[%s13853_s8 + $0x18] sm:$0xff]  }
 0x4bf   :  { %v5943_v63 = vpop.f32.mrb[123].mxu1  ;;  %9763 = vmatpush3.bf16.msra.mxu1 %v10975_v40 }
 0x4c0   :  { %9764 = vmatprep.subr.bf16.mxu1 %v10976_v10  ;;  %v10983_v63 = vld [vmem:[%s13853_s8 + $0x38] sm:$0xff]  }
 0x4c3   :  { %9765 = vmatpush3.bf16.msra.mxu1 %v10977_v47 }
 0x4c4   :  { %9766 = vmatprep.subr.bf16.mxu1 %v10978_v39 }
 0x4c7   :  { %v7628_v58 = vpop.f32.mrb[192].mxu0  ;;  %9767 = vmatpush3.bf16.msra.mxu1 %v10979_v1 }
 0x4c8   :  { %v7635_v32 = vadd.f32 %v7628_v58, %v7236_v22  ;;  %v7630_v15 = vpop.f32.mrb[193].mxu0 }
 0x4c9   :  { %v7636_v31 = vadd.f32 %v7630_v15, %v7237_v56  ;;  %v7632_v6 = vpop.f32.mrb[194].mxu0 }
 0x4ca   :  { %v7633_v24 = vpop.f32.mrb[195].mxu0 }
 0x4cc   :  { %v6136_v20 = vpop.f32.mrb[124].mxu1 }
 0x4cd   :  { %v6143_v57 = vadd.f32 %v6136_v20, %v5747_v27  ;;  %v6138_v46 = vpop.f32.mrb[125].mxu1 }
 0x4ce   :  { %v6144_v30 = vadd.f32 %v6138_v46, %v5748_v34  ;;  %v6140_v14 = vpop.f32.mrb[126].mxu1 }
 0x4cf   :  { %v6141_v19 = vpop.f32.mrb[127].mxu1 }
 0x4d7   :  { %v7825_v4 = vpop.f32.mrb[196].mxu0 }
 0x4d8   :  { %v7832_v5 = vadd.f32 %v7825_v4, %v7434_v35  ;;  %v7827_v41 = vpop.f32.mrb[197].mxu0  ;;  %v10980_v35 = vld [vmem:[%s13853_s8 + $0x70] sm:$0xff]  }
 0x4d9   :  { %v7833_v33 = vadd.f32 %v7827_v41, %v7435_v60  ;;  %v7829_v23 = vpop.f32.mrb[198].mxu0  ;;  %v10981_v60 = vld [vmem:[%s13853_s8 + $0x30] sm:$0xff]   ;;  %9768 = vmatprep.subr.bf16.mxu1 %v10980_v35 }
 0x4da   :  { %v7830_v55 = vpop.f32.mrb[199].mxu0  ;;  %9769 = vmatpush3.bf16.msra.mxu1 %v10981_v60 }
 0x4db   :  { %9770 = vmatprep.subr.bf16.mxu1 %v10982_v13 }
 0x4dc   :  { %v6336_v12 = vpop.f32.mrb[128].mxu1 }
 0x4dd   :  { %v6343_v49 = vadd.f32 %v6336_v12, %v5945_v62  ;;  %v6338_v29 = vpop.f32.mrb[129].mxu1 }
 0x4de   :  { %v6344_v54 = vadd.f32 %v6338_v29, %v5946_v61  ;;  %v6340_v45 = vpop.f32.mrb[130].mxu1  ;;  %9771 = vmatpush3.bf16.msra.mxu1 %v10983_v63 }
 0x4df   :  { %v6341_v3 = vpop.f32.mrb[131].mxu1 }
 0x4e7   :  { %v8023_v53 = vpop.f32.mrb[200].mxu0 }
 0x4e8   :  { %v13804_v51 = vadd.f32 %v8023_v53, %v7635_v32  ;;  %v8025_v28 = vpop.f32.mrb[201].mxu0 }
 0x4e9   :  { %v13806_v26 = vadd.f32 %v8025_v28, %v7636_v31  ;;  %v8027_v36 = vpop.f32.mrb[202].mxu0 }
 0x4ea   :  { %v8028_v42 = vpop.f32.mrb[203].mxu0 }
 0x4ec   :  { %v6534_v59 = vpop.f32.mrb[132].mxu1 }
 0x4ed   :  { %v6541_v16 = vadd.f32 %v6534_v59, %v6143_v57  ;;  %v6536_v22 = vpop.f32.mrb[133].mxu1 }
 0x4ee   :  { %v6542_v18 = vadd.f32 %v6536_v22, %v6144_v30  ;;  %v6538_v56 = vpop.f32.mrb[134].mxu1 }
 0x4ef   :  { %v6539_v9 = vpop.f32.mrb[135].mxu1 }
 0x4f0   :  { %v8236_v9 = vld [vmem:[%s13854_s7] sm:$0x3] }
 0x4f7   :  { %v8221_v27 = vpop.f32.mrb[204].mxu0 }
 0x4f8   :  { %v8228_v25 = vadd.f32 %v8221_v27, %v7832_v5  ;;  %v8223_v34 = vpop.f32.mrb[205].mxu0 }
 0x4f9   :  { %v8229_v43 = vadd.f32 %v8223_v34, %v7833_v33  ;;  %v8225_v37 = vpop.f32.mrb[206].mxu0 }
 0x4fa   :  { %v8226_v11 = vpop.f32.mrb[207].mxu0 }
 0x4fc   :  { %v6732_v21 = vpop.f32.mrb[136].mxu1 }
 0x4fd   :  { %v6739_v7 = vadd.f32 %v6732_v21, %v6343_v49  ;;  %v6734_v62 = vpop.f32.mrb[137].mxu1 }
 0x4fe   :  { %v6740_v8 = vadd.f32 %v6734_v62, %v6344_v54  ;;  %v6736_v61 = vpop.f32.mrb[138].mxu1 }
 0x4ff   :  { %v6737_v50 = vpop.f32.mrb[139].mxu1 }
 0x50c   :  { %v6933_v58 = vpop.f32.mrb[140].mxu1 }
 0x50d   :  { %v6940_v32 = vadd.f32 %v6933_v58, %v6541_v16  ;;  %v6935_v15 = vpop.f32.mrb[141].mxu1  ;;  %v8238_v16 = vlaneseq }
 0x50e   :  { %v6941_v31 = vadd.f32 %v6935_v15, %v6542_v18  ;;  %v6937_v6 = vpop.f32.mrb[142].mxu1 }
 0x50f   :  { %v6938_v24 = vpop.f32.mrb[143].mxu1  ;;  %v8239_v22 = vshrl.u32 %v8238_v16, 7 }
 0x511   :  { %v8240_v18 = vsub.s32 0, %v8239_v22  ;;  %v8244_v47 = vsub.s32 1, %v8239_v22 }
 0x513   :  { %v8241_v35 = vrot.slane %v8236_v9, %v8240_v18 }
 0x51c   :  { %v7130_v20 = vpop.f32.mrb[144].mxu1 }
 0x51d   :  { %v7137_v57 = vadd.f32 %v7130_v20, %v6739_v7  ;;  %v7132_v46 = vpop.f32.mrb[145].mxu1 }
 0x51e   :  { %v7138_v30 = vadd.f32 %v7132_v46, %v6740_v8  ;;  %v7134_v14 = vpop.f32.mrb[146].mxu1 }
 0x51f   :  { %v7135_v19 = vpop.f32.mrb[147].mxu1 }
 0x52c   :  { %v7328_v52 = vpop.f32.mrb[148].mxu1 }
 0x52d   :  { %v7335_v4 = vadd.f32 %v7328_v52, %v6940_v32  ;;  %v7330_v5 = vpop.f32.mrb[149].mxu1 }
 0x52e   :  { %v7336_v41 = vadd.f32 %v7330_v5, %v6941_v31  ;;  %v7332_v33 = vpop.f32.mrb[150].mxu1 }
 0x52f   :  { %v7333_v23 = vpop.f32.mrb[151].mxu1 }
 0x53c   :  { %v7526_v55 = vpop.f32.mrb[152].mxu1 }
 0x53d   :  { %v7533_v12 = vadd.f32 %v7526_v55, %v7137_v57  ;;  %v7528_v49 = vpop.f32.mrb[153].mxu1 }
 0x53e   :  { %v7534_v29 = vadd.f32 %v7528_v49, %v7138_v30  ;;  %v7530_v54 = vpop.f32.mrb[154].mxu1 }
 0x53f   :  { %v7531_v45 = vpop.f32.mrb[155].mxu1 }
 0x54c   :  { %v7726_v3 = vpop.f32.mrb[156].mxu1 }
 0x54d   :  { %v7733_v0 = vadd.f32 %v7726_v3, %v7335_v4  ;;  %v7728_v2 = vpop.f32.mrb[157].mxu1 }
 0x54e   :  { %v7734_v48 = vadd.f32 %v7728_v2, %v7336_v41  ;;  %v7730_v17 = vpop.f32.mrb[158].mxu1 }
 0x54f   :  { %v7731_v38 = vpop.f32.mrb[159].mxu1 }
 0x55c   :  { %v7924_v53 = vpop.f32.mrb[160].mxu1 }
 0x55d   :  { %v7931_v44 = vadd.f32 %v7924_v53, %v7533_v12  ;;  %v7926_v28 = vpop.f32.mrb[161].mxu1 }
 0x55e   :  { %v7932_v36 = vadd.f32 %v7926_v28, %v7534_v29  ;;  %v7928_v42 = vpop.f32.mrb[162].mxu1 }
 0x55f   :  { %v8230_v40 = vadd.f32 %v8228_v25, %v7931_v44  ;;  %v7929_v10 = vpop.f32.mrb[163].mxu1 }
 0x560   :  { %v8231_v59 = vadd.f32 %v8229_v43, %v7932_v36  ;;  %v8245_v43 = vrot.slane %v8236_v9, %v8244_v47 }
 0x56c   :  { %v8122_v56 = vpop.f32.mrb[164].mxu1 }
 0x56d   :  { %v8129_v39 = vadd.f32 %v8122_v56, %v7733_v0  ;;  %v8124_v27 = vpop.f32.mrb[165].mxu1 }
 0x56e   :  { %v8130_v34 = vadd.f32 %v8124_v27, %v7734_v48  ;;  %v8126_v1 = vpop.f32.mrb[166].mxu1 }
 0x56f   :  { %v8232_v37 = vadd.f32 %v8129_v39, %v13804_v51  ;;  %v8127_v11 = vpop.f32.mrb[167].mxu1  ;;  %v9546_v51 = vld [vmem:[%s13855_s9] ss:$0 sm:$0xff] }
 0x570   :  { %v8233_v25 = vadd.f32 %v8130_v34, %v13806_v26 }
 0x571   :  { %v8234_v60 = vadd.f32 %v8232_v37, %v8230_v40 }
 0x572   :  { %v8235_v21 = vadd.f32 %v8233_v25, %v8231_v59 }
 0x573   :  { %v8248_v13 = vadd.f32 %v8241_v35, %v8234_v60 }
 0x574   :  { %v8249_v7 = vadd.f32 %v8245_v43, %v8235_v21 }
 0x575   :  { %v8250_v62 = vmax.f32 %v8248_v13, 0.0 }
 0x576   :  { %v8251_v8 = vmax.f32 %v8249_v7, 0.0 }
 0x577   :  { %v8252_v50 = vpack.c.bf16 %v8250_v62, %v8250_v62 }
 0x578   :  { %v8253_v61 = vpack.c.bf16 %v8251_v8, %v8251_v8 }
 0x57a   :  { %8421 = vmatprep.mubr.bf16.mxu1 %v8253_v61 }
 0x57b   :  { %8422 = vmatmul.mubr.bf16.vlgmr.msra.gmra.mrb[168].mxu1 %v8252_v50 }
 0x64e   :  { %v9772_v63 = vpop.f32.mrb[168].mxu1 }
 0x64f   :  { %v9773_v58 = vpop.f32.mrb[169].mxu1 }
 0x650   :  { %v9774_v32 = vadd.f32 %v9773_v58, %v9772_v63  ;;  %v9775_v15 = vpop.f32.mrb[170].mxu1 }
 0x651   :  { %v9776_v26 = vpop.f32.mrb[171].mxu1 }
 0x652   :  { %v8424_v31 = vadd.f32 %v9774_v32, %v9546_v51 }
 0x654   :  { %8429 = vst [vmem:[%s13856_s10] sm:$0x3] %v8424_v31 }

</bundles_post_ra>
